<compile_context>
chip_gen: v7x
topology: tpu7x:2x2x1
jax: 0.10.0
libtpu: 0.0.40
codegen_flags: <defaults>
</compile_context>

<pallas_src>
import functools

import jax
import jax.numpy as jnp
from jax import lax
from jax.experimental import pallas as pl
from jax.experimental.pallas import tpu as pltpu

NEG_SLOPE = 0.01   # nn.LeakyReLU default
EPS = 1e-5         # nn.BatchNorm2d default


def _leaky(x):
    return jnp.where(x >= 0, x, NEG_SLOPE * x)


def _ru(x, m):
    return -(-x // m) * m


# --------------------------------------------------------------------------
# Fused Stage kernel: HeadConv (3x3 s2 p1 + 1x1 s2, BN folded) followed by
# `num` BodyConv blocks (BN + DW1x1 + DW3x3 + DW5x5 folded into one effective
# 5x5 depthwise kernel each), all LeakyReLU, activation resident in VMEM.
# --------------------------------------------------------------------------
def _stage_kernel(xph_ref, wh_ref, bh_ref, wb_ref, bb_ref, o_ref, xbuf,
                  *, cin, cout, num, h2, w2):
    """One image per grid step.

    xph_ref: (1, h2+1, 4*cin, w2+1)  polyphase input (planes on sublanes,
                                     W on lanes).
    wh_ref : (cin*9, cout, 1)        folded head weights (1x1 merged into
                                     the center tap), per-tap sublane vectors.
    bh_ref : (cout, 1)               folded head bias.
    wb_ref : (max(num,1)*25, cout, 1) folded effective 5x5 depthwise weights.
    bb_ref : (max(num,1), cout, 1)    folded body biases.
    o_ref  : (1, h2, cout, w2)       output block (wrapper transposes to NCHW).
    xbuf   : VMEM scratch (h2+4, cout, w2+4) -- activation with 2-wide zero halo.
    """
    f32 = jnp.float32

    # Zero only the 4 halo strips; the interior is always fully overwritten.
    xbuf[pl.ds(0, 2), :, :] = jnp.zeros((2, cout, w2 + 4), f32)
    xbuf[pl.ds(h2 + 2, 2), :, :] = jnp.zeros((2, cout, w2 + 4), f32)
    xbuf[:, :, pl.ds(0, 2)] = jnp.zeros((h2 + 4, cout, 2), f32)
    xbuf[:, :, pl.ds(w2 + 2, 2)] = jnp.zeros((h2 + 4, cout, 2), f32)

    # ---------------- HeadConv: 3x3 s2 p1 (+ 1x1 s2 folded into tap 4) -------
    # One vector MAC over (h2, cout, w2) per (ci, tap): the (cout, 1) weight
    # column broadcasts along lanes, the (h2, 1, w2) patch along sublanes.
    def head_ci(ci, acc):
        for kh in range(3):
            for kw in range(3):
                p = ((kh % 2) * 2 + (kw % 2)) * cin + ci
                patch = xph_ref[0, pl.ds(kh // 2, h2), pl.ds(p, 1),
                                pl.ds(kw // 2, w2)]            # (h2, 1, w2)
                w_col = wh_ref[ci * 9 + kh * 3 + kw]           # (cout, 1)
                acc = acc + w_col * patch.astype(f32)
        return acc

    acc = lax.fori_loop(0, cin, head_ci, jnp.zeros((h2, cout, w2), f32))
    xbuf[pl.ds(2, h2), :, pl.ds(2, w2)] = _leaky(acc + bh_ref[...])

    # ---------------- num x BodyConv: effective 5x5 depthwise ----------------
    # Channel-vectorized: one (h2, cout, w2) MAC per tap; 5 strip loads per
    # block (one per kh), kw offsets are in-register lane slices of the strip.
    if num > 0:
        @pl.loop(0, num)
        def _(blk):
            acc = jnp.zeros((h2, cout, w2), f32)
            for kh in range(5):
                strip = xbuf[pl.ds(kh, h2), :, :]              # (h2, cout, w2+4)
                for kw in range(5):
                    w_col = wb_ref[blk * 25 + kh * 5 + kw]     # (cout, 1)
                    acc = acc + w_col * strip[:, :, kw:kw + w2]
            xbuf[pl.ds(2, h2), :, pl.ds(2, w2)] = _leaky(acc + bb_ref[blk])

    # Single HBM write, lane-dense (W on lanes, channels on sublanes).
    o_ref[0] = xbuf[pl.ds(2, h2), :, pl.ds(2, w2)].astype(o_ref.dtype)


def stage_forward(x_nchw, params):
    """x_nchw: (N, Cin, H, W) float32 -> (N, Cout, H2, W2) NCHW."""
    N, Cin, H, W = x_nchw.shape
    Cout, num = params["cout"], params["num"]
    H2, W2 = (H - 1) // 2 + 1, (W - 1) // 2 + 1
    Hp, Wp = 2 * (H2 + 1), 2 * (W2 + 1)
    nblk = max(num, 1)

    # Pad 1 on top/left for the 3x3 s2 p1 conv; extend bottom/right with zeros
    # so the padded size splits exactly into 2x2 polyphase components:
    #   xph[n, a, (ph*2+pw)*Cin + ci, b] = xp[n, ci, 2a+ph, 2b+pw]
    xp = jnp.pad(x_nchw, ((0, 0), (0, 0), (1, Hp - H - 1), (1, Wp - W - 1)))
    xph = xp.reshape(N, Cin, H2 + 1, 2, W2 + 1, 2)
    xph = jnp.transpose(xph, (0, 2, 3, 5, 1, 4)).reshape(
        N, H2 + 1, 4 * Cin, W2 + 1)

    kernel = functools.partial(_stage_kernel, cin=Cin, cout=Cout, num=num,
                               h2=H2, w2=W2)

    # Scoped-VMEM budget: scratch + double-buffered in/out blocks + weights
    # (tile-padded to (8, 128)), plus headroom; clamp to v7x's 64 MiB.
    vmem_bytes = 4 * (
        (H2 + 4) * _ru(Cout, 8) * _ru(W2 + 4, 128)
        + 2 * (H2 + 1) * _ru(4 * Cin, 8) * _ru(W2 + 1, 128)
        + 2 * H2 * _ru(Cout, 8) * _ru(W2, 128)
        + 2 * (Cin * 9 + nblk * 26 + 1) * _ru(Cout, 8) * 128
    ) + (4 << 20)
    vmem_bytes = int(min(max(vmem_bytes, 16 << 20), 64 << 20))

    y = pl.pallas_call(
        kernel,
        out_shape=jax.ShapeDtypeStruct((N, H2, Cout, W2), x_nchw.dtype),
        grid=(N,),
        in_specs=[
            pl.BlockSpec((1, H2 + 1, 4 * Cin, W2 + 1), lambda n: (n, 0, 0, 0)),
            pl.BlockSpec((Cin * 9, Cout, 1), lambda n: (0, 0, 0)),
            pl.BlockSpec((Cout, 1), lambda n: (0, 0)),
            pl.BlockSpec((nblk * 25, Cout, 1), lambda n: (0, 0, 0)),
            pl.BlockSpec((nblk, Cout, 1), lambda n: (0, 0, 0)),
        ],
        out_specs=pl.BlockSpec((1, H2, Cout, W2), lambda n: (n, 0, 0, 0)),
        scratch_shapes=[pltpu.VMEM((H2 + 4, Cout, W2 + 4), jnp.float32)],
        compiler_params=pltpu.CompilerParams(
            dimension_semantics=("parallel",),
            vmem_limit_bytes=vmem_bytes),
    )(xph, params["w_head_v"], params["b_head_v"],
      params["w_body_v"], params["b_body_v"])

    # Layout plumbing back to NCHW (kernel output stays lane-dense / no
    # in-kernel relayout of the final activation).
    return jnp.transpose(y, (0, 2, 1, 3))


# --------------------------------------------------------------------------
# Deterministic parameter construction + BN folding (eval-mode BN)
# --------------------------------------------------------------------------
def _bn_fold(gamma, beta, mean, var):
    a = gamma / jnp.sqrt(var + EPS)
    return a, beta - a * mean


def _rand_bn(key, c):
    k1, k2, k3, k4 = jax.random.split(key, 4)
    gamma = 1.0 + 0.1 * jax.random.normal(k1, (c,), jnp.float32)
    beta = 0.1 * jax.random.normal(k2, (c,), jnp.float32)
    mean = 0.1 * jax.random.normal(k3, (c,), jnp.float32)
    var = jax.random.uniform(k4, (c,), jnp.float32, 0.5, 1.5)
    return gamma, beta, mean, var


def init_stage_params(key, cin, cout, num):
    keys = jax.random.split(key, 1 + max(num, 1))

    # ---- HeadConv: Conv3x3(s2,p1)+BN  +  Conv1x1(s2)+BN, folded together ----
    kh = jax.random.split(keys[0], 6)
    w3 = 0.2 * jax.random.normal(kh[0], (cout, cin, 3, 3), jnp.float32)
    cb3 = 0.1 * jax.random.normal(kh[1], (cout,), jnp.float32)
    w1 = 0.2 * jax.random.normal(kh[2], (cout, cin, 1, 1), jnp.float32)
    cb1 = 0.1 * jax.random.normal(kh[3], (cout,), jnp.float32)
    g3, b3, m3, v3 = _rand_bn(kh[4], cout)
    g1, b1, m1, v1 = _rand_bn(kh[5], cout)
    a3, d3 = _bn_fold(g3, b3, m3, v3)
    a1, d1 = _bn_fold(g1, b1, m1, v1)
    w3f = w3 * a3[:, None, None, None]                       # (Cout,Cin,3,3)
    w1f = w1[:, :, 0, 0] * a1[:, None]                       # (Cout,Cin)
    whk = w3f.reshape(cout, cin, 9)
    whk = whk.at[:, :, 4].add(w1f)                           # 1x1 -> center tap
    # (cout, cin, 9) -> (cin*9, cout, 1): per-tap sublane weight vectors.
    w_head_v = jnp.transpose(whk, (1, 2, 0)).reshape(cin * 9, cout)[:, :, None]
    b_head_v = (a3 * cb3 + d3 + a1 * cb1 + d1)[:, None]       # (cout, 1)

    # ---- BodyConv blocks: BN + DW1x1+BN + DW3x3+BN + DW5x5+BN folded into
    #      one effective 5x5 depthwise kernel + bias per block. ----
    w_list, b_list = [], []
    for i in range(num):
        kb = jax.random.split(keys[1 + i], 10)
        dw1 = 0.3 * jax.random.normal(kb[0], (cout, 1, 1, 1), jnp.float32)
        cbd1 = 0.1 * jax.random.normal(kb[1], (cout,), jnp.float32)
        dw3 = 0.3 * jax.random.normal(kb[2], (cout, 1, 3, 3), jnp.float32)
        cbd3 = 0.1 * jax.random.normal(kb[3], (cout,), jnp.float32)
        dw5 = 0.3 * jax.random.normal(kb[4], (cout, 1, 5, 5), jnp.float32)
        cbd5 = 0.1 * jax.random.normal(kb[5], (cout,), jnp.float32)
        g0, be0, m0, v0 = _rand_bn(kb[6], cout)                # standalone bn
        gg1, bb1, mm1, vv1 = _rand_bn(kb[7], cout)
        gg3, bb3, mm3, vv3 = _rand_bn(kb[8], cout)
        gg5, bb5, mm5, vv5 = _rand_bn(kb[9], cout)
        a0, d0 = _bn_fold(g0, be0, m0, v0)
        s1, t1 = _bn_fold(gg1, bb1, mm1, vv1)
        s3, t3 = _bn_fold(gg3, bb3, mm3, vv3)
        s5, t5 = _bn_fold(gg5, bb5, mm5, vv5)

        w_eff = jnp.zeros((cout, 5, 5), jnp.float32)
        w_eff = w_eff.at[:, 2, 2].add(a0 + s1 * dw1[:, 0, 0, 0])
        w_eff = w_eff.at[:, 1:4, 1:4].add(dw3[:, 0] * s3[:, None, None])
        w_eff = w_eff + dw5[:, 0] * s5[:, None, None]
        b_eff = d0 + s1 * cbd1 + t1 + s3 * cbd3 + t3 + s5 * cbd5 + t5
        # (cout, 5, 5) -> (25, cout): per-tap sublane weight vectors.
        w_list.append(jnp.transpose(w_eff, (1, 2, 0)).reshape(25, cout))
        b_list.append(b_eff[None, :])

    if num > 0:
        w_body_v = jnp.concatenate(w_list, axis=0)[:, :, None]  # (num*25,cout,1)
        b_body_v = jnp.concatenate(b_list, axis=0)[:, :, None]  # (num,cout,1)
    else:
        w_body_v = jnp.zeros((25, cout, 1), jnp.float32)
        b_body_v = jnp.zeros((1, cout, 1), jnp.float32)

    return {"w_head_v": w_head_v, "b_head_v": b_head_v,
            "w_body_v": w_body_v, "b_body_v": b_body_v,
            "cin": cin, "cout": cout, "num": num}


# --------------------------------------------------------------------------
# Pure-JAX reference (on the same folded params) for a correctness check.
# --------------------------------------------------------------------------
def stage_reference(x_nchw, params):
    cin, cout, num = params["cin"], params["cout"], params["num"]
    w_h = params["w_head_v"][:, :, 0].reshape(cin, 3, 3, cout)
    w_h = jnp.transpose(w_h, (3, 0, 1, 2))                    # OIHW
    y = lax.conv_general_dilated(
        x_nchw, w_h, window_strides=(2, 2), padding=((1, 1), (1, 1)),
        dimension_numbers=("NCHW", "OIHW", "NCHW"))
    y = _leaky(y + params["b_head_v"][:, 0].reshape(1, cout, 1, 1))
    if num > 0:
        w_b = params["w_body_v"][:, :, 0].reshape(num, 5, 5, cout)
        w_b = jnp.transpose(w_b, (0, 3, 1, 2))                # (num,cout,5,5)
        b_b = params["b_body_v"][:, :, 0]                     # (num,cout)
        for blk in range(num):
            z = lax.conv_general_dilated(
                y, w_b[blk][:, None], window_strides=(1, 1),
                padding=((2, 2), (2, 2)),
                dimension_numbers=("NCHW", "OIHW", "NCHW"),
                feature_group_count=cout)
            y = _leaky(z + b_b[blk].reshape(1, cout, 1, 1))
    return y


if __name__ == "__main__":
    key = jax.random.PRNGKey(0)
    k_x, k_p = jax.random.split(key)

    N, Cin, H, W = 2, 4, 16, 16
    Cout, num = 8, 2

    x = jax.random.normal(k_x, (N, Cin, H, W), jnp.float32)
    params = init_stage_params(k_p, Cin, Cout, num)

    out = jax.block_until_ready(stage_forward(x, params))
    ref = jax.block_until_ready(stage_reference(x, params))

    assert out.shape == (N, Cout, H // 2, W // 2), out.shape
    max_err = float(jnp.max(jnp.abs(out - ref)))
    assert jnp.allclose(out, ref, atol=2e-4, rtol=2e-4), max_err

    print("KERNEL_OK")
</pallas_src>

<mosaic_0001>
module attributes {stable_mosaic.version = 11 : i64} {
  func.func @_stage_kernel(%arg0: i32, %arg1: memref<1x9x16x9xf32, #tpu.memory_space<vmem>>, %arg2: memref<36x8x1xf32, #tpu.memory_space<vmem>>, %arg3: memref<8x1xf32, #tpu.memory_space<vmem>>, %arg4: memref<50x8x1xf32, #tpu.memory_space<vmem>>, %arg5: memref<2x8x1xf32, #tpu.memory_space<vmem>>, %arg6: memref<1x8x8x8xf32, #tpu.memory_space<vmem>>, %arg7: memref<12x8x12xf32, #tpu.memory_space<vmem>>) attributes {dimension_semantics = [#tpu.dimension_semantics<parallel>], iteration_bounds = array<i64: 2>, scalar_prefetch = 0 : i64, scratch_operands = 1 : i64, tpu.core_type = #tpu.core_type<tc>, window_params = [{transform_indices = @transform_0, window_bounds = array<i64: 1, 9, 16, 9>}, {pipeline_mode = #tpu.pipeline_mode<synchronous>, transform_indices = @transform_1, window_bounds = array<i64: 36, 8, 1>}, {pipeline_mode = #tpu.pipeline_mode<synchronous>, transform_indices = @transform_2, window_bounds = array<i64: 8, 1>}, {pipeline_mode = #tpu.pipeline_mode<synchronous>, transform_indices = @transform_3, window_bounds = array<i64: 50, 8, 1>}, {pipeline_mode = #tpu.pipeline_mode<synchronous>, transform_indices = @transform_4, window_bounds = array<i64: 2, 8, 1>}, {transform_indices = @transform_5, window_bounds = array<i64: 1, 8, 8, 8>}]} {
    %cst = arith.constant 0.000000e+00 : f32
    %0 = vector.broadcast %cst : f32 to vector<2x8x12xf32>
    %c0 = arith.constant 0 : index
    %c0_0 = arith.constant 0 : index
    %c0_1 = arith.constant 0 : index
    %1 = vector.load %arg7[%c0, %c0_0, %c0_1] : memref<12x8x12xf32, #tpu.memory_space<vmem>>, vector<2x8x12xf32>
    tpu.vector_store %arg7[%c0, %c0_0, %c0_1], %0 {strides = array<i32>} : memref<12x8x12xf32, #tpu.memory_space<vmem>>, vector<2x8x12xf32>,
    %cst_2 = arith.constant 0.000000e+00 : f32
    %2 = vector.broadcast %cst_2 : f32 to vector<2x8x12xf32>
    %c10 = arith.constant 10 : index
    %c0_3 = arith.constant 0 : index
    %c0_4 = arith.constant 0 : index
    %3 = vector.load %arg7[%c10, %c0_3, %c0_4] : memref<12x8x12xf32, #tpu.memory_space<vmem>>, vector<2x8x12xf32>
    tpu.vector_store %arg7[%c10, %c0_3, %c0_4], %2 {strides = array<i32>} : memref<12x8x12xf32, #tpu.memory_space<vmem>>, vector<2x8x12xf32>,
    %cst_5 = arith.constant 0.000000e+00 : f32
    %4 = vector.broadcast %cst_5 : f32 to vector<12x8x2xf32>
    %c0_6 = arith.constant 0 : index
    %c0_7 = arith.constant 0 : index
    %c0_8 = arith.constant 0 : index
    %5 = vector.load %arg7[%c0_6, %c0_7, %c0_8] : memref<12x8x12xf32, #tpu.memory_space<vmem>>, vector<12x8x2xf32>
    tpu.vector_store %arg7[%c0_6, %c0_7, %c0_8], %4 {strides = array<i32>} : memref<12x8x12xf32, #tpu.memory_space<vmem>>, vector<12x8x2xf32>,
    %cst_9 = arith.constant 0.000000e+00 : f32
    %6 = vector.broadcast %cst_9 : f32 to vector<12x8x2xf32>
    %c0_10 = arith.constant 0 : index
    %c0_11 = arith.constant 0 : index
    %c10_12 = arith.constant 10 : index
    %7 = vector.load %arg7[%c0_10, %c0_11, %c10_12] : memref<12x8x12xf32, #tpu.memory_space<vmem>>, vector<12x8x2xf32>
    tpu.vector_store %arg7[%c0_10, %c0_11, %c10_12], %6 {strides = array<i32>} : memref<12x8x12xf32, #tpu.memory_space<vmem>>, vector<12x8x2xf32>,
    %cst_13 = arith.constant 0.000000e+00 : f32
    %8 = vector.broadcast %cst_13 : f32 to vector<8x8x8xf32>
    %c0_i32 = arith.constant 0 : i32
    %c4_i32 = arith.constant 4 : i32
    %9 = arith.addi %c0_i32, %c4_i32 : i32
    %c1_i32 = arith.constant 1 : i32
    %10 = scf.for %arg8 = %c0_i32 to %9 step %c1_i32 iter_args(%arg9 = %8) -> (vector<8x8x8xf32>)  : i32 {
      %c0_i32_31 = arith.constant 0 : i32
      %26 = arith.addi %c0_i32_31, %arg8 : i32
      %c0_32 = arith.constant 0 : index
      %c0_33 = arith.constant 0 : index
      %27 = arith.index_cast %26 : i32 to index
      %c0_34 = arith.constant 0 : index
      %28 = vector.load %arg1[%c0_32, %c0_33, %27, %c0_34] : memref<1x9x16x9xf32, #tpu.memory_space<vmem>>, vector<1x8x1x8xf32>
      %29 = vector.shape_cast %28 : vector<1x8x1x8xf32> to vector<8x1x8xf32>
      %c9_i32 = arith.constant 9 : i32
      %30 = arith.muli %arg8, %c9_i32 : i32
      %c0_i32_35 = arith.constant 0 : i32
      %31 = arith.addi %30, %c0_i32_35 : i32
      %c0_i32_36 = arith.constant 0 : i32
      %32 = arith.addi %31, %c0_i32_36 : i32
      %33 = arith.index_cast %32 : i32 to index
      %c0_37 = arith.constant 0 : index
      %c0_38 = arith.constant 0 : index
      %34 = vector.load %arg2[%33, %c0_37, %c0_38] : memref<36x8x1xf32, #tpu.memory_space<vmem>>, vector<1x8x1xf32>
      %35 = vector.shape_cast %34 : vector<1x8x1xf32> to vector<8x1xf32>
      %36 = vector.shape_cast %35 : vector<8x1xf32> to vector<1x8x1xf32>
      %37 = vector.broadcast %36 : vector<1x8x1xf32> to vector<8x8x8xf32>
      %38 = vector.broadcast %29 : vector<8x1x8xf32> to vector<8x8x8xf32>
      %39 = arith.mulf %37, %38 : vector<8x8x8xf32>
      %40 = arith.addf %arg9, %39 : vector<8x8x8xf32>
      %c4_i32_39 = arith.constant 4 : i32
      %41 = arith.addi %c4_i32_39, %arg8 : i32
      %c0_40 = arith.constant 0 : index
      %c0_41 = arith.constant 0 : index
      %42 = arith.index_cast %41 : i32 to index
      %c0_42 = arith.constant 0 : index
      %43 = vector.load %arg1[%c0_40, %c0_41, %42, %c0_42] : memref<1x9x16x9xf32, #tpu.memory_space<vmem>>, vector<1x8x1x8xf32>
      %44 = vector.shape_cast %43 : vector<1x8x1x8xf32> to vector<8x1x8xf32>
      %c9_i32_43 = arith.constant 9 : i32
      %45 = arith.muli %arg8, %c9_i32_43 : i32
      %c0_i32_44 = arith.constant 0 : i32
      %46 = arith.addi %45, %c0_i32_44 : i32
      %c1_i32_45 = arith.constant 1 : i32
      %47 = arith.addi %46, %c1_i32_45 : i32
      %48 = arith.index_cast %47 : i32 to index
      %c0_46 = arith.constant 0 : index
      %c0_47 = arith.constant 0 : index
      %49 = vector.load %arg2[%48, %c0_46, %c0_47] : memref<36x8x1xf32, #tpu.memory_space<vmem>>, vector<1x8x1xf32>
      %50 = vector.shape_cast %49 : vector<1x8x1xf32> to vector<8x1xf32>
      %51 = vector.shape_cast %50 : vector<8x1xf32> to vector<1x8x1xf32>
      %52 = vector.broadcast %51 : vector<1x8x1xf32> to vector<8x8x8xf32>
      %53 = vector.broadcast %44 : vector<8x1x8xf32> to vector<8x8x8xf32>
      %54 = arith.mulf %52, %53 : vector<8x8x8xf32>
      %55 = arith.addf %40, %54 : vector<8x8x8xf32>
      %c0_i32_48 = arith.constant 0 : i32
      %56 = arith.addi %c0_i32_48, %arg8 : i32
      %c0_49 = arith.constant 0 : index
      %c0_50 = arith.constant 0 : index
      %57 = arith.index_cast %56 : i32 to index
      %c1 = arith.constant 1 : index
      %58 = vector.load %arg1[%c0_49, %c0_50, %57, %c1] : memref<1x9x16x9xf32, #tpu.memory_space<vmem>>, vector<1x8x1x8xf32>
      %59 = vector.shape_cast %58 : vector<1x8x1x8xf32> to vector<8x1x8xf32>
      %c9_i32_51 = arith.constant 9 : i32
      %60 = arith.muli %arg8, %c9_i32_51 : i32
      %c0_i32_52 = arith.constant 0 : i32
      %61 = arith.addi %60, %c0_i32_52 : i32
      %c2_i32_53 = arith.constant 2 : i32
      %62 = arith.addi %61, %c2_i32_53 : i32
      %63 = arith.index_cast %62 : i32 to index
      %c0_54 = arith.constant 0 : index
      %c0_55 = arith.constant 0 : index
      %64 = vector.load %arg2[%63, %c0_54, %c0_55] : memref<36x8x1xf32, #tpu.memory_space<vmem>>, vector<1x8x1xf32>
      %65 = vector.shape_cast %64 : vector<1x8x1xf32> to vector<8x1xf32>
      %66 = vector.shape_cast %65 : vector<8x1xf32> to vector<1x8x1xf32>
      %67 = vector.broadcast %66 : vector<1x8x1xf32> to vector<8x8x8xf32>
      %68 = vector.broadcast %59 : vector<8x1x8xf32> to vector<8x8x8xf32>
      %69 = arith.mulf %67, %68 : vector<8x8x8xf32>
      %70 = arith.addf %55, %69 : vector<8x8x8xf32>
      %c8_i32 = arith.constant 8 : i32
      %71 = arith.addi %c8_i32, %arg8 : i32
      %c0_56 = arith.constant 0 : index
      %c0_57 = arith.constant 0 : index
      %72 = arith.index_cast %71 : i32 to index
      %c0_58 = arith.constant 0 : index
      %73 = vector.load %arg1[%c0_56, %c0_57, %72, %c0_58] : memref<1x9x16x9xf32, #tpu.memory_space<vmem>>, vector<1x8x1x8xf32>
      %74 = vector.shape_cast %73 : vector<1x8x1x8xf32> to vector<8x1x8xf32>
      %c9_i32_59 = arith.constant 9 : i32
      %75 = arith.muli %arg8, %c9_i32_59 : i32
      %c3_i32 = arith.constant 3 : i32
      %76 = arith.addi %75, %c3_i32 : i32
      %c0_i32_60 = arith.constant 0 : i32
      %77 = arith.addi %76, %c0_i32_60 : i32
      %78 = arith.index_cast %77 : i32 to index
      %c0_61 = arith.constant 0 : index
      %c0_62 = arith.constant 0 : index
      %79 = vector.load %arg2[%78, %c0_61, %c0_62] : memref<36x8x1xf32, #tpu.memory_space<vmem>>, vector<1x8x1xf32>
      %80 = vector.shape_cast %79 : vector<1x8x1xf32> to vector<8x1xf32>
      %81 = vector.shape_cast %80 : vector<8x1xf32> to vector<1x8x1xf32>
      %82 = vector.broadcast %81 : vector<1x8x1xf32> to vector<8x8x8xf32>
      %83 = vector.broadcast %74 : vector<8x1x8xf32> to vector<8x8x8xf32>
      %84 = arith.mulf %82, %83 : vector<8x8x8xf32>
      %85 = arith.addf %70, %84 : vector<8x8x8xf32>
      %c12_i32 = arith.constant 12 : i32
      %86 = arith.addi %c12_i32, %arg8 : i32
      %c0_63 = arith.constant 0 : index
      %c0_64 = arith.constant 0 : index
      %87 = arith.index_cast %86 : i32 to index
      %c0_65 = arith.constant 0 : index
      %88 = vector.load %arg1[%c0_63, %c0_64, %87, %c0_65] : memref<1x9x16x9xf32, #tpu.memory_space<vmem>>, vector<1x8x1x8xf32>
      %89 = vector.shape_cast %88 : vector<1x8x1x8xf32> to vector<8x1x8xf32>
      %c9_i32_66 = arith.constant 9 : i32
      %90 = arith.muli %arg8, %c9_i32_66 : i32
      %c3_i32_67 = arith.constant 3 : i32
      %91 = arith.addi %90, %c3_i32_67 : i32
      %c1_i32_68 = arith.constant 1 : i32
      %92 = arith.addi %91, %c1_i32_68 : i32
      %93 = arith.index_cast %92 : i32 to index
      %c0_69 = arith.constant 0 : index
      %c0_70 = arith.constant 0 : index
      %94 = vector.load %arg2[%93, %c0_69, %c0_70] : memref<36x8x1xf32, #tpu.memory_space<vmem>>, vector<1x8x1xf32>
      %95 = vector.shape_cast %94 : vector<1x8x1xf32> to vector<8x1xf32>
      %96 = vector.shape_cast %95 : vector<8x1xf32> to vector<1x8x1xf32>
      %97 = vector.broadcast %96 : vector<1x8x1xf32> to vector<8x8x8xf32>
      %98 = vector.broadcast %89 : vector<8x1x8xf32> to vector<8x8x8xf32>
      %99 = arith.mulf %97, %98 : vector<8x8x8xf32>
      %100 = arith.addf %85, %99 : vector<8x8x8xf32>
      %c8_i32_71 = arith.constant 8 : i32
      %101 = arith.addi %c8_i32_71, %arg8 : i32
      %c0_72 = arith.constant 0 : index
      %c0_73 = arith.constant 0 : index
      %102 = arith.index_cast %101 : i32 to index
      %c1_74 = arith.constant 1 : index
      %103 = vector.load %arg1[%c0_72, %c0_73, %102, %c1_74] : memref<1x9x16x9xf32, #tpu.memory_space<vmem>>, vector<1x8x1x8xf32>
      %104 = vector.shape_cast %103 : vector<1x8x1x8xf32> to vector<8x1x8xf32>
      %c9_i32_75 = arith.constant 9 : i32
      %105 = arith.muli %arg8, %c9_i32_75 : i32
      %c3_i32_76 = arith.constant 3 : i32
      %106 = arith.addi %105, %c3_i32_76 : i32
      %c2_i32_77 = arith.constant 2 : i32
      %107 = arith.addi %106, %c2_i32_77 : i32
      %108 = arith.index_cast %107 : i32 to index
      %c0_78 = arith.constant 0 : index
      %c0_79 = arith.constant 0 : index
      %109 = vector.load %arg2[%108, %c0_78, %c0_79] : memref<36x8x1xf32, #tpu.memory_space<vmem>>, vector<1x8x1xf32>
      %110 = vector.shape_cast %109 : vector<1x8x1xf32> to vector<8x1xf32>
      %111 = vector.shape_cast %110 : vector<8x1xf32> to vector<1x8x1xf32>
      %112 = vector.broadcast %111 : vector<1x8x1xf32> to vector<8x8x8xf32>
      %113 = vector.broadcast %104 : vector<8x1x8xf32> to vector<8x8x8xf32>
      %114 = arith.mulf %112, %113 : vector<8x8x8xf32>
      %115 = arith.addf %100, %114 : vector<8x8x8xf32>
      %c0_i32_80 = arith.constant 0 : i32
      %116 = arith.addi %c0_i32_80, %arg8 : i32
      %c0_81 = arith.constant 0 : index
      %c1_82 = arith.constant 1 : index
      %117 = arith.index_cast %116 : i32 to index
      %c0_83 = arith.constant 0 : index
      %118 = vector.load %arg1[%c0_81, %c1_82, %117, %c0_83] : memref<1x9x16x9xf32, #tpu.memory_space<vmem>>, vector<1x8x1x8xf32>
      %119 = vector.shape_cast %118 : vector<1x8x1x8xf32> to vector<8x1x8xf32>
      %c9_i32_84 = arith.constant 9 : i32
      %120 = arith.muli %arg8, %c9_i32_84 : i32
      %c6_i32 = arith.constant 6 : i32
      %121 = arith.addi %120, %c6_i32 : i32
      %c0_i32_85 = arith.constant 0 : i32
      %122 = arith.addi %121, %c0_i32_85 : i32
      %123 = arith.index_cast %122 : i32 to index
      %c0_86 = arith.constant 0 : index
      %c0_87 = arith.constant 0 : index
      %124 = vector.load %arg2[%123, %c0_86, %c0_87] : memref<36x8x1xf32, #tpu.memory_space<vmem>>, vector<1x8x1xf32>
      %125 = vector.shape_cast %124 : vector<1x8x1xf32> to vector<8x1xf32>
      %126 = vector.shape_cast %125 : vector<8x1xf32> to vector<1x8x1xf32>
      %127 = vector.broadcast %126 : vector<1x8x1xf32> to vector<8x8x8xf32>
      %128 = vector.broadcast %119 : vector<8x1x8xf32> to vector<8x8x8xf32>
      %129 = arith.mulf %127, %128 : vector<8x8x8xf32>
      %130 = arith.addf %115, %129 : vector<8x8x8xf32>
      %c4_i32_88 = arith.constant 4 : i32
      %131 = arith.addi %c4_i32_88, %arg8 : i32
      %c0_89 = arith.constant 0 : index
      %c1_90 = arith.constant 1 : index
      %132 = arith.index_cast %131 : i32 to index
      %c0_91 = arith.constant 0 : index
      %133 = vector.load %arg1[%c0_89, %c1_90, %132, %c0_91] : memref<1x9x16x9xf32, #tpu.memory_space<vmem>>, vector<1x8x1x8xf32>
      %134 = vector.shape_cast %133 : vector<1x8x1x8xf32> to vector<8x1x8xf32>
      %c9_i32_92 = arith.constant 9 : i32
      %135 = arith.muli %arg8, %c9_i32_92 : i32
      %c6_i32_93 = arith.constant 6 : i32
      %136 = arith.addi %135, %c6_i32_93 : i32
      %c1_i32_94 = arith.constant 1 : i32
      %137 = arith.addi %136, %c1_i32_94 : i32
      %138 = arith.index_cast %137 : i32 to index
      %c0_95 = arith.constant 0 : index
      %c0_96 = arith.constant 0 : index
      %139 = vector.load %arg2[%138, %c0_95, %c0_96] : memref<36x8x1xf32, #tpu.memory_space<vmem>>, vector<1x8x1xf32>
      %140 = vector.shape_cast %139 : vector<1x8x1xf32> to vector<8x1xf32>
      %141 = vector.shape_cast %140 : vector<8x1xf32> to vector<1x8x1xf32>
      %142 = vector.broadcast %141 : vector<1x8x1xf32> to vector<8x8x8xf32>
      %143 = vector.broadcast %134 : vector<8x1x8xf32> to vector<8x8x8xf32>
      %144 = arith.mulf %142, %143 : vector<8x8x8xf32>
      %145 = arith.addf %130, %144 : vector<8x8x8xf32>
      %c0_i32_97 = arith.constant 0 : i32
      %146 = arith.addi %c0_i32_97, %arg8 : i32
      %c0_98 = arith.constant 0 : index
      %c1_99 = arith.constant 1 : index
      %147 = arith.index_cast %146 : i32 to index
      %c1_100 = arith.constant 1 : index
      %148 = vector.load %arg1[%c0_98, %c1_99, %147, %c1_100] : memref<1x9x16x9xf32, #tpu.memory_space<vmem>>, vector<1x8x1x8xf32>
      %149 = vector.shape_cast %148 : vector<1x8x1x8xf32> to vector<8x1x8xf32>
      %c9_i32_101 = arith.constant 9 : i32
      %150 = arith.muli %arg8, %c9_i32_101 : i32
      %c6_i32_102 = arith.constant 6 : i32
      %151 = arith.addi %150, %c6_i32_102 : i32
      %c2_i32_103 = arith.constant 2 : i32
      %152 = arith.addi %151, %c2_i32_103 : i32
      %153 = arith.index_cast %152 : i32 to index
      %c0_104 = arith.constant 0 : index
      %c0_105 = arith.constant 0 : index
      %154 = vector.load %arg2[%153, %c0_104, %c0_105] : memref<36x8x1xf32, #tpu.memory_space<vmem>>, vector<1x8x1xf32>
      %155 = vector.shape_cast %154 : vector<1x8x1xf32> to vector<8x1xf32>
      %156 = vector.shape_cast %155 : vector<8x1xf32> to vector<1x8x1xf32>
      %157 = vector.broadcast %156 : vector<1x8x1xf32> to vector<8x8x8xf32>
      %158 = vector.broadcast %149 : vector<8x1x8xf32> to vector<8x8x8xf32>
      %159 = arith.mulf %157, %158 : vector<8x8x8xf32>
      %160 = arith.addf %145, %159 : vector<8x8x8xf32>
      scf.yield %160 : vector<8x8x8xf32>
    }
    %c4_i32_14 = arith.constant 4 : i32
    %c0_15 = arith.constant 0 : index
    %c0_16 = arith.constant 0 : index
    %11 = vector.load %arg3[%c0_15, %c0_16] : memref<8x1xf32, #tpu.memory_space<vmem>>, vector<8x1xf32>
    %12 = vector.shape_cast %11 : vector<8x1xf32> to vector<1x8x1xf32>
    %13 = vector.broadcast %12 : vector<1x8x1xf32> to vector<8x8x8xf32>
    %14 = arith.addf %10, %13 : vector<8x8x8xf32>
    %cst_17 = arith.constant 0.000000e+00 : f32
    %15 = vector.broadcast %cst_17 : f32 to vector<8x8x8xf32>
    %16 = arith.cmpf oge, %14, %15 : vector<8x8x8xf32>
    %cst_18 = arith.constant 0.00999999977 : f32
    %17 = vector.broadcast %cst_18 : f32 to vector<8x8x8xf32>
    %18 = arith.mulf %17, %14 : vector<8x8x8xf32>
    %19 = arith.select %16, %14, %18 : vector<8x8x8xi1>, vector<8x8x8xf32>
    %c2 = arith.constant 2 : index
    %c0_19 = arith.constant 0 : index
    %c2_20 = arith.constant 2 : index
    %20 = vector.load %arg7[%c2, %c0_19, %c2_20] : memref<12x8x12xf32, #tpu.memory_space<vmem>>, vector<8x8x8xf32>
    tpu.vector_store %arg7[%c2, %c0_19, %c2_20], %19 {strides = array<i32>} : memref<12x8x12xf32, #tpu.memory_space<vmem>>, vector<8x8x8xf32>,
    %c0_i32_21 = arith.constant 0 : i32
    %c2_i32 = arith.constant 2 : i32
    %21 = arith.addi %c0_i32_21, %c2_i32 : i32
    %c1_i32_22 = arith.constant 1 : i32
    scf.for %arg8 = %c0_i32_21 to %21 step %c1_i32_22  : i32 {
      %c1_i32_31 = arith.constant 1 : i32
      %26 = arith.muli %arg8, %c1_i32_31 : i32
      %c0_i32_32 = arith.constant 0 : i32
      %27 = arith.addi %c0_i32_32, %26 : i32
      %cst_33 = arith.constant 0.000000e+00 : f32
      %28 = vector.broadcast %cst_33 : f32 to vector<8x8x8xf32>
      %c0_34 = arith.constant 0 : index
      %c0_35 = arith.constant 0 : index
      %c0_36 = arith.constant 0 : index
      %29 = vector.load %arg7[%c0_34, %c0_35, %c0_36] : memref<12x8x12xf32, #tpu.memory_space<vmem>>, vector<8x8x12xf32>
      %c25_i32 = arith.constant 25 : i32
      %30 = arith.muli %27, %c25_i32 : i32
      %c0_i32_37 = arith.constant 0 : i32
      %31 = arith.addi %30, %c0_i32_37 : i32
      %c0_i32_38 = arith.constant 0 : i32
      %32 = arith.addi %31, %c0_i32_38 : i32
      %33 = arith.index_cast %32 : i32 to index
      %c0_39 = arith.constant 0 : index
      %c0_40 = arith.constant 0 : index
      %34 = vector.load %arg4[%33, %c0_39, %c0_40] : memref<50x8x1xf32, #tpu.memory_space<vmem>>, vector<1x8x1xf32>
      %35 = vector.shape_cast %34 : vector<1x8x1xf32> to vector<8x1xf32>
      %36 = vector.extract_strided_slice %29 {offsets = [0, 0, 0], sizes = [8, 8, 8], strides = [1, 1, 1]} : vector<8x8x12xf32> to vector<8x8x8xf32>
      %37 = vector.shape_cast %35 : vector<8x1xf32> to vector<1x8x1xf32>
      %38 = vector.broadcast %37 : vector<1x8x1xf32> to vector<8x8x8xf32>
      %39 = arith.mulf %38, %36 : vector<8x8x8xf32>
      %40 = arith.addf %28, %39 : vector<8x8x8xf32>
      %c25_i32_41 = arith.constant 25 : i32
      %41 = arith.muli %27, %c25_i32_41 : i32
      %c0_i32_42 = arith.constant 0 : i32
      %42 = arith.addi %41, %c0_i32_42 : i32
      %c1_i32_43 = arith.constant 1 : i32
      %43 = arith.addi %42, %c1_i32_43 : i32
      %44 = arith.index_cast %43 : i32 to index
      %c0_44 = arith.constant 0 : index
      %c0_45 = arith.constant 0 : index
      %45 = vector.load %arg4[%44, %c0_44, %c0_45] : memref<50x8x1xf32, #tpu.memory_space<vmem>>, vector<1x8x1xf32>
      %46 = vector.shape_cast %45 : vector<1x8x1xf32> to vector<8x1xf32>
      %47 = vector.extract_strided_slice %29 {offsets = [0, 0, 1], sizes = [8, 8, 8], strides = [1, 1, 1]} : vector<8x8x12xf32> to vector<8x8x8xf32>
      %48 = vector.shape_cast %46 : vector<8x1xf32> to vector<1x8x1xf32>
      %49 = vector.broadcast %48 : vector<1x8x1xf32> to vector<8x8x8xf32>
      %50 = arith.mulf %49, %47 : vector<8x8x8xf32>
      %51 = arith.addf %40, %50 : vector<8x8x8xf32>
      %c25_i32_46 = arith.constant 25 : i32
      %52 = arith.muli %27, %c25_i32_46 : i32
      %c0_i32_47 = arith.constant 0 : i32
      %53 = arith.addi %52, %c0_i32_47 : i32
      %c2_i32_48 = arith.constant 2 : i32
      %54 = arith.addi %53, %c2_i32_48 : i32
      %55 = arith.index_cast %54 : i32 to index
      %c0_49 = arith.constant 0 : index
      %c0_50 = arith.constant 0 : index
      %56 = vector.load %arg4[%55, %c0_49, %c0_50] : memref<50x8x1xf32, #tpu.memory_space<vmem>>, vector<1x8x1xf32>
      %57 = vector.shape_cast %56 : vector<1x8x1xf32> to vector<8x1xf32>
      %58 = vector.extract_strided_slice %29 {offsets = [0, 0, 2], sizes = [8, 8, 8], strides = [1, 1, 1]} : vector<8x8x12xf32> to vector<8x8x8xf32>
      %59 = vector.shape_cast %57 : vector<8x1xf32> to vector<1x8x1xf32>
      %60 = vector.broadcast %59 : vector<1x8x1xf32> to vector<8x8x8xf32>
      %61 = arith.mulf %60, %58 : vector<8x8x8xf32>
      %62 = arith.addf %51, %61 : vector<8x8x8xf32>
      %c25_i32_51 = arith.constant 25 : i32
      %63 = arith.muli %27, %c25_i32_51 : i32
      %c0_i32_52 = arith.constant 0 : i32
      %64 = arith.addi %63, %c0_i32_52 : i32
      %c3_i32 = arith.constant 3 : i32
      %65 = arith.addi %64, %c3_i32 : i32
      %66 = arith.index_cast %65 : i32 to index
      %c0_53 = arith.constant 0 : index
      %c0_54 = arith.constant 0 : index
      %67 = vector.load %arg4[%66, %c0_53, %c0_54] : memref<50x8x1xf32, #tpu.memory_space<vmem>>, vector<1x8x1xf32>
      %68 = vector.shape_cast %67 : vector<1x8x1xf32> to vector<8x1xf32>
      %69 = vector.extract_strided_slice %29 {offsets = [0, 0, 3], sizes = [8, 8, 8], strides = [1, 1, 1]} : vector<8x8x12xf32> to vector<8x8x8xf32>
      %70 = vector.shape_cast %68 : vector<8x1xf32> to vector<1x8x1xf32>
      %71 = vector.broadcast %70 : vector<1x8x1xf32> to vector<8x8x8xf32>
      %72 = arith.mulf %71, %69 : vector<8x8x8xf32>
      %73 = arith.addf %62, %72 : vector<8x8x8xf32>
      %c25_i32_55 = arith.constant 25 : i32
      %74 = arith.muli %27, %c25_i32_55 : i32
      %c0_i32_56 = arith.constant 0 : i32
      %75 = arith.addi %74, %c0_i32_56 : i32
      %c4_i32_57 = arith.constant 4 : i32
      %76 = arith.addi %75, %c4_i32_57 : i32
      %77 = arith.index_cast %76 : i32 to index
      %c0_58 = arith.constant 0 : index
      %c0_59 = arith.constant 0 : index
      %78 = vector.load %arg4[%77, %c0_58, %c0_59] : memref<50x8x1xf32, #tpu.memory_space<vmem>>, vector<1x8x1xf32>
      %79 = vector.shape_cast %78 : vector<1x8x1xf32> to vector<8x1xf32>
      %80 = vector.extract_strided_slice %29 {offsets = [0, 0, 4], sizes = [8, 8, 8], strides = [1, 1, 1]} : vector<8x8x12xf32> to vector<8x8x8xf32>
      %81 = vector.shape_cast %79 : vector<8x1xf32> to vector<1x8x1xf32>
      %82 = vector.broadcast %81 : vector<1x8x1xf32> to vector<8x8x8xf32>
      %83 = arith.mulf %82, %80 : vector<8x8x8xf32>
      %84 = arith.addf %73, %83 : vector<8x8x8xf32>
      %c1 = arith.constant 1 : index
      %c0_60 = arith.constant 0 : index
      %c0_61 = arith.constant 0 : index
      %85 = vector.load %arg7[%c1, %c0_60, %c0_61] : memref<12x8x12xf32, #tpu.memory_space<vmem>>, vector<8x8x12xf32>
      %c25_i32_62 = arith.constant 25 : i32
      %86 = arith.muli %27, %c25_i32_62 : i32
      %c5_i32 = arith.constant 5 : i32
      %87 = arith.addi %86, %c5_i32 : i32
      %c0_i32_63 = arith.constant 0 : i32
      %88 = arith.addi %87, %c0_i32_63 : i32
      %89 = arith.index_cast %88 : i32 to index
      %c0_64 = arith.constant 0 : index
      %c0_65 = arith.constant 0 : index
      %90 = vector.load %arg4[%89, %c0_64, %c0_65] : memref<50x8x1xf32, #tpu.memory_space<vmem>>, vector<1x8x1xf32>
      %91 = vector.shape_cast %90 : vector<1x8x1xf32> to vector<8x1xf32>
      %92 = vector.extract_strided_slice %85 {offsets = [0, 0, 0], sizes = [8, 8, 8], strides = [1, 1, 1]} : vector<8x8x12xf32> to vector<8x8x8xf32>
      %93 = vector.shape_cast %91 : vector<8x1xf32> to vector<1x8x1xf32>
      %94 = vector.broadcast %93 : vector<1x8x1xf32> to vector<8x8x8xf32>
      %95 = arith.mulf %94, %92 : vector<8x8x8xf32>
      %96 = arith.addf %84, %95 : vector<8x8x8xf32>
      %c25_i32_66 = arith.constant 25 : i32
      %97 = arith.muli %27, %c25_i32_66 : i32
      %c5_i32_67 = arith.constant 5 : i32
      %98 = arith.addi %97, %c5_i32_67 : i32
      %c1_i32_68 = arith.constant 1 : i32
      %99 = arith.addi %98, %c1_i32_68 : i32
      %100 = arith.index_cast %99 : i32 to index
      %c0_69 = arith.constant 0 : index
      %c0_70 = arith.constant 0 : index
      %101 = vector.load %arg4[%100, %c0_69, %c0_70] : memref<50x8x1xf32, #tpu.memory_space<vmem>>, vector<1x8x1xf32>
      %102 = vector.shape_cast %101 : vector<1x8x1xf32> to vector<8x1xf32>
      %103 = vector.extract_strided_slice %85 {offsets = [0, 0, 1], sizes = [8, 8, 8], strides = [1, 1, 1]} : vector<8x8x12xf32> to vector<8x8x8xf32>
      %104 = vector.shape_cast %102 : vector<8x1xf32> to vector<1x8x1xf32>
      %105 = vector.broadcast %104 : vector<1x8x1xf32> to vector<8x8x8xf32>
      %106 = arith.mulf %105, %103 : vector<8x8x8xf32>
      %107 = arith.addf %96, %106 : vector<8x8x8xf32>
      %c25_i32_71 = arith.constant 25 : i32
      %108 = arith.muli %27, %c25_i32_71 : i32
      %c5_i32_72 = arith.constant 5 : i32
      %109 = arith.addi %108, %c5_i32_72 : i32
      %c2_i32_73 = arith.constant 2 : i32
      %110 = arith.addi %109, %c2_i32_73 : i32
      %111 = arith.index_cast %110 : i32 to index
      %c0_74 = arith.constant 0 : index
      %c0_75 = arith.constant 0 : index
      %112 = vector.load %arg4[%111, %c0_74, %c0_75] : memref<50x8x1xf32, #tpu.memory_space<vmem>>, vector<1x8x1xf32>
      %113 = vector.shape_cast %112 : vector<1x8x1xf32> to vector<8x1xf32>
      %114 = vector.extract_strided_slice %85 {offsets = [0, 0, 2], sizes = [8, 8, 8], strides = [1, 1, 1]} : vector<8x8x12xf32> to vector<8x8x8xf32>
      %115 = vector.shape_cast %113 : vector<8x1xf32> to vector<1x8x1xf32>
      %116 = vector.broadcast %115 : vector<1x8x1xf32> to vector<8x8x8xf32>
      %117 = arith.mulf %116, %114 : vector<8x8x8xf32>
      %118 = arith.addf %107, %117 : vector<8x8x8xf32>
      %c25_i32_76 = arith.constant 25 : i32
      %119 = arith.muli %27, %c25_i32_76 : i32
      %c5_i32_77 = arith.constant 5 : i32
      %120 = arith.addi %119, %c5_i32_77 : i32
      %c3_i32_78 = arith.constant 3 : i32
      %121 = arith.addi %120, %c3_i32_78 : i32
      %122 = arith.index_cast %121 : i32 to index
      %c0_79 = arith.constant 0 : index
      %c0_80 = arith.constant 0 : index
      %123 = vector.load %arg4[%122, %c0_79, %c0_80] : memref<50x8x1xf32, #tpu.memory_space<vmem>>, vector<1x8x1xf32>
      %124 = vector.shape_cast %123 : vector<1x8x1xf32> to vector<8x1xf32>
      %125 = vector.extract_strided_slice %85 {offsets = [0, 0, 3], sizes = [8, 8, 8], strides = [1, 1, 1]} : vector<8x8x12xf32> to vector<8x8x8xf32>
      %126 = vector.shape_cast %124 : vector<8x1xf32> to vector<1x8x1xf32>
      %127 = vector.broadcast %126 : vector<1x8x1xf32> to vector<8x8x8xf32>
      %128 = arith.mulf %127, %125 : vector<8x8x8xf32>
      %129 = arith.addf %118, %128 : vector<8x8x8xf32>
      %c25_i32_81 = arith.constant 25 : i32
      %130 = arith.muli %27, %c25_i32_81 : i32
      %c5_i32_82 = arith.constant 5 : i32
      %131 = arith.addi %130, %c5_i32_82 : i32
      %c4_i32_83 = arith.constant 4 : i32
      %132 = arith.addi %131, %c4_i32_83 : i32
      %133 = arith.index_cast %132 : i32 to index
      %c0_84 = arith.constant 0 : index
      %c0_85 = arith.constant 0 : index
      %134 = vector.load %arg4[%133, %c0_84, %c0_85] : memref<50x8x1xf32, #tpu.memory_space<vmem>>, vector<1x8x1xf32>
      %135 = vector.shape_cast %134 : vector<1x8x1xf32> to vector<8x1xf32>
      %136 = vector.extract_strided_slice %85 {offsets = [0, 0, 4], sizes = [8, 8, 8], strides = [1, 1, 1]} : vector<8x8x12xf32> to vector<8x8x8xf32>
      %137 = vector.shape_cast %135 : vector<8x1xf32> to vector<1x8x1xf32>
      %138 = vector.broadcast %137 : vector<1x8x1xf32> to vector<8x8x8xf32>
      %139 = arith.mulf %138, %136 : vector<8x8x8xf32>
      %140 = arith.addf %129, %139 : vector<8x8x8xf32>
      %c2_86 = arith.constant 2 : index
      %c0_87 = arith.constant 0 : index
      %c0_88 = arith.constant 0 : index
      %141 = vector.load %arg7[%c2_86, %c0_87, %c0_88] : memref<12x8x12xf32, #tpu.memory_space<vmem>>, vector<8x8x12xf32>
      %c25_i32_89 = arith.constant 25 : i32
      %142 = arith.muli %27, %c25_i32_89 : i32
      %c10_i32 = arith.constant 10 : i32
      %143 = arith.addi %142, %c10_i32 : i32
      %c0_i32_90 = arith.constant 0 : i32
      %144 = arith.addi %143, %c0_i32_90 : i32
      %145 = arith.index_cast %144 : i32 to index
      %c0_91 = arith.constant 0 : index
      %c0_92 = arith.constant 0 : index
      %146 = vector.load %arg4[%145, %c0_91, %c0_92] : memref<50x8x1xf32, #tpu.memory_space<vmem>>, vector<1x8x1xf32>
      %147 = vector.shape_cast %146 : vector<1x8x1xf32> to vector<8x1xf32>
      %148 = vector.extract_strided_slice %141 {offsets = [0, 0, 0], sizes = [8, 8, 8], strides = [1, 1, 1]} : vector<8x8x12xf32> to vector<8x8x8xf32>
      %149 = vector.shape_cast %147 : vector<8x1xf32> to vector<1x8x1xf32>
      %150 = vector.broadcast %149 : vector<1x8x1xf32> to vector<8x8x8xf32>
      %151 = arith.mulf %150, %148 : vector<8x8x8xf32>
      %152 = arith.addf %140, %151 : vector<8x8x8xf32>
      %c25_i32_93 = arith.constant 25 : i32
      %153 = arith.muli %27, %c25_i32_93 : i32
      %c10_i32_94 = arith.constant 10 : i32
      %154 = arith.addi %153, %c10_i32_94 : i32
      %c1_i32_95 = arith.constant 1 : i32
      %155 = arith.addi %154, %c1_i32_95 : i32
      %156 = arith.index_cast %155 : i32 to index
      %c0_96 = arith.constant 0 : index
      %c0_97 = arith.constant 0 : index
      %157 = vector.load %arg4[%156, %c0_96, %c0_97] : memref<50x8x1xf32, #tpu.memory_space<vmem>>, vector<1x8x1xf32>
      %158 = vector.shape_cast %157 : vector<1x8x1xf32> to vector<8x1xf32>
      %159 = vector.extract_strided_slice %141 {offsets = [0, 0, 1], sizes = [8, 8, 8], strides = [1, 1, 1]} : vector<8x8x12xf32> to vector<8x8x8xf32>
      %160 = vector.shape_cast %158 : vector<8x1xf32> to vector<1x8x1xf32>
      %161 = vector.broadcast %160 : vector<1x8x1xf32> to vector<8x8x8xf32>
      %162 = arith.mulf %161, %159 : vector<8x8x8xf32>
      %163 = arith.addf %152, %162 : vector<8x8x8xf32>
      %c25_i32_98 = arith.constant 25 : i32
      %164 = arith.muli %27, %c25_i32_98 : i32
      %c10_i32_99 = arith.constant 10 : i32
      %165 = arith.addi %164, %c10_i32_99 : i32
      %c2_i32_100 = arith.constant 2 : i32
      %166 = arith.addi %165, %c2_i32_100 : i32
      %167 = arith.index_cast %166 : i32 to index
      %c0_101 = arith.constant 0 : index
      %c0_102 = arith.constant 0 : index
      %168 = vector.load %arg4[%167, %c0_101, %c0_102] : memref<50x8x1xf32, #tpu.memory_space<vmem>>, vector<1x8x1xf32>
      %169 = vector.shape_cast %168 : vector<1x8x1xf32> to vector<8x1xf32>
      %170 = vector.extract_strided_slice %141 {offsets = [0, 0, 2], sizes = [8, 8, 8], strides = [1, 1, 1]} : vector<8x8x12xf32> to vector<8x8x8xf32>
      %171 = vector.shape_cast %169 : vector<8x1xf32> to vector<1x8x1xf32>
      %172 = vector.broadcast %171 : vector<1x8x1xf32> to vector<8x8x8xf32>
      %173 = arith.mulf %172, %170 : vector<8x8x8xf32>
      %174 = arith.addf %163, %173 : vector<8x8x8xf32>
      %c25_i32_103 = arith.constant 25 : i32
      %175 = arith.muli %27, %c25_i32_103 : i32
      %c10_i32_104 = arith.constant 10 : i32
      %176 = arith.addi %175, %c10_i32_104 : i32
      %c3_i32_105 = arith.constant 3 : i32
      %177 = arith.addi %176, %c3_i32_105 : i32
      %178 = arith.index_cast %177 : i32 to index
      %c0_106 = arith.constant 0 : index
      %c0_107 = arith.constant 0 : index
      %179 = vector.load %arg4[%178, %c0_106, %c0_107] : memref<50x8x1xf32, #tpu.memory_space<vmem>>, vector<1x8x1xf32>
      %180 = vector.shape_cast %179 : vector<1x8x1xf32> to vector<8x1xf32>
      %181 = vector.extract_strided_slice %141 {offsets = [0, 0, 3], sizes = [8, 8, 8], strides = [1, 1, 1]} : vector<8x8x12xf32> to vector<8x8x8xf32>
      %182 = vector.shape_cast %180 : vector<8x1xf32> to vector<1x8x1xf32>
      %183 = vector.broadcast %182 : vector<1x8x1xf32> to vector<8x8x8xf32>
      %184 = arith.mulf %183, %181 : vector<8x8x8xf32>
      %185 = arith.addf %174, %184 : vector<8x8x8xf32>
      %c25_i32_108 = arith.constant 25 : i32
      %186 = arith.muli %27, %c25_i32_108 : i32
      %c10_i32_109 = arith.constant 10 : i32
      %187 = arith.addi %186, %c10_i32_109 : i32
      %c4_i32_110 = arith.constant 4 : i32
      %188 = arith.addi %187, %c4_i32_110 : i32
      %189 = arith.index_cast %188 : i32 to index
      %c0_111 = arith.constant 0 : index
      %c0_112 = arith.constant 0 : index
      %190 = vector.load %arg4[%189, %c0_111, %c0_112] : memref<50x8x1xf32, #tpu.memory_space<vmem>>, vector<1x8x1xf32>
      %191 = vector.shape_cast %190 : vector<1x8x1xf32> to vector<8x1xf32>
      %192 = vector.extract_strided_slice %141 {offsets = [0, 0, 4], sizes = [8, 8, 8], strides = [1, 1, 1]} : vector<8x8x12xf32> to vector<8x8x8xf32>
      %193 = vector.shape_cast %191 : vector<8x1xf32> to vector<1x8x1xf32>
      %194 = vector.broadcast %193 : vector<1x8x1xf32> to vector<8x8x8xf32>
      %195 = arith.mulf %194, %192 : vector<8x8x8xf32>
      %196 = arith.addf %185, %195 : vector<8x8x8xf32>
      %c3 = arith.constant 3 : index
      %c0_113 = arith.constant 0 : index
      %c0_114 = arith.constant 0 : index
      %197 = vector.load %arg7[%c3, %c0_113, %c0_114] : memref<12x8x12xf32, #tpu.memory_space<vmem>>, vector<8x8x12xf32>
      %c25_i32_115 = arith.constant 25 : i32
      %198 = arith.muli %27, %c25_i32_115 : i32
      %c15_i32 = arith.constant 15 : i32
      %199 = arith.addi %198, %c15_i32 : i32
      %c0_i32_116 = arith.constant 0 : i32
      %200 = arith.addi %199, %c0_i32_116 : i32
      %201 = arith.index_cast %200 : i32 to index
      %c0_117 = arith.constant 0 : index
      %c0_118 = arith.constant 0 : index
      %202 = vector.load %arg4[%201, %c0_117, %c0_118] : memref<50x8x1xf32, #tpu.memory_space<vmem>>, vector<1x8x1xf32>
      %203 = vector.shape_cast %202 : vector<1x8x1xf32> to vector<8x1xf32>
      %204 = vector.extract_strided_slice %197 {offsets = [0, 0, 0], sizes = [8, 8, 8], strides = [1, 1, 1]} : vector<8x8x12xf32> to vector<8x8x8xf32>
      %205 = vector.shape_cast %203 : vector<8x1xf32> to vector<1x8x1xf32>
      %206 = vector.broadcast %205 : vector<1x8x1xf32> to vector<8x8x8xf32>
      %207 = arith.mulf %206, %204 : vector<8x8x8xf32>
      %208 = arith.addf %196, %207 : vector<8x8x8xf32>
      %c25_i32_119 = arith.constant 25 : i32
      %209 = arith.muli %27, %c25_i32_119 : i32
      %c15_i32_120 = arith.constant 15 : i32
      %210 = arith.addi %209, %c15_i32_120 : i32
      %c1_i32_121 = arith.constant 1 : i32
      %211 = arith.addi %210, %c1_i32_121 : i32
      %212 = arith.index_cast %211 : i32 to index
      %c0_122 = arith.constant 0 : index
      %c0_123 = arith.constant 0 : index
      %213 = vector.load %arg4[%212, %c0_122, %c0_123] : memref<50x8x1xf32, #tpu.memory_space<vmem>>, vector<1x8x1xf32>
      %214 = vector.shape_cast %213 : vector<1x8x1xf32> to vector<8x1xf32>
      %215 = vector.extract_strided_slice %197 {offsets = [0, 0, 1], sizes = [8, 8, 8], strides = [1, 1, 1]} : vector<8x8x12xf32> to vector<8x8x8xf32>
      %216 = vector.shape_cast %214 : vector<8x1xf32> to vector<1x8x1xf32>
      %217 = vector.broadcast %216 : vector<1x8x1xf32> to vector<8x8x8xf32>
      %218 = arith.mulf %217, %215 : vector<8x8x8xf32>
      %219 = arith.addf %208, %218 : vector<8x8x8xf32>
      %c25_i32_124 = arith.constant 25 : i32
      %220 = arith.muli %27, %c25_i32_124 : i32
      %c15_i32_125 = arith.constant 15 : i32
      %221 = arith.addi %220, %c15_i32_125 : i32
      %c2_i32_126 = arith.constant 2 : i32
      %222 = arith.addi %221, %c2_i32_126 : i32
      %223 = arith.index_cast %222 : i32 to index
      %c0_127 = arith.constant 0 : index
      %c0_128 = arith.constant 0 : index
      %224 = vector.load %arg4[%223, %c0_127, %c0_128] : memref<50x8x1xf32, #tpu.memory_space<vmem>>, vector<1x8x1xf32>
      %225 = vector.shape_cast %224 : vector<1x8x1xf32> to vector<8x1xf32>
      %226 = vector.extract_strided_slice %197 {offsets = [0, 0, 2], sizes = [8, 8, 8], strides = [1, 1, 1]} : vector<8x8x12xf32> to vector<8x8x8xf32>
      %227 = vector.shape_cast %225 : vector<8x1xf32> to vector<1x8x1xf32>
      %228 = vector.broadcast %227 : vector<1x8x1xf32> to vector<8x8x8xf32>
      %229 = arith.mulf %228, %226 : vector<8x8x8xf32>
      %230 = arith.addf %219, %229 : vector<8x8x8xf32>
      %c25_i32_129 = arith.constant 25 : i32
      %231 = arith.muli %27, %c25_i32_129 : i32
      %c15_i32_130 = arith.constant 15 : i32
      %232 = arith.addi %231, %c15_i32_130 : i32
      %c3_i32_131 = arith.constant 3 : i32
      %233 = arith.addi %232, %c3_i32_131 : i32
      %234 = arith.index_cast %233 : i32 to index
      %c0_132 = arith.constant 0 : index
      %c0_133 = arith.constant 0 : index
      %235 = vector.load %arg4[%234, %c0_132, %c0_133] : memref<50x8x1xf32, #tpu.memory_space<vmem>>, vector<1x8x1xf32>
      %236 = vector.shape_cast %235 : vector<1x8x1xf32> to vector<8x1xf32>
      %237 = vector.extract_strided_slice %197 {offsets = [0, 0, 3], sizes = [8, 8, 8], strides = [1, 1, 1]} : vector<8x8x12xf32> to vector<8x8x8xf32>
      %238 = vector.shape_cast %236 : vector<8x1xf32> to vector<1x8x1xf32>
      %239 = vector.broadcast %238 : vector<1x8x1xf32> to vector<8x8x8xf32>
      %240 = arith.mulf %239, %237 : vector<8x8x8xf32>
      %241 = arith.addf %230, %240 : vector<8x8x8xf32>
      %c25_i32_134 = arith.constant 25 : i32
      %242 = arith.muli %27, %c25_i32_134 : i32
      %c15_i32_135 = arith.constant 15 : i32
      %243 = arith.addi %242, %c15_i32_135 : i32
      %c4_i32_136 = arith.constant 4 : i32
      %244 = arith.addi %243, %c4_i32_136 : i32
      %245 = arith.index_cast %244 : i32 to index
      %c0_137 = arith.constant 0 : index
      %c0_138 = arith.constant 0 : index
      %246 = vector.load %arg4[%245, %c0_137, %c0_138] : memref<50x8x1xf32, #tpu.memory_space<vmem>>, vector<1x8x1xf32>
      %247 = vector.shape_cast %246 : vector<1x8x1xf32> to vector<8x1xf32>
      %248 = vector.extract_strided_slice %197 {offsets = [0, 0, 4], sizes = [8, 8, 8], strides = [1, 1, 1]} : vector<8x8x12xf32> to vector<8x8x8xf32>
      %249 = vector.shape_cast %247 : vector<8x1xf32> to vector<1x8x1xf32>
      %250 = vector.broadcast %249 : vector<1x8x1xf32> to vector<8x8x8xf32>
      %251 = arith.mulf %250, %248 : vector<8x8x8xf32>
      %252 = arith.addf %241, %251 : vector<8x8x8xf32>
      %c4 = arith.constant 4 : index
      %c0_139 = arith.constant 0 : index
      %c0_140 = arith.constant 0 : index
      %253 = vector.load %arg7[%c4, %c0_139, %c0_140] : memref<12x8x12xf32, #tpu.memory_space<vmem>>, vector<8x8x12xf32>
      %c25_i32_141 = arith.constant 25 : i32
      %254 = arith.muli %27, %c25_i32_141 : i32
      %c20_i32 = arith.constant 20 : i32
      %255 = arith.addi %254, %c20_i32 : i32
      %c0_i32_142 = arith.constant 0 : i32
      %256 = arith.addi %255, %c0_i32_142 : i32
      %257 = arith.index_cast %256 : i32 to index
      %c0_143 = arith.constant 0 : index
      %c0_144 = arith.constant 0 : index
      %258 = vector.load %arg4[%257, %c0_143, %c0_144] : memref<50x8x1xf32, #tpu.memory_space<vmem>>, vector<1x8x1xf32>
      %259 = vector.shape_cast %258 : vector<1x8x1xf32> to vector<8x1xf32>
      %260 = vector.extract_strided_slice %253 {offsets = [0, 0, 0], sizes = [8, 8, 8], strides = [1, 1, 1]} : vector<8x8x12xf32> to vector<8x8x8xf32>
      %261 = vector.shape_cast %259 : vector<8x1xf32> to vector<1x8x1xf32>
      %262 = vector.broadcast %261 : vector<1x8x1xf32> to vector<8x8x8xf32>
      %263 = arith.mulf %262, %260 : vector<8x8x8xf32>
      %264 = arith.addf %252, %263 : vector<8x8x8xf32>
      %c25_i32_145 = arith.constant 25 : i32
      %265 = arith.muli %27, %c25_i32_145 : i32
      %c20_i32_146 = arith.constant 20 : i32
      %266 = arith.addi %265, %c20_i32_146 : i32
      %c1_i32_147 = arith.constant 1 : i32
      %267 = arith.addi %266, %c1_i32_147 : i32
      %268 = arith.index_cast %267 : i32 to index
      %c0_148 = arith.constant 0 : index
      %c0_149 = arith.constant 0 : index
      %269 = vector.load %arg4[%268, %c0_148, %c0_149] : memref<50x8x1xf32, #tpu.memory_space<vmem>>, vector<1x8x1xf32>
      %270 = vector.shape_cast %269 : vector<1x8x1xf32> to vector<8x1xf32>
      %271 = vector.extract_strided_slice %253 {offsets = [0, 0, 1], sizes = [8, 8, 8], strides = [1, 1, 1]} : vector<8x8x12xf32> to vector<8x8x8xf32>
      %272 = vector.shape_cast %270 : vector<8x1xf32> to vector<1x8x1xf32>
      %273 = vector.broadcast %272 : vector<1x8x1xf32> to vector<8x8x8xf32>
      %274 = arith.mulf %273, %271 : vector<8x8x8xf32>
      %275 = arith.addf %264, %274 : vector<8x8x8xf32>
      %c25_i32_150 = arith.constant 25 : i32
      %276 = arith.muli %27, %c25_i32_150 : i32
      %c20_i32_151 = arith.constant 20 : i32
      %277 = arith.addi %276, %c20_i32_151 : i32
      %c2_i32_152 = arith.constant 2 : i32
      %278 = arith.addi %277, %c2_i32_152 : i32
      %279 = arith.index_cast %278 : i32 to index
      %c0_153 = arith.constant 0 : index
      %c0_154 = arith.constant 0 : index
      %280 = vector.load %arg4[%279, %c0_153, %c0_154] : memref<50x8x1xf32, #tpu.memory_space<vmem>>, vector<1x8x1xf32>
      %281 = vector.shape_cast %280 : vector<1x8x1xf32> to vector<8x1xf32>
      %282 = vector.extract_strided_slice %253 {offsets = [0, 0, 2], sizes = [8, 8, 8], strides = [1, 1, 1]} : vector<8x8x12xf32> to vector<8x8x8xf32>
      %283 = vector.shape_cast %281 : vector<8x1xf32> to vector<1x8x1xf32>
      %284 = vector.broadcast %283 : vector<1x8x1xf32> to vector<8x8x8xf32>
      %285 = arith.mulf %284, %282 : vector<8x8x8xf32>
      %286 = arith.addf %275, %285 : vector<8x8x8xf32>
      %c25_i32_155 = arith.constant 25 : i32
      %287 = arith.muli %27, %c25_i32_155 : i32
      %c20_i32_156 = arith.constant 20 : i32
      %288 = arith.addi %287, %c20_i32_156 : i32
      %c3_i32_157 = arith.constant 3 : i32
      %289 = arith.addi %288, %c3_i32_157 : i32
      %290 = arith.index_cast %289 : i32 to index
      %c0_158 = arith.constant 0 : index
      %c0_159 = arith.constant 0 : index
      %291 = vector.load %arg4[%290, %c0_158, %c0_159] : memref<50x8x1xf32, #tpu.memory_space<vmem>>, vector<1x8x1xf32>
      %292 = vector.shape_cast %291 : vector<1x8x1xf32> to vector<8x1xf32>
      %293 = vector.extract_strided_slice %253 {offsets = [0, 0, 3], sizes = [8, 8, 8], strides = [1, 1, 1]} : vector<8x8x12xf32> to vector<8x8x8xf32>
      %294 = vector.shape_cast %292 : vector<8x1xf32> to vector<1x8x1xf32>
      %295 = vector.broadcast %294 : vector<1x8x1xf32> to vector<8x8x8xf32>
      %296 = arith.mulf %295, %293 : vector<8x8x8xf32>
      %297 = arith.addf %286, %296 : vector<8x8x8xf32>
      %c25_i32_160 = arith.constant 25 : i32
      %298 = arith.muli %27, %c25_i32_160 : i32
      %c20_i32_161 = arith.constant 20 : i32
      %299 = arith.addi %298, %c20_i32_161 : i32
      %c4_i32_162 = arith.constant 4 : i32
      %300 = arith.addi %299, %c4_i32_162 : i32
      %301 = arith.index_cast %300 : i32 to index
      %c0_163 = arith.constant 0 : index
      %c0_164 = arith.constant 0 : index
      %302 = vector.load %arg4[%301, %c0_163, %c0_164] : memref<50x8x1xf32, #tpu.memory_space<vmem>>, vector<1x8x1xf32>
      %303 = vector.shape_cast %302 : vector<1x8x1xf32> to vector<8x1xf32>
      %304 = vector.extract_strided_slice %253 {offsets = [0, 0, 4], sizes = [8, 8, 8], strides = [1, 1, 1]} : vector<8x8x12xf32> to vector<8x8x8xf32>
      %305 = vector.shape_cast %303 : vector<8x1xf32> to vector<1x8x1xf32>
      %306 = vector.broadcast %305 : vector<1x8x1xf32> to vector<8x8x8xf32>
      %307 = arith.mulf %306, %304 : vector<8x8x8xf32>
      %308 = arith.addf %297, %307 : vector<8x8x8xf32>
      %309 = arith.index_cast %27 : i32 to index
      %c0_165 = arith.constant 0 : index
      %c0_166 = arith.constant 0 : index
      %310 = vector.load %arg5[%309, %c0_165, %c0_166] : memref<2x8x1xf32, #tpu.memory_space<vmem>>, vector<1x8x1xf32>
      %311 = vector.shape_cast %310 : vector<1x8x1xf32> to vector<8x1xf32>
      %312 = vector.shape_cast %311 : vector<8x1xf32> to vector<1x8x1xf32>
      %313 = vector.broadcast %312 : vector<1x8x1xf32> to vector<8x8x8xf32>
      %314 = arith.addf %308, %313 : vector<8x8x8xf32>
      %cst_167 = arith.constant 0.000000e+00 : f32
      %315 = vector.broadcast %cst_167 : f32 to vector<8x8x8xf32>
      %316 = arith.cmpf oge, %314, %315 : vector<8x8x8xf32>
      %cst_168 = arith.constant 0.00999999977 : f32
      %317 = vector.broadcast %cst_168 : f32 to vector<8x8x8xf32>
      %318 = arith.mulf %317, %314 : vector<8x8x8xf32>
      %319 = arith.select %316, %314, %318 : vector<8x8x8xi1>, vector<8x8x8xf32>
      %c2_169 = arith.constant 2 : index
      %c0_170 = arith.constant 0 : index
      %c2_171 = arith.constant 2 : index
      %320 = vector.load %arg7[%c2_169, %c0_170, %c2_171] : memref<12x8x12xf32, #tpu.memory_space<vmem>>, vector<8x8x8xf32>
      tpu.vector_store %arg7[%c2_169, %c0_170, %c2_171], %319 {strides = array<i32>} : memref<12x8x12xf32, #tpu.memory_space<vmem>>, vector<8x8x8xf32>,
    }
    %c2_i32_23 = arith.constant 2 : i32
    %c2_24 = arith.constant 2 : index
    %c0_25 = arith.constant 0 : index
    %c2_26 = arith.constant 2 : index
    %22 = vector.load %arg7[%c2_24, %c0_25, %c2_26] : memref<12x8x12xf32, #tpu.memory_space<vmem>>, vector<8x8x8xf32>
    %c0_27 = arith.constant 0 : index
    %c0_28 = arith.constant 0 : index
    %c0_29 = arith.constant 0 : index
    %c0_30 = arith.constant 0 : index
    %23 = vector.load %arg6[%c0_27, %c0_28, %c0_29, %c0_30] : memref<1x8x8x8xf32, #tpu.memory_space<vmem>>, vector<1x8x8x8xf32>
    %24 = vector.shape_cast %23 : vector<1x8x8x8xf32> to vector<8x8x8xf32>
    %25 = vector.shape_cast %22 : vector<8x8x8xf32> to vector<1x8x8x8xf32>
    tpu.vector_store %arg6[%c0_27, %c0_28, %c0_29, %c0_30], %25 {strides = array<i32>} : memref<1x8x8x8xf32, #tpu.memory_space<vmem>>, vector<1x8x8x8xf32>,
    return
  }
  func.func @transform_0(%arg0: i32) -> (i32, i32, i32, i32) {
    %c0_i32 = arith.constant 0 : i32
    %c0_i32_0 = arith.constant 0 : i32
    %c0_i32_1 = arith.constant 0 : i32
    %c0_i32_2 = arith.constant 0 : i32
    return %arg0, %c0_i32, %c0_i32_0, %c0_i32_1 : i32, i32, i32, i32
  }
  func.func @transform_1(%arg0: i32) -> (i32, i32, i32) {
    %c0_i32 = arith.constant 0 : i32
    %c0_i32_0 = arith.constant 0 : i32
    %c0_i32_1 = arith.constant 0 : i32
    %c0_i32_2 = arith.constant 0 : i32
    return %c0_i32, %c0_i32_0, %c0_i32_1 : i32, i32, i32
  }
  func.func @transform_2(%arg0: i32) -> (i32, i32) {
    %c0_i32 = arith.constant 0 : i32
    %c0_i32_0 = arith.constant 0 : i32
    %c0_i32_1 = arith.constant 0 : i32
    return %c0_i32, %c0_i32_0 : i32, i32
  }
  func.func @transform_3(%arg0: i32) -> (i32, i32, i32) {
    %c0_i32 = arith.constant 0 : i32
    %c0_i32_0 = arith.constant 0 : i32
    %c0_i32_1 = arith.constant 0 : i32
    %c0_i32_2 = arith.constant 0 : i32
    return %c0_i32, %c0_i32_0, %c0_i32_1 : i32, i32, i32
  }
  func.func @transform_4(%arg0: i32) -> (i32, i32, i32) {
    %c0_i32 = arith.constant 0 : i32
    %c0_i32_0 = arith.constant 0 : i32
    %c0_i32_1 = arith.constant 0 : i32
    %c0_i32_2 = arith.constant 0 : i32
    return %c0_i32, %c0_i32_0, %c0_i32_1 : i32, i32, i32
  }
  func.func @transform_5(%arg0: i32) -> (i32, i32, i32, i32) {
    %c0_i32 = arith.constant 0 : i32
    %c0_i32_0 = arith.constant 0 : i32
    %c0_i32_1 = arith.constant 0 : i32
    %c0_i32_2 = arith.constant 0 : i32
    return %arg0, %c0_i32, %c0_i32_0, %c0_i32_1 : i32, i32, i32, i32
  }
}

</mosaic_0001>

<bundles_post_ra>
// kernel: tpu_custom_call.1
= control target key start
LH: loop header
LB: loop body
LE: loop exit
PB: predicated region body
PF: predicated region fallthrough
CT: control target
= control target key end

     0   :  { %10 = vsyncpa [#allocation4], 0  ;;  %s4384_s0 = inlined_call_operand.vmem [shape: f32[2,9,16,9], index: 0, kind: input, shape index: {}]   ;;  %s4385_s1 = inlined_call_operand.vmem [shape: f32[36,8,1], index: 1, kind: input, shape index: {}]   ;;  %s4386_s2 = inlined_call_operand.vmem [shape: f32[8,1], index: 2, kind: input, shape index: {}]   ;;  %s4387_s3 = inlined_call_operand.vmem [shape: f32[50,8,1], index: 3, kind: input, shape index: {}]   ;;  %s4388_s4 = inlined_call_operand.vmem [shape: f32[2,8,1], index: 4, kind: input, shape index: {}]   ;;  %s4389_s5 = inlined_call_operand.hbm [shape: f32[2,8,8,8], index: 5, kind: output, shape index: {}]  }
   0x1   :  { %12 = vsyncpa [#allocation4 + $0x1], 0  ;;  %s3120_s18 = smov 0   ;;  %s3122_s19 = smov 0  }
   0x2   :  { %s3124_s20 = smov 0   ;;  %s3126_s21 = smov 0  }
   0x3 LB: > { %s3141_s22 = sadd.s32 4294967295, %s3033_s21   ;;  %s2619_s23 = sadd.s32 4294967294, %s3033_s21   ;;  %s3033_s21 = sphi %s3126_s21, %s4508_s21   ;;  %s3029_s20 = sphi %s3124_s20, %s4507_s20   ;;  %s3025_s19 = sphi %s3122_s19, %s4506_s19   ;;  %s3021_s18 = sphi %s3120_s18, %s4505_s18  }
   0x4   : > { %s3145_s24 = sadd.s32 1, %s3033_s21   ;;  %s135_s25 = sadd.s32 1, %s3029_s20 }
   0x5   : > { %s132_s26 = ssub.s32 %s3033_s21, %s3145_s24  ;;  %p145_p0 = scmp.ne.s32.totalorder %s3029_s20, %s3025_s19 }
   0x6   : > { %p133_p1 = scmp.eq.s32.totalorder %s132_s26, 0  ;;  %p146_p2 = scmp.eq.s32.totalorder %s3141_s22, 1 }
   0x7   : > { %p151_p3 = scmp.ne.s32.totalorder %s3025_s19, %s3021_s18  ;;  %p152_p4 = scmp.eq.s32.totalorder %s2619_s23, 1 }
   0x8   : > { %s3156_s27 = scalar_select %p133_p1, %s3029_s20, %s135_s25  }
   0x9   : > { %p3158_p5 = por %p146_p2, %p145_p0  ;;  %p3162_p6 = por %p152_p4, %p151_p3 }
   0xa   : > { %p2622_p7 = scmp.ge.s32.totalorder %s3033_s21, 1  ;;  %p190_p8 = scmp.lt.s32.totalorder %s3033_s21, 3 }
   0xc   : > { %p191_p9 = pnand %p2622_p7, %p190_p8 }
   0xd   : > { %s215_s30 = sand.u32 (!%p191_p9), 1, %s3025_s19   ;;  %p218_p10 = scmp.lt.s32.totalorder (!%p191_p9), %s3141_s22, 1  ;;  %vm223_vm0 = vcmask (!%p191_p9), 97280   ;;  %vm229_vm1 = vcmask (!%p191_p9), 15360   ;;  %vm242_vm2 = vcmask (!%p191_p9), 97360   ;;  %v3075_v0 = vmov (!%p191_p9), 0.0  }
   0xe   : > { %194 = sbr.rel (%p191_p9) target bundleno = 1928 (0x788), region = 40  ;;  %s3172_s6 = sshll.u32 (!%p191_p9), %s215_s30, 6  ;;  %224 = vst.msk [vmem:[#allocation2] sm:$0xff] (!%p191_p9), %vm223_vm0, %v3075_v0  ;;  %225 = vst.msk [vmem:[#allocation2 + $0x8] sm:$0xff] (!%p191_p9), %vm223_vm0, %v3075_v0  ;;  %v3209_v1 = vmov (!%p191_p9), 0.0   ;;  %v3211_v2 = vmov (!%p191_p9), 0.0  }
   0xf   : > { %227 = vst.msk [vmem:[#allocation2 + $0x50] sm:$0xff] (!%p191_p9), %vm223_vm0, %v3075_v0  ;;  %228 = vst.msk [vmem:[#allocation2 + $0x58] sm:$0xff] (!%p191_p9), %vm223_vm0, %v3075_v0  ;;  %s3207_s12 = scalar_lea.vmem (!%p191_p9), [#allocation3], %s3172_s6  ;;  %v3213_v3 = vmov (!%p191_p9), 0.0   ;;  %v3215_v4 = vmov (!%p191_p9), 0.0   ;;  %v3217_v5 = vmov (!%p191_p9), 0.0  }
  0x10   : > { %232 = vst.msk [vmem:[#allocation2 + $0x10] sm:$0xff] (!%p191_p9), %vm229_vm1, %v3075_v0  ;;  %233 = vst.msk [vmem:[#allocation2 + $0x18] sm:$0xff] (!%p191_p9), %vm229_vm1, %v3075_v0  ;;  %v3219_v6 = vmov (!%p191_p9), 0.0   ;;  %v3221_v7 = vmov (!%p191_p9), 0.0   ;;  %v3223_v8 = vmov (!%p191_p9), 0.0   ;;  %s3225_s13 = smov (!%p191_p9), 0  }
  0x11   : > { %234 = vst.msk [vmem:[#allocation2 + $0x20] sm:$0xff] (!%p191_p9), %vm229_vm1, %v3075_v0  ;;  %235 = vst.msk [vmem:[#allocation2 + $0x28] sm:$0xff] (!%p191_p9), %vm229_vm1, %v3075_v0 }
  0x12   : > { %236 = vst.msk [vmem:[#allocation2 + $0x30] sm:$0xff] (!%p191_p9), %vm229_vm1, %v3075_v0  ;;  %237 = vst.msk [vmem:[#allocation2 + $0x38] sm:$0xff] (!%p191_p9), %vm229_vm1, %v3075_v0 }
  0x13   : > { %238 = vst.msk [vmem:[#allocation2 + $0x40] sm:$0xff] (!%p191_p9), %vm229_vm1, %v3075_v0  ;;  %239 = vst.msk [vmem:[#allocation2 + $0x48] sm:$0xff] (!%p191_p9), %vm229_vm1, %v3075_v0 }
  0x14   : > { %230 = vst.msk [vmem:[#allocation2] sm:$0xff] (!%p191_p9), %vm229_vm1, %v3075_v0  ;;  %231 = vst.msk [vmem:[#allocation2 + $0x8] sm:$0xff] (!%p191_p9), %vm229_vm1, %v3075_v0 }
  0x15   : > { %240 = vst.msk [vmem:[#allocation2 + $0x50] sm:$0xff] %vm229_vm1, %v3075_v0  ;;  %241 = vst.msk [vmem:[#allocation2 + $0x58] sm:$0xff] %vm229_vm1, %v3075_v0  ;;  %s219_s7 = scalar_select %p218_p10, %s3141_s22, 1 }
  0x16   : > { %245 = vst.msk [vmem:[#allocation2 + $0x10] sm:$0xff] %vm242_vm2, %v3075_v0  ;;  %246 = vst.msk [vmem:[#allocation2 + $0x18] sm:$0xff] %vm242_vm2, %v3075_v0 }
  0x17   : > { %247 = vst.msk [vmem:[#allocation2 + $0x20] sm:$0xff] %vm242_vm2, %v3075_v0  ;;  %248 = vst.msk [vmem:[#allocation2 + $0x28] sm:$0xff] %vm242_vm2, %v3075_v0  ;;  %s2786_s8 = smul.u32 144, %s219_s7 }
  0x18   : > { %249 = vst.msk [vmem:[#allocation2 + $0x30] sm:$0xff] %vm242_vm2, %v3075_v0  ;;  %250 = vst.msk [vmem:[#allocation2 + $0x38] sm:$0xff] %vm242_vm2, %v3075_v0 }
  0x19   : > { %251 = vst.msk [vmem:[#allocation2 + $0x40] sm:$0xff] %vm242_vm2, %v3075_v0  ;;  %252 = vst.msk [vmem:[#allocation2 + $0x48] sm:$0xff] %vm242_vm2, %v3075_v0  ;;  %s3204_s11 = scalar_lea.vmem %s4384_s0, %s2786_s8 }
  0x1a   : > { %243 = vst.msk [vmem:[#allocation2] sm:$0xff] %vm242_vm2, %v3075_v0  ;;  %244 = vst.msk [vmem:[#allocation2 + $0x8] sm:$0xff] %vm242_vm2, %v3075_v0 }
  0x1b   : > { %253 = vst.msk [vmem:[#allocation2 + $0x50] sm:$0xff] %vm242_vm2, %v3075_v0  ;;  %254 = vst.msk [vmem:[#allocation2 + $0x58] sm:$0xff] %vm242_vm2, %v3075_v0 }
  0x1c LB: >> { %v3076_v9 = vmov 0   ;;  %s2625_s14 = smul.u32 72, %s3069_s13  ;;  %s3260_s23 = scalar_lea.vmem %s3204_s11, %s3069_s13  ;;  %s3069_s13 = sphi %s3225_s13, %s260_s13   ;;  %v3065_v8 = vphi %v3223_v8, %v4402_v8   ;;  %v3061_v7 = vphi %v3221_v7, %v4401_v7   ;;  %v3057_v6 = vphi %v3219_v6, %v4400_v6   ;;  %v3053_v5 = vphi %v3217_v5, %v4399_v5   ;;  %v3049_v4 = vphi %v3215_v4, %v4398_v4   ;;  %v3045_v3 = vphi %v3213_v3, %v4397_v3   ;;  %v3041_v2 = vphi %v3211_v2, %v4396_v2   ;;  %v3037_v1 = vphi %v3209_v1, %v4395_v1  }
  0x1d   : >> { %2920 = vset.pattern.permute.xlu0 %v3076_v9  ;;  %2921 = vset.pattern.permute.xlu1 %v3076_v9  ;;  %v3263_v19 = vld [vmem:[%s3260_s23 + $0x10] ss:$0 sm:$0xff]  ;;  %v2626_v20 = vld [vmem:[%s3260_s23] ss:$0 sm:$0xff]  ;;  %s3077_s25 = smov 127   ;;  %s260_s13 = sadd.s32 1, %s3069_s13  }
  0x1e   : >> { %s280_s17 = scalar_lea.vmem %s4385_s1, %s2625_s14  ;;  %v3270_v25 = vld [vmem:[%s3260_s23 + $0x30] ss:$0 sm:$0xff]  ;;  %v3273_v26 = vld [vmem:[%s3260_s23 + $0x20] ss:$0 sm:$0xff]  ;;  %v3294_v35 = vld [vmem:[%s3260_s23 + $0x14] ss:$0 sm:$0xff] }
  0x1f   : >> { %v2653_v10 = vld [vmem:[%s280_s17 + $0x10] sm:$0xff]  ;;  %v2729_v11 = vld [vmem:[%s280_s17 + $0x40] sm:$0xff]  ;;  %v2691_v12 = vld [vmem:[%s280_s17 + $0x28] sm:$0xff]  ;;  %p257_p11 = scmp.ge.s32.totalorder %s260_s13, 4  }
  0x20   : >> { %408 = vperm.xlu0 %2920, %v2653_v10   ;;  %790 = vperm.xlu1 %2921, %v2729_v11   ;;  %v281_v13 = vld [vmem:[%s280_s17] sm:$0xff]  ;;  %v2643_v14 = vld [vmem:[%s280_s17 + $0x8] sm:$0xff]  ;;  %v2663_v15 = vld [vmem:[%s280_s17 + $0x18] sm:$0xff]  ;;  %s3079_s7 = smov (%p257_p11), 2   ;;  %vm912_vm11 = vcmask (%p257_p11), 80912   ;;  %s3512_s8 = smov (%p257_p11), 0  }
  0x21   : >> { %v2681_v16 = vld [vmem:[%s280_s17 + $0x20] sm:$0xff]  ;;  %v2701_v17 = vld [vmem:[%s280_s17 + $0x30] sm:$0xff]  ;;  %v2719_v18 = vld [vmem:[%s280_s17 + $0x38] sm:$0xff] }
  0x22   : >> { %v3282_v31 = vld [vmem:[%s3260_s23 + $0x50] ss:$0 sm:$0xff]  ;;  %v3285_v32 = vld [vmem:[%s3260_s23 + $0x40] ss:$0 sm:$0xff]  ;;  %v2644_v37 = vld [vmem:[%s3260_s23 + $0x4] ss:$0 sm:$0xff] }
  0x23   : >> { %v3288_v33 = vld [vmem:[%s3260_s23 + $0x70] ss:$0 sm:$0xff]  ;;  %v3291_v34 = vld [vmem:[%s3260_s23 + $0x60] ss:$0 sm:$0xff]  ;;  %v3301_v38 = vld [vmem:[%s3260_s23 + $0x34] ss:$0 sm:$0xff] }
  0x24   : >> { %599 = vperm.xlu0 %2920, %v2691_v12   ;;  %284 = vperm.xlu1 %2921, %v281_v13   ;;  %v3308_v44 = vld [vmem:[%s3260_s23 + $0x24] ss:$0 sm:$0xff]  ;;  %v3315_v49 = vld [vmem:[%s3260_s23 + $0x54] ss:$0 sm:$0xff]  ;;  %v3344_v10 = vld [vmem:[%s3260_s23 + $0x8] ss:$0 sm:$0xff] }
  0x25   : >> { %v3325_v57 = vld [vmem:[%s3260_s23 + $0x44] ss:$0 sm:$0xff]  ;;  %v3332_v62 = vld [vmem:[%s3260_s23 + $0x74] ss:$0 sm:$0xff] }
  0x26   : >> { %v3341_v9 = vld [vmem:[%s3260_s23 + $0x64] ss:$0 sm:$0xff] }
  0x28   : >> { %351 = vperm.xlu0 %2920, %v2643_v14   ;;  %475 = vperm.xlu1 %2921, %v2663_v15  }
  0x2c   : >> { %542 = vperm.xlu0 %2920, %v2681_v16   ;;  %666 = vperm.xlu1 %2921, %v2701_v17  }
  0x30   : >> { %733 = vperm.xlu0 %2920, %v2719_v18  }
  0x9f   : >> { %v409_v21 = vpop.permute.xlu0 %408  ;;  %v3266_v22 = vpop.permute.xlu1 %790 }
  0xa0   : >> { %v412_v23 = vmul.f32 %v3263_v19, %v409_v21  ;;  %v411_v24 = vmul.f32 %v2626_v20, %v409_v21  ;;  %v414_v29 = vmul.f32 %v3270_v25, %v409_v21  ;;  %v413_v30 = vmul.f32 %v3273_v26, %v409_v21 }
  0xa1   : >> { %v416_v41 = vmul.f32 %v3282_v31, %v409_v21  ;;  %v415_v42 = vmul.f32 %v3285_v32, %v409_v21  ;;  %v418_v43 = vmul.f32 %v3288_v33, %v409_v21  ;;  %v417_v46 = vmul.f32 %v3291_v34, %v409_v21 }
  0xa2   : >> { %429 = vrot.lane.b32.xlu1 %v412_v23, %s3077_s25  ;;  %427 = vrot.lane.b32.xlu0 %v411_v24, %s3077_s25  ;;  %v2667_v23 = vld [vmem:[%s3260_s23 + $0x38] ss:$0 sm:$0xff] }
  0xa3   : >> { %v3277_v27 = vpop.permute.xlu0 %599  ;;  %v285_v28 = vpop.permute.xlu1 %284 }
  0xa4   : >> { %v322_v36 = vmul.f32 %v3270_v25, %v285_v28  ;;  %v321_v39 = vmul.f32 %v3273_v26, %v285_v28  ;;  %v324_v45 = vmul.f32 %v3282_v31, %v285_v28  ;;  %v320_v48 = vmul.f32 %v3263_v19, %v285_v28 }
  0xa5   : >> { %v323_v50 = vmul.f32 %v3285_v32, %v285_v28  ;;  %v319_v52 = vmul.f32 %v2626_v20, %v285_v28  ;;  %v326_v58 = vmul.f32 %v3288_v33, %v285_v28  ;;  %v325_v63 = vmul.f32 %v3291_v34, %v285_v28 }
  0xa6   : >> { %433 = vrot.lane.b32.xlu1 %v414_v29, %s3077_s25  ;;  %431 = vrot.lane.b32.xlu0 %v413_v30, %s3077_s25  ;;  %v328_v54 = vadd.f32 %v3061_v7, %v320_v48  ;;  %v330_v55 = vadd.f32 %v3053_v5, %v322_v36  ;;  %v329_v60 = vadd.f32 %v3057_v6, %v321_v39  ;;  %v3377_v30 = vld [vmem:[%s3260_s23 + $0x48] ss:$0 sm:$0xff]  ;;  %v2669_v36 = vld [vmem:[%s3260_s23 + $0x58] ss:$0 sm:$0xff] }
  0xa7   : >> { %v352_v40 = vpop.permute.xlu0 %351  ;;  %v327_v59 = vadd.f32 %v3065_v8, %v319_v52  ;;  %v332_v5 = vadd.f32 %v3045_v3, %v324_v45  ;;  %v2665_v8 = vld [vmem:[%s3260_s23 + $0x18] ss:$0 sm:$0xff]  ;;  %v331_v3 = vadd.f32 %v3049_v4, %v323_v50  ;;  %v334_v15 = vadd.f32 %v3037_v1, %v326_v58  ;;  %v2666_v4 = vld [vmem:[%s3260_s23 + $0x28] ss:$0 sm:$0xff]  ;;  %v3416_v50 = vld [vmem:[%s3260_s23 + $0x80] ss:$0 sm:$0xff] }
  0xa8   : >> { %v387_v47 = vmul.f32 %v3294_v35, %v352_v40  ;;  %v386_v51 = vmul.f32 %v2644_v37, %v352_v40  ;;  %v389_v53 = vmul.f32 %v3301_v38, %v352_v40  ;;  %v388_v56 = vmul.f32 %v3308_v44, %v352_v40  ;;  %v3386_v39 = vld [vmem:[%s3260_s23 + $0x68] ss:$0 sm:$0xff] }
  0xa9   : >> { %v391_v61 = vmul.f32 %v3315_v49, %v352_v40  ;;  %v390_v12 = vmul.f32 %v3325_v57, %v352_v40  ;;  %v393_v14 = vmul.f32 %v3332_v62, %v352_v40  ;;  %v392_v16 = vmul.f32 %v3341_v9, %v352_v40  ;;  %v3389_v40 = vld [vmem:[%s3260_s23 + $0x78] ss:$0 sm:$0xff] }
  0xaa   : >> { %437 = vrot.lane.b32.xlu1 %v416_v41, %s3077_s25  ;;  %435 = vrot.lane.b32.xlu0 %v415_v42, %s3077_s25  ;;  %v3335_v0 = vadd.f32 %v387_v47, %v328_v54  ;;  %v3337_v7 = vadd.f32 %v389_v53, %v330_v55  ;;  %v3347_v6 = vadd.f32 %v386_v51, %v327_v59  ;;  %v476_v54 = vpop.permute.xlu1 %475 }
  0xab   : >> { %v3349_v11 = vadd.f32 %v388_v56, %v329_v60  ;;  %v3354_v13 = vadd.f32 %v391_v61, %v332_v5  ;;  %v602_v17 = vmul.f32 %v3344_v10, %v3277_v27  ;;  %v603_v18 = vmul.f32 %v2665_v8, %v3277_v27  ;;  %v543_v53 = vpop.permute.xlu0 %542  ;;  %v2682_v60 = vld [vmem:[%s3260_s23 + $0xc] ss:$0 sm:$0xff]  ;;  %v2683_v61 = vld [vmem:[%s3260_s23 + $0x1c] ss:$0 sm:$0xff] }
  0xac   : >> { %v3363_v20 = vadd.f32 %v390_v12, %v331_v3  ;;  %v333_v21 = vadd.f32 %v3041_v2, %v325_v63  ;;  %v3368_v24 = vadd.f32 %v393_v14, %v334_v15  ;;  %v604_v28 = vmul.f32 %v2666_v4, %v3277_v27 }
  0xad   : >> { %v605_v29 = vmul.f32 %v2667_v23, %v3277_v27  ;;  %v606_v2 = vmul.f32 %v3377_v30, %v3277_v27  ;;  %v607_v37 = vmul.f32 %v2669_v36, %v3277_v27  ;;  %v608_v41 = vmul.f32 %v3386_v39, %v3277_v27 }
  0xae   : >> { %441 = vrot.lane.b32.xlu1 %v418_v43, %s3077_s25  ;;  %439 = vrot.lane.b32.xlu0 %v417_v46, %s3077_s25  ;;  %v3372_v1 = vadd.f32 %v392_v16, %v333_v21  ;;  %v609_v42 = vmul.f32 %v3389_v40, %v3277_v27  ;;  %v793_v43 = vmul.f32 %v3263_v19, %v3266_v22  ;;  %v3428_v56 = vpop.permute.xlu1 %666 }
  0xaf   : >> { %v794_v45 = vmul.f32 %v3273_v26, %v3266_v22  ;;  %v795_v46 = vmul.f32 %v3270_v25, %v3266_v22  ;;  %v796_v27 = vmul.f32 %v3285_v32, %v3266_v22  ;;  %v797_v47 = vmul.f32 %v3282_v31, %v3266_v22  ;;  %v3426_v55 = vpop.permute.xlu0 %733 }
  0xb0   : >> { %v798_v48 = vmul.f32 %v3291_v34, %v3266_v22  ;;  %v799_v51 = vmul.f32 %v3288_v33, %v3266_v22  ;;  %v800_v52 = vmul.f32 %v3416_v50, %v3266_v22  ;;  %v511_v63 = vmul.f32 %v2665_v8, %v476_v54 }
  0xb1   : >> { %v510_v22 = vmul.f32 %v3344_v10, %v476_v54  ;;  %v577_v15 = vmul.f32 %v2682_v60, %v543_v53  ;;  %v578_v16 = vmul.f32 %v2683_v61, %v543_v53  ;;  %v512_v21 = vmul.f32 %v2666_v4, %v476_v54 }
  0xb2   : >> { %618 = vrot.lane.b32.xlu1 %v602_v17, %s3077_s25  ;;  %620 = vrot.lane.b32.xlu0 %v603_v18, %s3077_s25  ;;  %v513_v17 = vmul.f32 %v2667_v23, %v476_v54  ;;  %v514_v23 = vmul.f32 %v3377_v30, %v476_v54  ;;  %v516_v30 = vmul.f32 %v3386_v39, %v476_v54 }
  0xb3   : >> { %v702_v39 = vmul.f32 %v3273_v26, %v3428_v56  ;;  %v704_v26 = vmul.f32 %v3285_v32, %v3428_v56  ;;  %v706_v32 = vmul.f32 %v3291_v34, %v3428_v56  ;;  %v708_v34 = vmul.f32 %v3416_v50, %v3428_v56 }
  0xb6   : >> { %622 = vrot.lane.b32.xlu1 %v604_v28, %s3077_s25  ;;  %624 = vrot.lane.b32.xlu0 %v605_v29, %s3077_s25  ;;  %v2684_v29 = vld [vmem:[%s3260_s23 + $0x2c] ss:$0 sm:$0xff] }
  0xba   : >> { %626 = vrot.lane.b32.xlu1 %v606_v2, %s3077_s25  ;;  %628 = vrot.lane.b32.xlu0 %v607_v37, %s3077_s25  ;;  %v2685_v2 = vld [vmem:[%s3260_s23 + $0x3c] ss:$0 sm:$0xff] }
  0xbe   : >> { %630 = vrot.lane.b32.xlu1 %v608_v41, %s3077_s25  ;;  %632 = vrot.lane.b32.xlu0 %v609_v42, %s3077_s25  ;;  %v579_v42 = vmul.f32 %v2684_v29, %v543_v53 }
  0xc2   : >> { %809 = vrot.lane.b32.xlu1 %v793_v43, %s3077_s25  ;;  %811 = vrot.lane.b32.xlu0 %v794_v45, %s3077_s25  ;;  %v580_v43 = vmul.f32 %v2685_v2, %v543_v53  ;;  %v515_v45 = vmul.f32 %v2669_v36, %v476_v54  ;;  %v517_v36 = vmul.f32 %v3389_v40, %v476_v54 }
  0xc6   : >> { %813 = vrot.lane.b32.xlu1 %v795_v46, %s3077_s25  ;;  %815 = vrot.lane.b32.xlu0 %v796_v27, %s3077_s25  ;;  %v2686_v27 = vld [vmem:[%s3260_s23 + $0x4c] ss:$0 sm:$0xff] }
  0xca   : >> { %817 = vrot.lane.b32.xlu1 %v797_v47, %s3077_s25  ;;  %819 = vrot.lane.b32.xlu0 %v798_v48, %s3077_s25  ;;  %v2687_v47 = vld [vmem:[%s3260_s23 + $0x5c] ss:$0 sm:$0xff] }
  0xcb   : >> { %v582_v60 = vmul.f32 %v2687_v47, %v543_v53 }
  0xce   : >> { %821 = vrot.lane.b32.xlu1 %v799_v51, %s3077_s25  ;;  %823 = vrot.lane.b32.xlu0 %v800_v52, %s3077_s25 }
 0x114   : >> { %v430_v58 = vpop.permute.xlu1 %429  ;;  %v428_v59 = vpop.permute.xlu0 %427 }
 0x115   : >> { %v452_v5 = vadd.f32 %v430_v58, %v3335_v0  ;;  %v451_v12 = vadd.f32 %v428_v59, %v3347_v6  ;;  %v581_v59 = vmul.f32 %v2686_v27, %v543_v53 }
 0x117   : >> { %v519_v3 = vadd.f32 %v511_v63, %v452_v5  ;;  %v518_v14 = vadd.f32 %v510_v22, %v451_v12  ;;  %v2688_v5 = vld [vmem:[%s3260_s23 + $0x6c] ss:$0 sm:$0xff]  ;;  %v2689_v22 = vld [vmem:[%s3260_s23 + $0x7c] ss:$0 sm:$0xff] }
 0x118   : >> { %v434_v18 = vpop.permute.xlu1 %433  ;;  %v432_v28 = vpop.permute.xlu0 %431 }
 0x119   : >> { %v454_v8 = vadd.f32 %v434_v18, %v3337_v7  ;;  %v453_v0 = vadd.f32 %v432_v28, %v3349_v11  ;;  %v585_v37 = vadd.f32 %v577_v15, %v518_v14  ;;  %v586_v10 = vadd.f32 %v578_v16, %v519_v3 }
 0x11a   : >> { %v583_v16 = vmul.f32 %v2688_v5, %v543_v53  ;;  %v701_v18 = vmul.f32 %v3263_v19, %v3428_v56  ;;  %v703_v19 = vmul.f32 %v3270_v25, %v3428_v56  ;;  %v705_v25 = vmul.f32 %v3282_v31, %v3428_v56 }
 0x11b   : >> { %v521_v41 = vadd.f32 %v513_v17, %v454_v8  ;;  %v520_v6 = vadd.f32 %v512_v21, %v453_v0  ;;  %v584_v17 = vmul.f32 %v2689_v22, %v543_v53  ;;  %v768_v8 = vmul.f32 %v3294_v35, %v3426_v55 }
 0x11c   : >> { %v438_v46 = vpop.permute.xlu1 %437  ;;  %v436_v4 = vpop.permute.xlu0 %435  ;;  %v769_v53 = vmul.f32 %v3308_v44, %v3426_v55  ;;  %v770_v35 = vmul.f32 %v3301_v38, %v3426_v55  ;;  %v771_v44 = vmul.f32 %v3325_v57, %v3426_v55  ;;  %v772_v38 = vmul.f32 %v3315_v49, %v3426_v55 }
 0x11d   : >> { %v456_v48 = vadd.f32 %v438_v46, %v3354_v13  ;;  %v455_v7 = vadd.f32 %v436_v4, %v3363_v20  ;;  %v587_v11 = vadd.f32 %v579_v42, %v520_v6  ;;  %v588_v51 = vadd.f32 %v580_v43, %v521_v41 }
 0x11e   : >> { %v773_v57 = vmul.f32 %v3341_v9, %v3426_v55  ;;  %v707_v31 = vmul.f32 %v3288_v33, %v3428_v56  ;;  %v774_v49 = vmul.f32 %v3332_v62, %v3426_v55 }
 0x11f   : >> { %v523_v52 = vadd.f32 %v515_v45, %v456_v48  ;;  %v522_v58 = vadd.f32 %v514_v23, %v455_v7 }
 0x120   : >> { %v442_v61 = vpop.permute.xlu1 %441  ;;  %v440_v63 = vpop.permute.xlu0 %439 }
 0x121   : >> { %v458_v12 = vadd.f32 %v442_v61, %v3368_v24  ;;  %v457_v13 = vadd.f32 %v440_v63, %v3372_v1  ;;  %v589_v3 = vadd.f32 %v581_v59, %v522_v58  ;;  %v590_v20 = vadd.f32 %v582_v60, %v523_v52  ;;  %v2727_v58 = vld [vmem:[%s3260_s23 + $0x84] ss:$0 sm:$0xff] }
 0x122   : >> { %v775_v9 = vmul.f32 %v2727_v58, %v3426_v55  ;;  %v841_v55 = vld [vmem:[%s4386_s2] sm:$0xff] (%p257_p11) }
 0x123   : >> { %v525_v14 = vadd.f32 %v517_v36, %v458_v12  ;;  %v524_v15 = vadd.f32 %v516_v30, %v457_v13 }
 0x124   : >> { %v619_v40 = vpop.permute.xlu1 %618  ;;  %v621_v54 = vpop.permute.xlu0 %620 }
 0x125   : >> { %v642_v21 = vadd.f32 %v619_v40, %v585_v37  ;;  %v643_v28 = vadd.f32 %v621_v54, %v586_v10  ;;  %v591_v29 = vadd.f32 %v583_v16, %v524_v15  ;;  %v592_v24 = vadd.f32 %v584_v17, %v525_v14 }
 0x127   : >> { %v709_v2 = vadd.f32 %v701_v18, %v642_v21  ;;  %v710_v1 = vadd.f32 %v702_v39, %v643_v28  ;;  %v3078_v21 = vmov (%p257_p11), 0  }
 0x128   : >> { %v623_v0 = vpop.permute.xlu1 %622  ;;  %v625_v41 = vpop.permute.xlu0 %624  ;;  %2922 = vset.pattern.permute.xlu0 (%p257_p11), %v3078_v21 }
 0x129   : >> { %v644_v37 = vadd.f32 %v623_v0, %v587_v11  ;;  %v645_v10 = vadd.f32 %v625_v41, %v588_v51  ;;  %v776_v6 = vadd.f32 %v768_v8, %v709_v2  ;;  %v777_v42 = vadd.f32 %v769_v53, %v710_v1  ;;  %844 = vperm.xlu0 (%p257_p11), %2922, %v841_v55  }
 0x12b   : >> { %v711_v43 = vadd.f32 %v703_v19, %v644_v37  ;;  %v712_v45 = vadd.f32 %v704_v26, %v645_v10 }
 0x12c   : >> { %v627_v46 = vpop.permute.xlu1 %626  ;;  %v629_v23 = vpop.permute.xlu0 %628 }
 0x12d   : >> { %v646_v4 = vadd.f32 %v627_v46, %v589_v3  ;;  %v647_v27 = vadd.f32 %v629_v23, %v590_v20  ;;  %v778_v47 = vadd.f32 %v770_v35, %v711_v43  ;;  %v779_v48 = vadd.f32 %v771_v44, %v712_v45 }
 0x12f   : >> { %v713_v7 = vadd.f32 %v705_v25, %v646_v4  ;;  %v714_v11 = vadd.f32 %v706_v32, %v647_v27 }
 0x130   : >> { %v631_v51 = vpop.permute.xlu1 %630  ;;  %v633_v52 = vpop.permute.xlu0 %632 }
 0x131   : >> { %v648_v59 = vadd.f32 %v631_v51, %v591_v29  ;;  %v649_v60 = vadd.f32 %v633_v52, %v592_v24  ;;  %v780_v36 = vadd.f32 %v772_v38, %v713_v7  ;;  %v781_v61 = vadd.f32 %v773_v57, %v714_v11 }
 0x133   : >> { %v715_v30 = vadd.f32 %v707_v31, %v648_v59  ;;  %v716_v63 = vadd.f32 %v708_v34, %v649_v60 }
 0x134   : >> { %v810_v5 = vpop.permute.xlu1 %809  ;;  %v812_v22 = vpop.permute.xlu0 %811 }
 0x135   : >> { %v833_v33 = vadd.f32 %v810_v5, %v776_v6   ;;  %v834_v12 = vadd.f32 %v812_v22, %v777_v42   ;;  %v782_v13 = vadd.f32 %v774_v49, %v715_v30  ;;  %v783_v3 = vadd.f32 %v775_v9, %v716_v63 }
 0x137   : >> { %v4401_v7 = vmov %v834_v12  ;;  %v4402_v8 = vmov %v833_v33 }
 0x138   : >> { %v814_v50 = vpop.permute.xlu1 %813  ;;  %v816_v56 = vpop.permute.xlu0 %815 }
 0x139   : >> { %v835_v20 = vadd.f32 %v814_v50, %v778_v47   ;;  %v836_v14 = vadd.f32 %v816_v56, %v779_v48  }
 0x13b   : >> { %v4399_v5 = vmov %v836_v14  ;;  %v4400_v6 = vmov %v835_v20 }
 0x13c   : >> { %v818_v15 = vpop.permute.xlu1 %817  ;;  %v820_v16 = vpop.permute.xlu0 %819 }
 0x13d   : >> { %v837_v17 = vadd.f32 %v818_v15, %v780_v36   ;;  %v838_v18 = vadd.f32 %v820_v16, %v781_v61   ;;  %259 = sbr.rel (!%p257_p11) target bundleno = 28 (0x1c), region = 135 }
 0x13f   : >> { %v4398_v4 = vmov %v837_v17 }
 0x140   : >> { %v822_v40 = vpop.permute.xlu1 %821  ;;  %v824_v39 = vpop.permute.xlu0 %823 }
 0x141   : >> { %v839_v54 = vadd.f32 %v822_v40, %v782_v13   ;;  %v840_v62 = vadd.f32 %v824_v39, %v783_v3   ;;  %v4397_v3 = vmov %v838_v18 }
 0x143   : >> { %v4395_v1 = vmov %v840_v62  ;;  %v4396_v2 = vmov %v839_v54 }
 0x1a8   : > { %v845_v28 = vpop.permute.xlu0 %844 }
 0x1a9   : > { %v848_v29 = vadd.f32 %v845_v28, %v834_v12  ;;  %v847_v24 = vadd.f32 %v845_v28, %v833_v33  ;;  %v849_v8 = vadd.f32 %v845_v28, %v835_v20  ;;  %v850_v53 = vadd.f32 %v845_v28, %v836_v14 }
 0x1aa   : > { %v851_v26 = vadd.f32 %v845_v28, %v837_v17  ;;  %v852_v41 = vadd.f32 %v845_v28, %v838_v18  ;;  %v853_v6 = vadd.f32 %v845_v28, %v839_v54  ;;  %v854_v42 = vadd.f32 %v845_v28, %v840_v62 }
 0x1ab   : > { %vm856_vm3 = vcmp.ge.f32.partialorder %v848_v29, 0.0  ;;  %v864_v19 = vmul.f32 0.01, %v848_v29  ;;  %vm855_vm4 = vcmp.ge.f32.partialorder %v847_v24, 0.0  ;;  %v863_v0 = vmul.f32 0.01, %v847_v24 }
 0x1ac   : > { %v865_v2 = vmul.f32 0.01, %v849_v8  ;;  %v866_v1 = vmul.f32 0.01, %v850_v53  ;;  %vm857_vm5 = vcmp.ge.f32.partialorder %v849_v8, 0.0  ;;  %vm858_vm6 = vcmp.ge.f32.partialorder %v850_v53, 0.0 }
 0x1ad   : > { %v872_v37 = vsel %vm856_vm3, %v848_v29, %v864_v19  ;;  %v871_v10 = vsel %vm855_vm4, %v847_v24, %v863_v0  ;;  %v867_v35 = vmul.f32 0.01, %v851_v26  ;;  %v868_v44 = vmul.f32 0.01, %v852_v41 }
 0x1ae   : > { %889 = vrot.lane.b32.xlu1 %v872_v37, %s3079_s7  ;;  %887 = vrot.lane.b32.xlu0 %v871_v10, %s3079_s7  ;;  %v873_v43 = vsel %vm857_vm5, %v849_v8, %v865_v2  ;;  %v874_v45 = vsel %vm858_vm6, %v850_v53, %v866_v1  ;;  %vm859_vm7 = vcmp.ge.f32.partialorder %v851_v26, 0.0  ;;  %vm860_vm8 = vcmp.ge.f32.partialorder %v852_v41, 0.0 }
 0x1af   : > { %v875_v25 = vsel %vm859_vm7, %v851_v26, %v867_v35  ;;  %v876_v46 = vsel %vm860_vm8, %v852_v41, %v868_v44  ;;  %v869_v32 = vmul.f32 0.01, %v853_v6  ;;  %v870_v23 = vmul.f32 0.01, %v854_v42 }
 0x1b0   : > { %vm861_vm9 = vcmp.ge.f32.partialorder %v853_v6, 0.0  ;;  %vm862_vm10 = vcmp.ge.f32.partialorder %v854_v42, 0.0 }
 0x1b1   : > { %v877_v4 = vsel %vm861_vm9, %v853_v6, %v869_v32  ;;  %v878_v27 = vsel %vm862_vm10, %v854_v42, %v870_v23 }
 0x1b2   : > { %891 = vrot.lane.b32.xlu1 %v873_v43, %s3079_s7  ;;  %893 = vrot.lane.b32.xlu0 %v874_v45, %s3079_s7 }
 0x1b6   : > { %895 = vrot.lane.b32.xlu1 %v875_v25, %s3079_s7  ;;  %897 = vrot.lane.b32.xlu0 %v876_v46, %s3079_s7 }
 0x1ba   : > { %899 = vrot.lane.b32.xlu1 %v877_v4, %s3079_s7  ;;  %901 = vrot.lane.b32.xlu0 %v878_v27, %s3079_s7 }
 0x220   : > { %v890_v47 = vpop.permute.xlu1 %889  ;;  %v888_v48 = vpop.permute.xlu0 %887 }
 0x221   : > { %914 = vst.msk [vmem:[#allocation2 + $0x18] sm:$0xff] %vm912_vm11, %v890_v47  ;;  %913 = vst.msk [vmem:[#allocation2 + $0x10] sm:$0xff] %vm912_vm11, %v888_v48 }
 0x224   : > { %v892_v7 = vpop.permute.xlu1 %891  ;;  %v894_v11 = vpop.permute.xlu0 %893 }
 0x225   : > { %915 = vst.msk [vmem:[#allocation2 + $0x20] sm:$0xff] %vm912_vm11, %v892_v7  ;;  %916 = vst.msk [vmem:[#allocation2 + $0x28] sm:$0xff] %vm912_vm11, %v894_v11 }
 0x228   : > { %v896_v38 = vpop.permute.xlu1 %895  ;;  %v898_v57 = vpop.permute.xlu0 %897 }
 0x229   : > { %917 = vst.msk [vmem:[#allocation2 + $0x30] sm:$0xff] %vm912_vm11, %v896_v38  ;;  %918 = vst.msk [vmem:[#allocation2 + $0x38] sm:$0xff] %vm912_vm11, %v898_v57 }
 0x22c   : > { %v900_v31 = vpop.permute.xlu1 %899  ;;  %v902_v51 = vpop.permute.xlu0 %901 }
 0x22d   : > { %919 = vst.msk [vmem:[#allocation2 + $0x40] sm:$0xff] %vm912_vm11, %v900_v31  ;;  %920 = vst.msk [vmem:[#allocation2 + $0x48] sm:$0xff] %vm912_vm11, %v902_v51 }
 0x22e LB: >> { %v3080_v34 = vmov 0   ;;  %s2730_s9 = smul.u32 200, %s3073_s8  ;;  %v3535_v33 = vld [vmem:[#allocation2 + $0x10] sm:$0xff]  ;;  %v3537_v12 = vld [vmem:[#allocation2] sm:$0xff]  ;;  %s3081_s14 = smov 127   ;;  %v3545_v56 = vld [vmem:[#allocation2 + $0x8] sm:$0xff]  ;;  %s3073_s8 = sphi %s3512_s8, %s926_s8  }
 0x22f   : >> { %2923 = vset.pattern.permute.xlu0 %v3080_v34  ;;  %2924 = vset.pattern.permute.xlu1 %v3080_v34  ;;  %v3543_v50 = vld [vmem:[#allocation2 + $0x20] sm:$0xff]  ;;  %v3553_v16 = vld [vmem:[#allocation2 + $0x18] sm:$0xff]  ;;  %v3559_v39 = vld [vmem:[#allocation2 + $0x28] sm:$0xff]  ;;  %s3082_s15 = smov 126   ;;  %s3083_s16 = smov 125  }
 0x230   : >> { %s3521_s13 = scalar_lea.vmem %s4387_s3, %s2730_s9  ;;  %v3551_v15 = vld [vmem:[#allocation2 + $0x30] sm:$0xff]  ;;  %v3565_v55 = vld [vmem:[#allocation2 + $0x38] sm:$0xff]  ;;  %s3084_s17 = smov 124  }
 0x231   : >> { %v938_v52 = vld [vmem:[%s3521_s13] sm:$0xff]  ;;  %v2732_v58 = vld [vmem:[%s3521_s13 + $0x8] sm:$0xff]  ;;  %v2736_v59 = vld [vmem:[%s3521_s13 + $0x18] sm:$0xff]  ;;  %s2779_s23 = sshll.u32 %s3073_s8, 3  ;;  %s3085_s7 = smov 2  }
 0x232   : >> { %941 = vperm.xlu0 %2923, %v938_v52   ;;  %1080 = vperm.xlu1 %2924, %v2736_v59   ;;  %v2740_v60 = vld [vmem:[%s3521_s13 + $0x28] sm:$0xff]  ;;  %v2734_v36 = vld [vmem:[%s3521_s13 + $0x10] sm:$0xff]  ;;  %v2744_v61 = vld [vmem:[%s3521_s13 + $0x38] sm:$0xff]  ;;  %s2236_s6 = scalar_lea.vmem %s4388_s4, %s2779_s23  ;;  %s926_s8 = sadd.s32 1, %s3073_s8  }
 0x233   : >> { %v2738_v30 = vld [vmem:[%s3521_s13 + $0x20] sm:$0xff]  ;;  %v2748_v63 = vld [vmem:[%s3521_s13 + $0x48] sm:$0xff]  ;;  %v2742_v49 = vld [vmem:[%s3521_s13 + $0x30] sm:$0xff]  ;;  %p923_p12 = scmp.ge.s32.totalorder %s926_s8, 2  }
 0x234   : >> { %v2746_v9 = vld [vmem:[%s3521_s13 + $0x40] sm:$0xff]  ;;  %s3086_s9 = smov (%p923_p12), 126   ;;  %vm2355_vm4 = vcmask (%p923_p12), 64512   ;;  %s2785_s8 = sshll.u32 (%p923_p12), %s3141_s22, 10 }
 0x235   : >> { %v3623_v31 = vld [vmem:[#allocation2 + $0x40] sm:$0xff]  ;;  %s2378_s10 = sshll.u32 (%p923_p12), %s3207_s12, 4  ;;  %s4343_s22 = scalar_lea.sflag (%p923_p12), [#allocation4], %s215_s30  ;;  %s4335_s10 = int_to_ptr.vmem [resolvable:$true] %s2378_s10 }
 0x236   : >> { %966 = vperm.xlu0 %2923, %v2732_v58   ;;  %1203 = vperm.xlu1 %2924, %v2740_v60  }
 0x23a   : >> { %1023 = vperm.xlu0 %2923, %v2734_v36   ;;  %1285 = vperm.xlu1 %2924, %v2744_v61  }
 0x23e   : >> { %1137 = vperm.xlu0 %2923, %v2738_v30   ;;  %1399 = vperm.xlu1 %2924, %v2748_v63  }
 0x242   : >> { %1228 = vperm.xlu0 %2923, %v2742_v49  }
 0x246   : >> { %1342 = vperm.xlu0 %2923, %v2746_v9  }
 0x2b1   : >> { %v3533_v5 = vpop.permute.xlu0 %941  ;;  %v1081_v19 = vpop.permute.xlu1 %1080 }
 0x2b2   : >> { %v1083_v0 = vmul.f32 %v1081_v19, %v3537_v12  ;;  %v1085_v41 = vmul.f32 %v1081_v19, %v3535_v33  ;;  %v1087_v10 = vmul.f32 %v1081_v19, %v3543_v50  ;;  %v1084_v2 = vmul.f32 %v1081_v19, %v3545_v56 }
 0x2b3   : >> { %v1089_v1 = vmul.f32 %v1081_v19, %v3551_v15  ;;  %v1086_v6 = vmul.f32 %v1081_v19, %v3553_v16  ;;  %v1088_v43 = vmul.f32 %v1081_v19, %v3559_v39  ;;  %v1090_v35 = vmul.f32 %v1081_v19, %v3565_v55 }
 0x2b5   : >> { %v967_v22 = vpop.permute.xlu0 %966  ;;  %v3621_v57 = vpop.permute.xlu1 %1203 }
 0x2b6   : >> { %v971_v13 = vmul.f32 %v967_v22, %v3535_v33  ;;  %v969_v3 = vmul.f32 %v967_v22, %v3537_v12  ;;  %v973_v20 = vmul.f32 %v967_v22, %v3543_v50  ;;  %v970_v14 = vmul.f32 %v967_v22, %v3545_v56 }
 0x2b7   : >> { %v975_v17 = vmul.f32 %v967_v22, %v3551_v15  ;;  %v972_v18 = vmul.f32 %v967_v22, %v3553_v16  ;;  %v974_v54 = vmul.f32 %v967_v22, %v3559_v39  ;;  %v976_v21 = vmul.f32 %v967_v22, %v3565_v55 }
 0x2b8   : >> { %989 = vrot.lane.b32.xlu0 %v971_v13, %s3081_s14  ;;  %985 = vrot.lane.b32.xlu1 %v969_v3, %s3081_s14 }
 0x2b9   : >> { %v1024_v40 = vpop.permute.xlu0 %1023  ;;  %v1286_v52 = vpop.permute.xlu1 %1285 }
 0x2ba   : >> { %v1027_v62 = vmul.f32 %v1024_v40, %v3545_v56  ;;  %v1029_v28 = vmul.f32 %v1024_v40, %v3553_v16  ;;  %v1031_v29 = vmul.f32 %v1024_v40, %v3559_v39  ;;  %v1026_v24 = vmul.f32 %v1024_v40, %v3537_v12 }
 0x2bb   : >> { %v1033_v8 = vmul.f32 %v1024_v40, %v3565_v55  ;;  %v1028_v53 = vmul.f32 %v1024_v40, %v3535_v33  ;;  %v1030_v26 = vmul.f32 %v1024_v40, %v3543_v50  ;;  %v1032_v37 = vmul.f32 %v1024_v40, %v3551_v15 }
 0x2bc   : >> { %993 = vrot.lane.b32.xlu0 %v973_v20, %s3081_s14  ;;  %987 = vrot.lane.b32.xlu1 %v970_v14, %s3081_s14  ;;  %v1288_v58 = vmul.f32 %v1286_v52, %v3545_v56  ;;  %v1290_v60 = vmul.f32 %v1286_v52, %v3553_v16  ;;  %v1292_v61 = vmul.f32 %v1286_v52, %v3559_v39 }
 0x2bd   : >> { %v1138_v42 = vpop.permute.xlu0 %1137  ;;  %v1289_v30 = vmul.f32 %v1286_v52, %v3535_v33  ;;  %v1294_v63 = vmul.f32 %v1286_v52, %v3565_v55  ;;  %v1291_v49 = vmul.f32 %v1286_v52, %v3543_v50  ;;  %v1293_v22 = vmul.f32 %v1286_v52, %v3551_v15 }
 0x2be   : >> { %v1141_v45 = vmul.f32 %v1138_v42, %v3545_v56  ;;  %v1143_v44 = vmul.f32 %v1138_v42, %v3553_v16  ;;  %v1145_v25 = vmul.f32 %v1138_v42, %v3559_v39  ;;  %v1140_v46 = vmul.f32 %v1138_v42, %v3537_v12 }
 0x2bf   : >> { %v1147_v32 = vmul.f32 %v1138_v42, %v3565_v55  ;;  %v1142_v23 = vmul.f32 %v1138_v42, %v3535_v33  ;;  %v1144_v27 = vmul.f32 %v1138_v42, %v3543_v50  ;;  %v1146_v48 = vmul.f32 %v1138_v42, %v3551_v15 }
 0x2c0   : >> { %997 = vrot.lane.b32.xlu0 %v975_v17, %s3081_s14  ;;  %991 = vrot.lane.b32.xlu1 %v972_v18, %s3081_s14  ;;  %v1295_v3 = vmul.f32 %v1286_v52, %v3623_v31 }
 0x2c1   : >> { %v1229_v4 = vpop.permute.xlu0 %1228 }
 0x2c2   : >> { %v1232_v47 = vmul.f32 %v1229_v4, %v3535_v33  ;;  %v1234_v7 = vmul.f32 %v1229_v4, %v3543_v50  ;;  %v1236_v11 = vmul.f32 %v1229_v4, %v3551_v15  ;;  %v1231_v38 = vmul.f32 %v1229_v4, %v3545_v56 }
 0x2c3   : >> { %v1238_v51 = vmul.f32 %v1229_v4, %v3623_v31  ;;  %v1233_v34 = vmul.f32 %v1229_v4, %v3553_v16  ;;  %v1235_v59 = vmul.f32 %v1229_v4, %v3559_v39  ;;  %v1237_v36 = vmul.f32 %v1229_v4, %v3565_v55 }
 0x2c4   : >> { %995 = vrot.lane.b32.xlu1 %v974_v54, %s3081_s14  ;;  %1044 = vrot.lane.b32.xlu0 %v1027_v62, %s3082_s15  ;;  %v1400_v54 = vpop.permute.xlu1 %1399 }
 0x2c5   : >> { %v1343_v9 = vpop.permute.xlu0 %1342  ;;  %v1402_v62 = vmul.f32 %v1400_v54, %v3545_v56  ;;  %v1409_v42 = vmul.f32 %v1400_v54, %v3623_v31 }
 0x2c6   : >> { %v1346_v13 = vmul.f32 %v1343_v9, %v3535_v33  ;;  %v1348_v20 = vmul.f32 %v1343_v9, %v3543_v50  ;;  %v1350_v14 = vmul.f32 %v1343_v9, %v3551_v15  ;;  %v1345_v17 = vmul.f32 %v1343_v9, %v3545_v56 }
 0x2c7   : >> { %v1352_v18 = vmul.f32 %v1343_v9, %v3623_v31  ;;  %v1347_v40 = vmul.f32 %v1343_v9, %v3553_v16 }
 0x2c8   : >> { %999 = vrot.lane.b32.xlu1 %v976_v21, %s3081_s14  ;;  %1048 = vrot.lane.b32.xlu0 %v1029_v28, %s3082_s15  ;;  %v1349_v21 = vmul.f32 %v1343_v9, %v3559_v39  ;;  %v1404_v28 = vmul.f32 %v1400_v54, %v3553_v16 }
 0x2cc   : >> { %1052 = vrot.lane.b32.xlu0 %v1031_v29, %s3082_s15  ;;  %1042 = vrot.lane.b32.xlu1 %v1026_v24, %s3082_s15  ;;  %v1351_v29 = vmul.f32 %v1343_v9, %v3565_v55 }
 0x2d0   : >> { %1056 = vrot.lane.b32.xlu0 %v1033_v8, %s3082_s15  ;;  %1046 = vrot.lane.b32.xlu1 %v1028_v53, %s3082_s15  ;;  %v1406_v8 = vmul.f32 %v1400_v54, %v3559_v39  ;;  %v1403_v53 = vmul.f32 %v1400_v54, %v3535_v33 }
 0x2d4   : >> { %1099 = vrot.lane.b32.xlu0 %v1083_v0, %s3083_s16  ;;  %1050 = vrot.lane.b32.xlu1 %v1030_v26, %s3082_s15  ;;  %v1408_v0 = vmul.f32 %v1400_v54, %v3565_v55  ;;  %v1405_v26 = vmul.f32 %v1400_v54, %v3543_v50 }
 0x2d8   : >> { %1103 = vrot.lane.b32.xlu0 %v1085_v41, %s3083_s16  ;;  %1054 = vrot.lane.b32.xlu1 %v1032_v37, %s3082_s15  ;;  %v2750_v37 = vld [vmem:[%s3521_s13 + $0x50] sm:$0xff] }
 0x2dc   : >> { %1107 = vrot.lane.b32.xlu0 %v1087_v10, %s3083_s16  ;;  %1101 = vrot.lane.b32.xlu1 %v1084_v2, %s3083_s16  ;;  %v1407_v2 = vmul.f32 %v1400_v54, %v3551_v15 }
 0x2e0   : >> { %1111 = vrot.lane.b32.xlu0 %v1089_v1, %s3083_s16  ;;  %1105 = vrot.lane.b32.xlu1 %v1086_v6, %s3083_s16 }
 0x2e4   : >> { %1109 = vrot.lane.b32.xlu1 %v1088_v43, %s3083_s16  ;;  %1158 = vrot.lane.b32.xlu0 %v1141_v45, %s3084_s17  ;;  %v2752_v43 = vld [vmem:[%s3521_s13 + $0x58] sm:$0xff] }
 0x2e8   : >> { %1113 = vrot.lane.b32.xlu1 %v1090_v35, %s3083_s16  ;;  %1162 = vrot.lane.b32.xlu0 %v1143_v44, %s3084_s17 }
 0x2ec   : >> { %1166 = vrot.lane.b32.xlu0 %v1145_v25, %s3084_s17  ;;  %1156 = vrot.lane.b32.xlu1 %v1140_v46, %s3084_s17 }
 0x2f0   : >> { %1170 = vrot.lane.b32.xlu0 %v1147_v32, %s3084_s17  ;;  %1160 = vrot.lane.b32.xlu1 %v1142_v23, %s3084_s17 }
 0x2f4   : >> { %1164 = vrot.lane.b32.xlu1 %v1144_v27, %s3084_s17  ;;  %1249 = vrot.lane.b32.xlu0 %v1232_v47, %s3081_s14 }
 0x2f8   : >> { %1168 = vrot.lane.b32.xlu1 %v1146_v48, %s3084_s17  ;;  %1253 = vrot.lane.b32.xlu0 %v1234_v7, %s3081_s14 }
 0x2fc   : >> { %1257 = vrot.lane.b32.xlu0 %v1236_v11, %s3081_s14  ;;  %1247 = vrot.lane.b32.xlu1 %v1231_v38, %s3081_s14  ;;  %v944_v38 = vmul.f32 %v3533_v5, %v3537_v12 }
 0x300   : >> { %1261 = vrot.lane.b32.xlu0 %v1238_v51, %s3081_s14  ;;  %1251 = vrot.lane.b32.xlu1 %v1233_v34, %s3081_s14 }
 0x304   : >> { %1304 = vrot.lane.b32.xlu0 %v1288_v58, %s3082_s15  ;;  %1255 = vrot.lane.b32.xlu1 %v1235_v59, %s3081_s14 }
 0x308   : >> { %1308 = vrot.lane.b32.xlu0 %v1290_v60, %s3082_s15  ;;  %1259 = vrot.lane.b32.xlu1 %v1237_v36, %s3081_s14 }
 0x30c   : >> { %1312 = vrot.lane.b32.xlu0 %v1292_v61, %s3082_s15  ;;  %1306 = vrot.lane.b32.xlu1 %v1289_v30, %s3082_s15  ;;  %v1206_v61 = vmul.f32 %v3621_v57, %v3545_v56 }
 0x310   : >> { %1316 = vrot.lane.b32.xlu0 %v1294_v63, %s3082_s15  ;;  %1310 = vrot.lane.b32.xlu1 %v1291_v49, %s3082_s15 }
 0x314   : >> { %1314 = vrot.lane.b32.xlu1 %v1293_v22, %s3082_s15  ;;  %1363 = vrot.lane.b32.xlu0 %v1346_v13, %s3083_s16 }
 0x318   : >> { %1318 = vrot.lane.b32.xlu1 %v1295_v3, %s3082_s15  ;;  %1367 = vrot.lane.b32.xlu0 %v1348_v20, %s3083_s16 }
 0x31c   : >> { %1371 = vrot.lane.b32.xlu0 %v1350_v14, %s3083_s16  ;;  %1361 = vrot.lane.b32.xlu1 %v1345_v17, %s3083_s16 }
 0x320   : >> { %1375 = vrot.lane.b32.xlu0 %v1352_v18, %s3083_s16  ;;  %1365 = vrot.lane.b32.xlu1 %v1347_v40, %s3083_s16 }
 0x324   : >> { %1418 = vrot.lane.b32.xlu0 %v1402_v62, %s3084_s17  ;;  %1369 = vrot.lane.b32.xlu1 %v1349_v21, %s3083_s16 }
 0x328   : >> { %1422 = vrot.lane.b32.xlu0 %v1404_v28, %s3084_s17  ;;  %1373 = vrot.lane.b32.xlu1 %v1351_v29, %s3083_s16 }
 0x32a   : >> { %v986_v24 = vpop.permute.xlu1 %985  ;;  %v3679_v41 = vpop.permute.xlu0 %989 }
 0x32b   : >> { %v1009_v51 = vadd.f32 %v986_v24, %v944_v38 }
 0x32c   : >> { %1426 = vrot.lane.b32.xlu0 %v1406_v8, %s3084_s17  ;;  %1420 = vrot.lane.b32.xlu1 %v1403_v53, %s3084_s17 }
 0x32e   : >> { %v3675_v19 = vpop.permute.xlu1 %987  ;;  %v3688_v1 = vpop.permute.xlu0 %993 }
 0x330   : >> { %1430 = vrot.lane.b32.xlu0 %v1408_v0, %s3084_s17  ;;  %1424 = vrot.lane.b32.xlu1 %v1405_v26, %s3084_s17 }
 0x332   : >> { %v3684_v10 = vpop.permute.xlu1 %991  ;;  %v3697_v35 = vpop.permute.xlu0 %997 }
 0x334   : >> { %1464 = vperm.xlu0 %2923, %v2750_v37   ;;  %1428 = vrot.lane.b32.xlu1 %v1407_v2, %s3084_s17 }
 0x336   : >> { %v3690_v6 = vpop.permute.xlu1 %995  ;;  %v3699_v25 = vpop.permute.xlu0 %1044 }
 0x338   : >> { %1432 = vrot.lane.b32.xlu1 %v1409_v42, %s3084_s17 }
 0x33a   : >> { %v3695_v45 = vpop.permute.xlu1 %999  ;;  %v3705_v23 = vpop.permute.xlu0 %1048 }
 0x33c   : >> { %1489 = vperm.xlu1 %2924, %v2752_v43  }
 0x33e   : >> { %v1043_v44 = vpop.permute.xlu1 %1042  ;;  %v3709_v27 = vpop.permute.xlu0 %1052 }
 0x33f   : >> { %v1066_v58 = vadd.f32 %v1043_v44, %v1009_v51 }
 0x342   : >> { %v3701_v46 = vpop.permute.xlu1 %1046  ;;  %v3715_v7 = vpop.permute.xlu0 %1056 }
 0x343   : >> { %4403 = vst [vmem:[#allocation6_spill] sm:$0xff] %v3715_v7 }
 0x346   : >> { %v3703_v32 = vpop.permute.xlu1 %1050  ;;  %v1100_v34 = vpop.permute.xlu0 %1099 }
 0x347   : >> { %v1123_v59 = vadd.f32 %v1100_v34, %v1066_v58 }
 0x34a   : >> { %v3707_v4 = vpop.permute.xlu1 %1054  ;;  %v3759_v29 = vpop.permute.xlu0 %1103 }
 0x34e   : >> { %v3711_v47 = vpop.permute.xlu1 %1101  ;;  %v3763_v8 = vpop.permute.xlu0 %1107 }
 0x352   : >> { %v3713_v48 = vpop.permute.xlu1 %1105  ;;  %v3767_v0 = vpop.permute.xlu0 %1111 }
 0x356   : >> { %v3717_v11 = vpop.permute.xlu1 %1109  ;;  %v3773_v43 = vpop.permute.xlu0 %1158 }
 0x35a   : >> { %v3721_v52 = vpop.permute.xlu1 %1113  ;;  %v3781_v51 = vpop.permute.xlu0 %1162 }
 0x35b   : >> { %4404 = vst [vmem:[#allocation7_spill] sm:$0xff] %v3721_v52 }
 0x35e   : >> { %v1157_v60 = vpop.permute.xlu1 %1156 }
 0x35f   : >> { %v1180_v36 = vadd.f32 %v1157_v60, %v1123_v59  ;;  %v3787_v59 = vld [vmem:[#allocation2 + $0x48] sm:$0xff] }
 0x361   : >> { %v3725_v30 = vadd.f32 %v1206_v61, %v1180_v36  ;;  %v3791_v61 = vpop.permute.xlu0 %1166 }
 0x362   : >> { %v3727_v63 = vpop.permute.xlu1 %1160 }
 0x366   : >> { %v3729_v49 = vpop.permute.xlu1 %1164 }
 0x36a   : >> { %v3731_v9 = vpop.permute.xlu1 %1168 }
 0x36e   : >> { %v3733_v12 = vpop.permute.xlu1 %1247 }
 0x372   : >> { %v3735_v22 = vpop.permute.xlu1 %1251 }
 0x376   : >> { %v3737_v13 = vpop.permute.xlu1 %1255 }
 0x37a   : >> { %v3739_v3 = vpop.permute.xlu1 %1259 }
 0x37e   : >> { %v3741_v20 = vpop.permute.xlu1 %1306 }
 0x382   : >> { %v3743_v14 = vpop.permute.xlu1 %1310 }
 0x383   : >> { %4405 = vst [vmem:[#allocation8_spill] sm:$0xff] %v3743_v14  ;;  %v946_v14 = vmul.f32 %v3533_v5, %v3535_v33 }
 0x386   : >> { %v3745_v17 = vpop.permute.xlu1 %1314 }
 0x387   : >> { %4406 = vst [vmem:[#allocation9_spill] sm:$0xff] %v3745_v17  ;;  %v2776_v17 = vld [vmem:[%s3521_s13 + $0xb8] sm:$0xff] }
 0x38a   : >> { %v3747_v18 = vpop.permute.xlu1 %1318 }
 0x38b   : >> { %4407 = vst [vmem:[#allocation10_spill] sm:$0xff] %v3747_v18 }
 0x38e   : >> { %v3749_v40 = vpop.permute.xlu1 %1361 }
 0x38f   : >> { %4408 = vst [vmem:[#allocation11_spill] sm:$0xff] %v3749_v40 }
 0x392   : >> { %v3751_v54 = vpop.permute.xlu1 %1365 }
 0x393   : >> { %4409 = vst [vmem:[#allocation12_spill] sm:$0xff] %v3751_v54 }
 0x396   : >> { %v3753_v62 = vpop.permute.xlu1 %1369 }
 0x397   : >> { %4410 = vst [vmem:[#allocation13_spill] sm:$0xff] %v3753_v62 }
 0x39a   : >> { %v3755_v21 = vpop.permute.xlu1 %1373 }
 0x39b   : >> { %4411 = vst [vmem:[#allocation14_spill] sm:$0xff] %v3755_v21 }
 0x39e   : >> { %v3757_v28 = vpop.permute.xlu1 %1420 }
 0x39f   : >> { %4412 = vst [vmem:[#allocation15_spill] sm:$0xff] %v3757_v28 }
 0x3a2   : >> { %v3761_v24 = vpop.permute.xlu1 %1424 }
 0x3a3   : >> { %4413 = vst [vmem:[#allocation16_spill] sm:$0xff] %v3761_v24 }
 0x3a6   : >> { %v3765_v53 = vpop.permute.xlu1 %1428 }
 0x3a7   : >> { %4414 = vst [vmem:[#allocation17_spill] sm:$0xff] %v3765_v53 }
 0x3aa   : >> { %v3769_v26 = vpop.permute.xlu1 %1432 }
 0x3ab   : >> { %4415 = vst [vmem:[#allocation18_spill] sm:$0xff] %v3769_v26 }
 0x3bb   : >> { %v1490_v37 = vpop.permute.xlu1 %1489 }
 0x3bc   : >> { %v1493_v2 = vmul.f32 %v1490_v37, %v3553_v16  ;;  %v1492_v42 = vmul.f32 %v1490_v37, %v3535_v33  ;;  %v1495_v44 = vmul.f32 %v1490_v37, %v3559_v39  ;;  %v1494_v38 = vmul.f32 %v1490_v37, %v3543_v50 }
 0x3bd   : >> { %v1497_v34 = vmul.f32 %v1490_v37, %v3565_v55  ;;  %v1496_v58 = vmul.f32 %v1490_v37, %v3551_v15  ;;  %v1499_v60 = vmul.f32 %v1490_v37, %v3787_v59  ;;  %v1498_v36 = vmul.f32 %v1490_v37, %v3623_v31 }
 0x3be   : >> { %1510 = vrot.lane.b32.xlu1 %v1493_v2, %s3081_s14  ;;  %1508 = vrot.lane.b32.xlu0 %v1492_v42, %s3081_s14  ;;  %v2754_v2 = vld [vmem:[%s3521_s13 + $0x60] sm:$0xff]  ;;  %v3796_v42 = vpop.permute.xlu0 %1170 }
 0x3bf   : >> { %4416 = vst [vmem:[#allocation19_spill] sm:$0xff] %v3796_v42 }
 0x3c2   : >> { %1514 = vrot.lane.b32.xlu1 %v1495_v44, %s3081_s14  ;;  %1512 = vrot.lane.b32.xlu0 %v1494_v38, %s3081_s14  ;;  %v3798_v44 = vpop.permute.xlu0 %1249 }
 0x3c6   : >> { %1518 = vrot.lane.b32.xlu1 %v1497_v34, %s3081_s14  ;;  %1516 = vrot.lane.b32.xlu0 %v1496_v58, %s3081_s14  ;;  %v3800_v38 = vpop.permute.xlu0 %1253 }
 0x3ca   : >> { %1522 = vrot.lane.b32.xlu1 %v1499_v60, %s3081_s14  ;;  %1520 = vrot.lane.b32.xlu0 %v1498_v36, %s3081_s14  ;;  %v3802_v34 = vpop.permute.xlu0 %1257 }
 0x3ce   : >> { %1546 = vperm.xlu0 %2923, %v2754_v2   ;;  %v3804_v58 = vpop.permute.xlu0 %1261 }
 0x3cf   : >> { %4417 = vst [vmem:[#allocation20_spill] sm:$0xff] %v3804_v58 }
 0x3d2   : >> { %v3806_v26 = vpop.permute.xlu0 %1304 }
 0x3d6   : >> { %v3808_v37 = vpop.permute.xlu0 %1308 }
 0x3d7   : >> { %4418 = vst [vmem:[#allocation21_spill] sm:$0xff] %v3808_v37  ;;  %v950_v37 = vmul.f32 %v3533_v5, %v3551_v15 }
 0x3d9   : >> { %v1015_v40 = vadd.f32 %v3697_v35, %v950_v37 }
 0x3da   : >> { %v3810_v18 = vpop.permute.xlu0 %1312 }
 0x3db   : >> { %4419 = vst [vmem:[#allocation22_spill] sm:$0xff] %v3810_v18 }
 0x3de   : >> { %v3812_v60 = vpop.permute.xlu0 %1316 }
 0x3df   : >> { %4420 = vst [vmem:[#allocation23_spill] sm:$0xff] %v3812_v60 }
 0x3e2   : >> { %v3814_v36 = vpop.permute.xlu0 %1363 }
 0x3e3   : >> { %4421 = vst [vmem:[#allocation24_spill] sm:$0xff] %v3814_v36 }
 0x3e6   : >> { %v3816_v2 = vpop.permute.xlu0 %1367 }
 0x3e7   : >> { %4422 = vst [vmem:[#allocation25_spill] sm:$0xff] %v3816_v2 }
 0x3ea   : >> { %v3818_v42 = vpop.permute.xlu0 %1371 }
 0x3eb   : >> { %4423 = vst [vmem:[#allocation26_spill] sm:$0xff] %v3818_v42 }
 0x3ee   : >> { %v3820_v52 = vpop.permute.xlu0 %1375 }
 0x3ef   : >> { %4424 = vst [vmem:[#allocation27_spill] sm:$0xff] %v3820_v52 }
 0x3f2   : >> { %v3822_v7 = vpop.permute.xlu0 %1418 }
 0x3f3   : >> { %4425 = vst [vmem:[#allocation28_spill] sm:$0xff] %v3822_v7 }
 0x3f6   : >> { %v3824_v53 = vpop.permute.xlu0 %1422 }
 0x3f7   : >> { %4426 = vst [vmem:[#allocation29_spill] sm:$0xff] %v3824_v53 }
 0x3fa   : >> { %v3826_v58 = vpop.permute.xlu0 %1426 }
 0x3fb   : >> { %4427 = vst [vmem:[#allocation30_spill] sm:$0xff] %v3826_v58 }
 0x3fe   : >> { %v3828_v24 = vpop.permute.xlu0 %1430 }
 0x3ff   : >> { %4428 = vst [vmem:[#allocation31_spill] sm:$0xff] %v3828_v24 }
 0x402   : >> { %v3830_v21 = vpop.permute.xlu0 %1464 }
 0x403   : >> { %4429 = vst [vmem:[#allocation32_spill] sm:$0xff] %v3830_v21 }
 0x430   : >> { %v3832_v62 = vpop.permute.xlu0 %1508 }
 0x431   : >> { %4430 = vst [vmem:[#allocation33_spill] sm:$0xff] %v3832_v62 }
 0x434   : >> { %v3834_v54 = vpop.permute.xlu0 %1512 }
 0x435   : >> { %4431 = vst [vmem:[#allocation34_spill] sm:$0xff] %v3834_v54  ;;  %v2756_v54 = vld [vmem:[%s3521_s13 + $0x68] sm:$0xff] }
 0x438   : >> { %v3836_v28 = vpop.permute.xlu0 %1516 }
 0x439   : >> { %4432 = vst [vmem:[#allocation35_spill] sm:$0xff] %v3836_v28 }
 0x43c   : >> { %v3838_v2 = vpop.permute.xlu0 %1520 }
 0x43d   : >> { %4433 = vst [vmem:[#allocation36_spill] sm:$0xff] %v3838_v2 }
 0x44d   : >> { %v1547_v42 = vpop.permute.xlu0 %1546 }
 0x44e   : >> { %v1550_v52 = vmul.f32 %v1547_v42, %v3553_v16  ;;  %v1549_v53 = vmul.f32 %v1547_v42, %v3535_v33  ;;  %v1552_v24 = vmul.f32 %v1547_v42, %v3559_v39  ;;  %v1551_v58 = vmul.f32 %v1547_v42, %v3543_v50 }
 0x44f   : >> { %v1554_v2 = vmul.f32 %v1547_v42, %v3565_v55  ;;  %v1553_v28 = vmul.f32 %v1547_v42, %v3551_v15 }
 0x450   : >> { %1567 = vrot.lane.b32.xlu0 %v1550_v52, %s3082_s15  ;;  %1565 = vrot.lane.b32.xlu1 %v1549_v53, %s3082_s15  ;;  %v1556_v52 = vmul.f32 %v1547_v42, %v3787_v59  ;;  %v1555_v53 = vmul.f32 %v1547_v42, %v3623_v31 }
 0x454   : >> { %1571 = vrot.lane.b32.xlu0 %v1552_v24, %s3082_s15  ;;  %1569 = vrot.lane.b32.xlu1 %v1551_v58, %s3082_s15  ;;  %v3857_v24 = vpop.permute.xlu1 %1510 }
 0x455   : >> { %4434 = vst [vmem:[#allocation37_spill] sm:$0xff] %v3857_v24 }
 0x458   : >> { %1575 = vrot.lane.b32.xlu0 %v1554_v2, %s3082_s15  ;;  %1573 = vrot.lane.b32.xlu1 %v1553_v28, %s3082_s15  ;;  %v3859_v58 = vpop.permute.xlu1 %1514 }
 0x459   : >> { %4435 = vst [vmem:[#allocation38_spill] sm:$0xff] %v3859_v58  ;;  %v2766_v58 = vld [vmem:[%s3521_s13 + $0x90] sm:$0xff] }
 0x45c   : >> { %1579 = vrot.lane.b32.xlu0 %v1556_v52, %s3082_s15  ;;  %1577 = vrot.lane.b32.xlu1 %v1555_v53, %s3082_s15  ;;  %v3861_v62 = vpop.permute.xlu1 %1518 }
 0x45d   : >> { %4436 = vst [vmem:[#allocation39_spill] sm:$0xff] %v3861_v62 }
 0x460   : >> { %1603 = vperm.xlu1 %2924, %v2756_v54   ;;  %v3863_v7 = vpop.permute.xlu1 %1522 }
 0x461   : >> { %4437 = vst [vmem:[#allocation40_spill] sm:$0xff] %v3863_v7 }
 0x4c2   : >> { %v3865_v2 = vpop.permute.xlu1 %1565 }
 0x4c3   : >> { %4438 = vst [vmem:[#allocation41_spill] sm:$0xff] %v3865_v2  ;;  %v2774_v2 = vld [vmem:[%s3521_s13 + $0xb0] sm:$0xff] }
 0x4c6   : >> { %v3867_v28 = vpop.permute.xlu1 %1569 }
 0x4c7   : >> { %4439 = vst [vmem:[#allocation42_spill] sm:$0xff] %v3867_v28  ;;  %v2768_v28 = vld [vmem:[%s3521_s13 + $0x98] sm:$0xff] }
 0x4ca   : >> { %v3869_v42 = vpop.permute.xlu1 %1573 }
 0x4cb   : >> { %4440 = vst [vmem:[#allocation43_spill] sm:$0xff] %v3869_v42 }
 0x4ce   : >> { %v3871_v52 = vpop.permute.xlu1 %1577 }
 0x4cf   : >> { %4441 = vst [vmem:[#allocation44_spill] sm:$0xff] %v3871_v52 }
 0x4df   : >> { %v1604_v53 = vpop.permute.xlu1 %1603 }
 0x4e0   : >> { %v1607_v54 = vmul.f32 %v1604_v53, %v3553_v16  ;;  %v1606_v24 = vmul.f32 %v1604_v53, %v3535_v33  ;;  %v1609_v7 = vmul.f32 %v1604_v53, %v3559_v39  ;;  %v1608_v62 = vmul.f32 %v1604_v53, %v3543_v50 }
 0x4e1   : >> { %v1611_v52 = vmul.f32 %v1604_v53, %v3565_v55  ;;  %v1610_v42 = vmul.f32 %v1604_v53, %v3551_v15 }
 0x4e2   : >> { %1624 = vrot.lane.b32.xlu1 %v1607_v54, %s3083_s16  ;;  %1622 = vrot.lane.b32.xlu0 %v1606_v24, %s3083_s16  ;;  %v2758_v24 = vld [vmem:[%s3521_s13 + $0x70] sm:$0xff]  ;;  %v1612_v54 = vmul.f32 %v1604_v53, %v3623_v31 }
 0x4e6   : >> { %1628 = vrot.lane.b32.xlu1 %v1609_v7, %s3083_s16  ;;  %1626 = vrot.lane.b32.xlu0 %v1608_v62, %s3083_s16  ;;  %v2764_v7 = vld [vmem:[%s3521_s13 + $0x88] sm:$0xff]  ;;  %v2762_v62 = vld [vmem:[%s3521_s13 + $0x80] sm:$0xff] }
 0x4ea   : >> { %1632 = vrot.lane.b32.xlu1 %v1611_v52, %s3083_s16  ;;  %1630 = vrot.lane.b32.xlu0 %v1610_v42, %s3083_s16  ;;  %v2772_v52 = vld [vmem:[%s3521_s13 + $0xa8] sm:$0xff]  ;;  %v2778_v42 = vld [vmem:[%s3521_s13 + $0xc0] sm:$0xff] }
 0x4ee   : >> { %1660 = vperm.xlu1 %2924, %v2758_v24   ;;  %1634 = vrot.lane.b32.xlu0 %v1612_v54, %s3083_s16  ;;  %v1613_v24 = vmul.f32 %v1604_v53, %v3787_v59  ;;  %v3898_v54 = vpop.permute.xlu0 %1567 }
 0x4ef   : >> { %4442 = vst [vmem:[#allocation45_spill] sm:$0xff] %v3898_v54 }
 0x4f2   : >> { %1808 = vperm.xlu1 %2924, %v2764_v7   ;;  %1751 = vperm.xlu0 %2923, %v2762_v62   ;;  %v3900_v7 = vpop.permute.xlu0 %1571 }
 0x4f3   : >> { %4443 = vst [vmem:[#allocation46_spill] sm:$0xff] %v3900_v7 }
 0x4f6   : >> { %1922 = vperm.xlu1 %2924, %v2768_v28   ;;  %1865 = vperm.xlu0 %2923, %v2766_v58   ;;  %v3902_v62 = vpop.permute.xlu0 %1575 }
 0x4f7   : >> { %4444 = vst [vmem:[#allocation47_spill] sm:$0xff] %v3902_v62 }
 0x4fa   : >> { %2070 = vperm.xlu1 %2924, %v2774_v2   ;;  %2013 = vperm.xlu0 %2923, %v2772_v52   ;;  %v3906_v58 = vpop.permute.xlu0 %1579 }
 0x4fb   : >> { %4446 = vst [vmem:[#allocation49_spill] sm:$0xff] %v3906_v58 }
 0x4fe   : >> { %2184 = vperm.xlu1 %2924, %v2778_v42   ;;  %2127 = vperm.xlu0 %2923, %v2776_v17  }
 0x502   : >> { %1636 = vrot.lane.b32.xlu0 %v1613_v24, %s3083_s16 }
 0x554   : >> { %v3904_v28 = vpop.permute.xlu1 %1624  ;;  %v3910_v52 = vpop.permute.xlu0 %1622 }
 0x555   : >> { %4445 = vst [vmem:[#allocation48_spill] sm:$0xff] %v3904_v28  ;;  %4448 = vst [vmem:[#allocation51_spill] sm:$0xff] %v3910_v52  ;;  %v4002_v52 = vld [vmem:[#allocation2 + $0x28] sm:$0xff]  ;;  %v4004_v28 = vld [vmem:[#allocation2 + $0x20] sm:$0xff] }
 0x558   : >> { %v3908_v2 = vpop.permute.xlu1 %1628  ;;  %v3914_v17 = vpop.permute.xlu0 %1626 }
 0x559   : >> { %4447 = vst [vmem:[#allocation50_spill] sm:$0xff] %v3908_v2  ;;  %4450 = vst [vmem:[#allocation53_spill] sm:$0xff] %v3914_v17 }
 0x55c   : >> { %v3912_v42 = vpop.permute.xlu1 %1632  ;;  %v3920_v62 = vpop.permute.xlu0 %1630 }
 0x55d   : >> { %4449 = vst [vmem:[#allocation52_spill] sm:$0xff] %v3912_v42  ;;  %4451 = vst [vmem:[#allocation54_spill] sm:$0xff] %v3920_v62 }
 0x560   : >> { %v3928_v7 = vpop.permute.xlu0 %1634 }
 0x561   : >> { %4452 = vst [vmem:[#allocation55_spill] sm:$0xff] %v3928_v7 }
 0x56d   : >> { %v1661_v53 = vpop.permute.xlu1 %1660 }
 0x56e   : >> { %v1663_v24 = vmul.f32 %v1661_v53, %v3535_v33  ;;  %v1664_v54 = vmul.f32 %v1661_v53, %v3553_v16  ;;  %v1665_v58 = vmul.f32 %v1661_v53, %v3543_v50  ;;  %v1666_v2 = vmul.f32 %v1661_v53, %v3559_v39 }
 0x56f   : >> { %v1667_v42 = vmul.f32 %v1661_v53, %v3551_v15  ;;  %v1668_v17 = vmul.f32 %v1661_v53, %v3565_v55 }
 0x570   : >> { %1679 = vrot.lane.b32.xlu1 %v1663_v24, %s3084_s17  ;;  %1681 = vrot.lane.b32.xlu0 %v1664_v54, %s3084_s17  ;;  %v1669_v54 = vmul.f32 %v1661_v53, %v3623_v31  ;;  %v1670_v24 = vmul.f32 %v1661_v53, %v3787_v59 }
 0x571   : >> { %v1752_v62 = vpop.permute.xlu0 %1751  ;;  %v1809_v7 = vpop.permute.xlu1 %1808 }
 0x572   : >> { %v1757_v53 = vmul.f32 %v1752_v62, %v3551_v15 }
 0x574   : >> { %1683 = vrot.lane.b32.xlu1 %v1665_v58, %s3084_s17  ;;  %1685 = vrot.lane.b32.xlu0 %v1666_v2, %s3084_s17  ;;  %v2760_v58 = vld [vmem:[%s3521_s13 + $0x78] sm:$0xff]  ;;  %v1754_v2 = vmul.f32 %v1752_v62, %v3553_v16 }
 0x578   : >> { %1687 = vrot.lane.b32.xlu1 %v1667_v42, %s3084_s17  ;;  %1689 = vrot.lane.b32.xlu0 %v1668_v17, %s3084_s17  ;;  %v1755_v42 = vmul.f32 %v1752_v62, %v3543_v50  ;;  %v1756_v17 = vmul.f32 %v1752_v62, %v3559_v39 }
 0x57c   : >> { %1691 = vrot.lane.b32.xlu1 %v1669_v54, %s3084_s17  ;;  %1693 = vrot.lane.b32.xlu0 %v1670_v24, %s3084_s17  ;;  %v1758_v54 = vmul.f32 %v1752_v62, %v3565_v55  ;;  %v2770_v24 = vld [vmem:[%s3521_s13 + $0xa0] sm:$0xff] }
 0x580   : >> { %1726 = vperm.xlu1 %2924, %v2760_v58   ;;  %1770 = vrot.lane.b32.xlu0 %v1754_v2, %s3081_s14  ;;  %v1759_v58 = vmul.f32 %v1752_v62, %v3623_v31  ;;  %v3949_v2 = vld [vmem:[#allocation2 + $0x50] sm:$0xff] }
 0x584   : >> { %1772 = vrot.lane.b32.xlu1 %v1755_v42, %s3081_s14  ;;  %1774 = vrot.lane.b32.xlu0 %v1756_v17, %s3081_s14  ;;  %v1760_v42 = vmul.f32 %v1752_v62, %v3787_v59  ;;  %v1761_v17 = vmul.f32 %v1752_v62, %v3949_v2  ;;  %v1815_v62 = vmul.f32 %v1809_v7, %v3565_v55 }
 0x588   : >> { %1776 = vrot.lane.b32.xlu1 %v1757_v53, %s3081_s14  ;;  %1778 = vrot.lane.b32.xlu0 %v1758_v54, %s3081_s14  ;;  %v1811_v53 = vmul.f32 %v1809_v7, %v3553_v16  ;;  %v1812_v54 = vmul.f32 %v1809_v7, %v3543_v50 }
 0x58c   : >> { %1780 = vrot.lane.b32.xlu1 %v1759_v58, %s3081_s14  ;;  %1988 = vperm.xlu0 %2923, %v2770_v24   ;;  %v1813_v58 = vmul.f32 %v1809_v7, %v3559_v39  ;;  %v1814_v24 = vmul.f32 %v1809_v7, %v3551_v15 }
 0x590   : >> { %1782 = vrot.lane.b32.xlu1 %v1760_v42, %s3081_s14  ;;  %1784 = vrot.lane.b32.xlu0 %v1761_v17, %s3081_s14  ;;  %v1816_v42 = vmul.f32 %v1809_v7, %v3623_v31  ;;  %v1817_v17 = vmul.f32 %v1809_v7, %v3787_v59 }
 0x594   : >> { %1827 = vrot.lane.b32.xlu1 %v1811_v53, %s3082_s15  ;;  %1829 = vrot.lane.b32.xlu0 %v1812_v54, %s3082_s15  ;;  %v1818_v53 = vmul.f32 %v1809_v7, %v3949_v2  ;;  %v1866_v54 = vpop.permute.xlu0 %1865 }
 0x595   : >> { %v1873_v7 = vmul.f32 %v1866_v54, %v3623_v31 }
 0x598   : >> { %1831 = vrot.lane.b32.xlu1 %v1813_v58, %s3082_s15  ;;  %1833 = vrot.lane.b32.xlu0 %v1814_v24, %s3082_s15  ;;  %v1869_v58 = vmul.f32 %v1866_v54, %v3543_v50  ;;  %v1868_v24 = vmul.f32 %v1866_v54, %v3553_v16 }
 0x59c   : >> { %1835 = vrot.lane.b32.xlu1 %v1815_v62, %s3082_s15  ;;  %1837 = vrot.lane.b32.xlu0 %v1816_v42, %s3082_s15  ;;  %v1871_v62 = vmul.f32 %v1866_v54, %v3551_v15  ;;  %v1870_v42 = vmul.f32 %v1866_v54, %v3559_v39 }
 0x5a0   : >> { %1839 = vrot.lane.b32.xlu1 %v1817_v17, %s3082_s15  ;;  %1841 = vrot.lane.b32.xlu0 %v1818_v53, %s3082_s15  ;;  %v1872_v17 = vmul.f32 %v1866_v54, %v3565_v55  ;;  %v1875_v53 = vmul.f32 %v1866_v54, %v3949_v2 }
 0x5a4   : >> { %1886 = vrot.lane.b32.xlu0 %v1869_v58, %s3083_s16  ;;  %1884 = vrot.lane.b32.xlu1 %v1868_v24, %s3083_s16  ;;  %v1874_v58 = vmul.f32 %v1866_v54, %v3787_v59  ;;  %v1923_v24 = vpop.permute.xlu1 %1922 }
 0x5a5   : >> { %v1930_v54 = vmul.f32 %v1923_v24, %v3623_v31 }
 0x5a8   : >> { %1890 = vrot.lane.b32.xlu0 %v1871_v62, %s3083_s16  ;;  %1888 = vrot.lane.b32.xlu1 %v1870_v42, %s3083_s16  ;;  %v1926_v62 = vmul.f32 %v1923_v24, %v3543_v50  ;;  %v1925_v42 = vmul.f32 %v1923_v24, %v3553_v16 }
 0x5ac   : >> { %1894 = vrot.lane.b32.xlu0 %v1873_v7, %s3083_s16  ;;  %1892 = vrot.lane.b32.xlu1 %v1872_v17, %s3083_s16  ;;  %v1928_v7 = vmul.f32 %v1923_v24, %v3551_v15  ;;  %v1927_v17 = vmul.f32 %v1923_v24, %v3559_v39 }
 0x5b0   : >> { %1898 = vrot.lane.b32.xlu0 %v1875_v53, %s3083_s16  ;;  %1896 = vrot.lane.b32.xlu1 %v1874_v58, %s3083_s16  ;;  %v1929_v53 = vmul.f32 %v1923_v24, %v3565_v55  ;;  %v1932_v58 = vmul.f32 %v1923_v24, %v3949_v2 }
 0x5b4   : >> { %1943 = vrot.lane.b32.xlu0 %v1926_v62, %s3084_s17  ;;  %1941 = vrot.lane.b32.xlu1 %v1925_v42, %s3084_s17  ;;  %v1931_v62 = vmul.f32 %v1923_v24, %v3787_v59  ;;  %v2014_v42 = vpop.permute.xlu0 %2013  ;;  %v945_v24 = vmul.f32 %v3533_v5, %v3545_v56 }
 0x5b5   : >> { %v2020_v36 = vmul.f32 %v2014_v42, %v3623_v31 }
 0x5b6   : >> { %v1010_v18 = vadd.f32 %v3675_v19, %v945_v24 }
 0x5b8   : >> { %1947 = vrot.lane.b32.xlu0 %v1928_v7, %s3084_s17  ;;  %1945 = vrot.lane.b32.xlu1 %v1927_v17, %s3084_s17  ;;  %v2017_v7 = vmul.f32 %v2014_v42, %v4002_v52  ;;  %v2016_v17 = vmul.f32 %v2014_v42, %v4004_v28  ;;  %v1067_v21 = vadd.f32 %v3699_v25, %v1010_v18 }
 0x5b9   : >> { %v951_v18 = vmul.f32 %v3533_v5, %v3565_v55 }
 0x5bc   : >> { %1951 = vrot.lane.b32.xlu0 %v1930_v54, %s3084_s17  ;;  %1949 = vrot.lane.b32.xlu1 %v1929_v53, %s3084_s17  ;;  %v4010_v54 = vld [vmem:[#allocation2 + $0x38] sm:$0xff]  ;;  %v4012_v53 = vld [vmem:[#allocation2 + $0x30] sm:$0xff] }
 0x5bd   : >> { %4453 = vst [vmem:[#allocation56_spill] sm:$0xff] %v4010_v54  ;;  %v2018_v60 = vmul.f32 %v2014_v42, %v4012_v53 }
 0x5c0   : >> { %1955 = vrot.lane.b32.xlu0 %v1932_v58, %s3084_s17  ;;  %1953 = vrot.lane.b32.xlu1 %v1931_v62, %s3084_s17  ;;  %v947_v58 = vmul.f32 %v3533_v5, %v3553_v16  ;;  %v2019_v62 = vmul.f32 %v2014_v42, %v4010_v54  ;;  %v1011_v54 = vadd.f32 %v3679_v41, %v946_v14  ;;  %v4046_v14 = vld [vmem:[#allocation2 + $0x58] sm:$0xff] }
 0x5c2   : >> { %v1012_v56 = vadd.f32 %v3684_v10, %v947_v58  ;;  %v2021_v58 = vmul.f32 %v2014_v42, %v3787_v59 }
 0x5c4   : >> { %2034 = vrot.lane.b32.xlu0 %v2017_v7, %s3081_s14  ;;  %2032 = vrot.lane.b32.xlu1 %v2016_v17, %s3081_s14  ;;  %v948_v7 = vmul.f32 %v3533_v5, %v3543_v50  ;;  %v949_v17 = vmul.f32 %v3533_v5, %v3559_v39  ;;  %v1069_v10 = vadd.f32 %v3705_v23, %v1012_v56 }
 0x5c6   : >> { %v1013_v19 = vadd.f32 %v3688_v1, %v948_v7  ;;  %v1014_v24 = vadd.f32 %v3690_v6, %v949_v17  ;;  %v1124_v1 = vadd.f32 %v3711_v47, %v1067_v21  ;;  %v1072_v6 = vadd.f32 %v3707_v4, %v1015_v40 }
 0x5c7   : >> { %v1126_v35 = vadd.f32 %v3713_v48, %v1069_v10  ;;  %v2023_v4 = vmul.f32 %v2014_v42, %v4046_v14  ;;  %v2022_v48 = vmul.f32 %v2014_v42, %v3949_v2  ;;  %v1207_v21 = vmul.f32 %v3621_v57, %v3535_v33 }
 0x5c8   : >> { %2038 = vrot.lane.b32.xlu0 %v2019_v62, %s3081_s14  ;;  %2036 = vrot.lane.b32.xlu1 %v2018_v60, %s3081_s14  ;;  %v1071_v62 = vadd.f32 %v3709_v27, %v1014_v24  ;;  %v1068_v60 = vadd.f32 %v3701_v46, %v1011_v54  ;;  %v1070_v41 = vadd.f32 %v3703_v32, %v1013_v19 }
 0x5c9   : >> { %v1181_v32 = vadd.f32 %v3773_v43, %v1124_v1  ;;  %v1129_v27 = vadd.f32 %v3767_v0, %v1072_v6  ;;  %v1183_v47 = vadd.f32 %v3781_v51, %v1126_v35  ;;  %v1209_v43 = vmul.f32 %v3621_v57, %v3543_v50  ;;  %v4455_v1 = vld [vmem:[#allocation11_spill] sm:$0xff]  ;;  %v4458_v35 = vld [vmem:[#allocation22_spill] sm:$0xff] }
 0x5ca   : >> { %v1125_v25 = vadd.f32 %v3759_v29, %v1068_v60  ;;  %v1127_v23 = vadd.f32 %v3763_v8, %v1070_v41  ;;  %v1128_v46 = vadd.f32 %v3717_v11, %v1071_v62  ;;  %v4070_v29 = vpop.permute.xlu1 %2070  ;;  %v1208_v51 = vmul.f32 %v3621_v57, %v3553_v16  ;;  %v4454_v60 = vld [vmem:[#allocation24_spill] sm:$0xff] }
 0x5cb   : >> { %v1186_v0 = vadd.f32 %v3731_v9, %v1129_v27  ;;  %v1215_v5 = vadd.f32 %v1207_v21, %v1181_v32  ;;  %v4085_v9 = vadd.f32 %v3695_v45, %v951_v18  ;;  %v1217_v37 = vadd.f32 %v1209_v43, %v1183_v47  ;;  %v4460_v32 = vld [vmem:[#allocation23_spill] sm:$0xff]  ;;  %v4461_v47 = vld [vmem:[#allocation9_spill] sm:$0xff]  ;;  %v4465_v21 = vld [vmem:[#allocation12_spill] sm:$0xff] }
 0x5cc   : >> { %2042 = vrot.lane.b32.xlu0 %v2021_v58, %s3081_s14  ;;  %2040 = vrot.lane.b32.xlu1 %v2020_v36, %s3081_s14  ;;  %v1185_v40 = vadd.f32 %v3791_v61, %v1128_v46  ;;  %v1182_v11 = vadd.f32 %v3727_v63, %v1125_v25  ;;  %v1184_v8 = vadd.f32 %v3729_v49, %v1127_v23  ;;  %v2237_v49 = vld [vmem:[%s2236_s6] sm:$0xff]  ;;  %v4459_v25 = vld [vmem:[#allocation8_spill] sm:$0xff]  ;;  %v4115_v46 = vpop.permute.xlu0 %2127  ;;  %v4463_v18 = vld [vmem:[#allocation15_spill] sm:$0xff] }
 0x5cd   : >> { %v1211_v63 = vmul.f32 %v3621_v57, %v3551_v15  ;;  %v1210_v61 = vmul.f32 %v3621_v57, %v3559_v39  ;;  %v1212_v36 = vmul.f32 %v3621_v57, %v3565_v55  ;;  %v2073_v42 = vmul.f32 %v4070_v29, %v4004_v28  ;;  %v4466_v43 = vld [vmem:[#allocation56_spill] sm:$0xff] }
 0x5ce   : >> { %v1272_v54 = vadd.f32 %v3798_v44, %v1215_v5  ;;  %v1271_v15 = vadd.f32 %v3733_v12, %v3725_v30  ;;  %v1216_v17 = vadd.f32 %v1208_v51, %v1182_v11  ;;  %v1274_v56 = vadd.f32 %v3800_v38, %v1217_v37  ;;  %v4467_v37 = vld [vmem:[#allocation26_spill] sm:$0xff] }
 0x5cf   : >> { %v1219_v7 = vadd.f32 %v1211_v63, %v1185_v40  ;;  %v1218_v19 = vadd.f32 %v1210_v61, %v1184_v8  ;;  %v1220_v24 = vadd.f32 %v1212_v36, %v1186_v0  ;;  %v2075_v12 = vmul.f32 %v4070_v29, %v4012_v53  ;;  %v4464_v40 = vld [vmem:[#allocation25_spill] sm:$0xff] }
 0x5d0   : >> { %2046 = vrot.lane.b32.xlu0 %v2023_v4, %s3081_s14  ;;  %2044 = vrot.lane.b32.xlu1 %v2022_v48, %s3081_s14  ;;  %v1273_v10 = vadd.f32 %v3735_v22, %v1216_v17  ;;  %v1328_v58 = vadd.f32 %v3806_v26, %v1271_v15  ;;  %v1329_v44 = vadd.f32 %v3741_v20, %v1272_v54  ;;  %v4456_v22 = vld [vmem:[#allocation32_spill] sm:$0xff]  ;;  %v4457_v26 = vld [vmem:[#allocation21_spill] sm:$0xff]  ;;  %v4469_v15 = vld [vmem:[#allocation14_spill] sm:$0xff]  ;;  %s4333_s14 = scalar_lea.hbm (%p923_p12), %s4389_s5, %s2785_s8 }
 0x5d1   : >> { %v1276_v45 = vadd.f32 %v3802_v34, %v1219_v7  ;;  %v1275_v62 = vadd.f32 %v3737_v13, %v1218_v19  ;;  %v1277_v30 = vadd.f32 %v3739_v3, %v1220_v24  ;;  %v2074_v38 = vmul.f32 %v4070_v29, %v4002_v52  ;;  %v4470_v17 = vld [vmem:[#allocation29_spill] sm:$0xff]  ;;  %v4471_v19 = vld [vmem:[#allocation16_spill] sm:$0xff] }
 0x5d2   : >> { %v1386_v41 = vadd.f32 %v4454_v60, %v1329_v44  ;;  %v1385_v34 = vadd.f32 %v4455_v1, %v1328_v58  ;;  %v1468_v6 = vmul.f32 %v4456_v22, %v3553_v16  ;;  %v1467_v20 = vmul.f32 %v4456_v22, %v3535_v33  ;;  %v4462_v16 = vld [vmem:[#allocation28_spill] sm:$0xff] }
 0x5d3   : >> { %v1330_v13 = vadd.f32 %v4457_v26, %v1273_v10  ;;  %v1332_v3 = vadd.f32 %v4458_v35, %v1275_v62  ;;  %v1331_v23 = vadd.f32 %v4459_v25, %v1274_v56  ;;  %v1334_v27 = vadd.f32 %v4460_v32, %v1277_v30  ;;  %v4144_v44 = vld [vmem:[#allocation2 + $0x30] sm:$0xff]  ;;  %v4148_v30 = vpop.permute.xlu1 %2184  ;;  %v4476_v26 = vld [vmem:[#allocation30_spill] sm:$0xff]  ;;  %v4477_v35 = vld [vmem:[#allocation17_spill] sm:$0xff] }
 0x5d4   : >> { %2089 = vrot.lane.b32.xlu0 %v2073_v42, %s3082_s15  ;;  %2240 = vperm.xlu1 %2924, %v2237_v49   ;;  %v1333_v4 = vadd.f32 %v4461_v47, %v1276_v45  ;;  %v1442_v48 = vadd.f32 %v4462_v16, %v1385_v34  ;;  %v1443_v33 = vadd.f32 %v4463_v18, %v1386_v41  ;;  %v4468_v42 = vld [vmem:[#allocation13_spill] sm:$0xff] }
 0x5d5   : >> { %v1388_v11 = vadd.f32 %v4464_v40, %v1331_v23  ;;  %v1387_v8 = vadd.f32 %v4465_v21, %v1330_v13  ;;  %v2077_v0 = vmul.f32 %v4070_v29, %v3623_v31  ;;  %v2076_v5 = vmul.f32 %v4070_v29, %v4466_v43  ;;  %v4472_v45 = vld [vmem:[#allocation37_spill] sm:$0xff]  ;;  %v4478_v23 = vld [vmem:[#allocation38_spill] sm:$0xff] }
 0x5d6   : >> { %v1476_v63 = vadd.f32 %v1468_v6, %v1443_v33  ;;  %v1475_v51 = vadd.f32 %v1467_v20, %v1442_v48  ;;  %v1470_v61 = vmul.f32 %v4456_v22, %v3559_v39  ;;  %v1469_v49 = vmul.f32 %v4456_v22, %v3543_v50  ;;  %v4473_v39 = vld [vmem:[#allocation33_spill] sm:$0xff]  ;;  %v4481_v48 = vld [vmem:[#allocation51_spill] sm:$0xff] }
 0x5d7   : >> { %v1390_v36 = vadd.f32 %v4467_v37, %v1333_v4  ;;  %v1389_v54 = vadd.f32 %v4468_v42, %v1332_v3  ;;  %v1391_v7 = vadd.f32 %v4469_v15, %v1334_v27  ;;  %v1444_v56 = vadd.f32 %v4470_v17, %v1387_v8  ;;  %v4474_v34 = vld [vmem:[#allocation45_spill] sm:$0xff]  ;;  %v4479_v27 = vld [vmem:[#allocation34_spill] sm:$0xff]  ;;  %v4480_v4 = vld [vmem:[#allocation48_spill] sm:$0xff] }
 0x5d8   : >> { %2093 = vrot.lane.b32.xlu0 %v2075_v12, %s3082_s15  ;;  %2091 = vrot.lane.b32.xlu1 %v2074_v38, %s3082_s15  ;;  %v1445_v24 = vadd.f32 %v4471_v19, %v1388_v11  ;;  %v1533_v10 = vadd.f32 %v4472_v45, %v1476_v63  ;;  %v1532_v58 = vadd.f32 %v4473_v39, %v1475_v51  ;;  %v4150_v12 = vpop.permute.xlu0 %1636  ;;  %v4483_v51 = vld [vmem:[#allocation42_spill] sm:$0xff] }
 0x5d9   : >> { %v1472_v50 = vmul.f32 %v4456_v22, %v3565_v55  ;;  %v1471_v62 = vmul.f32 %v4144_v44, %v4456_v22  ;;  %v2079_v38 = vmul.f32 %v4070_v29, %v3949_v2  ;;  %v2078_v60 = vmul.f32 %v4070_v29, %v3787_v59  ;;  %v4475_v55 = vld [vmem:[#allocation41_spill] sm:$0xff] }
 0x5da   : >> { %v1478_v41 = vadd.f32 %v1470_v61, %v1445_v24  ;;  %v1477_v1 = vadd.f32 %v1469_v49, %v1444_v56  ;;  %v1590_v6 = vadd.f32 %v4474_v34, %v1533_v10  ;;  %v1589_v20 = vadd.f32 %v4475_v55, %v1532_v58  ;;  %v4487_v56 = vld [vmem:[#allocation35_spill] sm:$0xff]  ;;  %v4488_v24 = vld [vmem:[#allocation50_spill] sm:$0xff]  ;;  %v4489_v10 = vld [vmem:[#allocation53_spill] sm:$0xff] }
 0x5db   : >> { %v1446_v13 = vadd.f32 %v4476_v26, %v1389_v54  ;;  %v1447_v3 = vadd.f32 %v4477_v35, %v1390_v36  ;;  %v1473_v25 = vmul.f32 %v4456_v22, %v3623_v31  ;;  %v2080_v8 = vmul.f32 %v4070_v29, %v4046_v14  ;;  %v4484_v36 = vld [vmem:[#allocation6_spill] sm:$0xff]  ;;  %v4485_v54 = vld [vmem:[#allocation31_spill] sm:$0xff]  ;;  %v4494_v35 = vld [vmem:[#allocation36_spill] sm:$0xff] }
 0x5dc   : >> { %2097 = vrot.lane.b32.xlu0 %v2077_v0, %s3082_s15  ;;  %2095 = vrot.lane.b32.xlu1 %v2076_v5, %s3082_s15  ;;  %v1535_v32 = vadd.f32 %v4478_v23, %v1478_v41  ;;  %v1534_v47 = vadd.f32 %v4479_v27, %v1477_v1  ;;  %v1647_v16 = vadd.f32 %v4480_v4, %v1590_v6  ;;  %v4482_v5 = vld [vmem:[#allocation46_spill] sm:$0xff]  ;;  %v4486_v29 = vld [vmem:[#allocation39_spill] sm:$0xff] }
 0x5dd   : >> { %v1646_v18 = vadd.f32 %v4481_v48, %v1589_v20  ;;  %v1480_v33 = vadd.f32 %v1472_v50, %v1447_v3  ;;  %v1479_v40 = vadd.f32 %v1471_v62, %v1446_v13  ;;  %v2130_v0 = vmul.f32 %v4115_v46, %v4004_v28  ;;  %v4490_v58 = vld [vmem:[#allocation7_spill] sm:$0xff] }
 0x5de   : >> { %v1592_v63 = vadd.f32 %v4482_v5, %v1535_v32  ;;  %v1591_v61 = vadd.f32 %v4483_v51, %v1534_v47  ;;  %v1073_v42 = vadd.f32 %v4484_v36, %v4085_v9  ;;  %v1448_v15 = vadd.f32 %v4485_v54, %v1391_v7  ;;  %v4491_v41 = vld [vmem:[#allocation47_spill] sm:$0xff]  ;;  %v4496_v32 = vld [vmem:[#allocation54_spill] sm:$0xff] }
 0x5df   : >> { %v1537_v17 = vadd.f32 %v4486_v29, %v1480_v33  ;;  %v1536_v19 = vadd.f32 %v4487_v56, %v1479_v40  ;;  %v2131_v9 = vmul.f32 %v4115_v46, %v4002_v52  ;;  %v2132_v7 = vmul.f32 %v4115_v46, %v4012_v53  ;;  %v4492_v34 = vld [vmem:[#allocation43_spill] sm:$0xff]  ;;  %v4497_v33 = vld [vmem:[#allocation44_spill] sm:$0xff] }
 0x5e0   : >> { %2101 = vrot.lane.b32.xlu0 %v2079_v38, %s3082_s15  ;;  %2099 = vrot.lane.b32.xlu1 %v2078_v60, %s3082_s15  ;;  %v1649_v45 = vadd.f32 %v4488_v24, %v1592_v63  ;;  %v1648_v39 = vadd.f32 %v4489_v10, %v1591_v61  ;;  %v1130_v50 = vadd.f32 %v4490_v58, %v1073_v42  ;;  %v4493_v26 = vld [vmem:[#allocation19_spill] sm:$0xff]  ;;  %v4500_v42 = vld [vmem:[#allocation10_spill] sm:$0xff] }
 0x5e1   : >> { %v1481_v62 = vadd.f32 %v1473_v25, %v1448_v15  ;;  %v1594_v1 = vadd.f32 %v4491_v41, %v1537_v17  ;;  %v1593_v6 = vadd.f32 %v4492_v34, %v1536_v19  ;;  %v4495_v25 = vld [vmem:[#allocation52_spill] sm:$0xff]  ;;  %v2134_v48 = vmul.f32 %v4115_v46, %v3623_v31  ;;  %v4501_v17 = vld [vmem:[#allocation27_spill] sm:$0xff] }
 0x5e2   : >> { %v1680_v11 = vpop.permute.xlu1 %1679  ;;  %v1682_v21 = vpop.permute.xlu0 %1681  ;;  %v1187_v13 = vadd.f32 %v4493_v26, %v1130_v50  ;;  %v2135_v51 = vmul.f32 %v4115_v46, %v3787_v59  ;;  %v2136_v61 = vmul.f32 %v4115_v46, %v3949_v2  ;;  %v2137_v15 = vmul.f32 %v4115_v46, %v4046_v14  ;;  %v4503_v50 = vld [vmem:[#allocation40_spill] sm:$0xff] }
 0x5e3   : >> { %v4174_v49 = vadd.f32 %v1680_v11, %v1646_v18  ;;  %v4176_v37 = vadd.f32 %v1682_v21, %v1647_v16  ;;  %v1538_v3 = vadd.f32 %v4494_v35, %v1481_v62  ;;  %v1651_v23 = vadd.f32 %v4495_v25, %v1594_v1  ;;  %v2927_v25 = vld [vmem:[#allocation2 + $0x20] sm:$0xff] }
 0x5e4   : >> { %2103 = vrot.lane.b32.xlu1 %v2080_v8, %s3082_s15  ;;  %2146 = vrot.lane.b32.xlu0 %v2130_v0, %s3083_s16  ;;  %v1650_v27 = vadd.f32 %v4496_v32, %v1593_v6  ;;  %v2133_v16 = vmul.f32 %v4115_v46, %v4466_v43  ;;  %v1213_v18 = vmul.f32 %v3621_v57, %v3623_v31  ;;  %v4498_v0 = vld [vmem:[#allocation55_spill] sm:$0xff]  ;;  %v4499_v57 = vld [vmem:[#allocation20_spill] sm:$0xff]  ;;  %s2931_s15 = scalar_lea.vmem (%p923_p12), %s4335_s10, 1024 }
 0x5e5   : >> { %v1595_v40 = vadd.f32 %v4497_v33, %v1538_v3  ;;  %v2187_v29 = vmul.f32 %v4148_v30, %v4004_v28  ;;  %v1474_v19 = vmul.f32 %v4456_v22, %v3787_v59  ;;  %v2189_v46 = vmul.f32 %v4148_v30, %v4012_v53  ;;  %p2932_p13 = scmp.ne.s32.totalorder (%p923_p12), %s4335_s10, %s2931_s15 }
 0x5e6   : >> { %v1684_v38 = vpop.permute.xlu1 %1683  ;;  %v1686_v60 = vpop.permute.xlu0 %1685  ;;  %v1221_v8 = vadd.f32 %v1213_v18, %v1187_v13  ;;  %v2192_v34 = vmul.f32 %v4148_v30, %v3787_v59  ;;  %v2193_v6 = vmul.f32 %v4148_v30, %v3949_v2  ;;  %v2194_v3 = vmul.f32 %v4148_v30, %v4046_v14 }
 0x5e7   : >> { %v4194_v55 = vadd.f32 %v1684_v38, %v1648_v39  ;;  %v4196_v20 = vadd.f32 %v1686_v60, %v1649_v45  ;;  %v1652_v5 = vadd.f32 %v4498_v0, %v1595_v40  ;;  %v4502_v45 = vld [vmem:[#allocation18_spill] sm:$0xff]  ;;  %v2188_v39 = vmul.f32 %v4148_v30, %v4002_v52  ;;  %p2933_p0 = pnand (%p923_p12), %p2932_p13, %p3158_p5 }
 0x5e8   : >> { %2148 = vrot.lane.b32.xlu1 %v2131_v9, %s3083_s16  ;;  %2150 = vrot.lane.b32.xlu0 %v2132_v7, %s3083_s16  ;;  %v1278_v31 = vadd.f32 %v4499_v57, %v1221_v8  ;;  %v2190_v38 = vmul.f32 %v4148_v30, %v4466_v43  ;;  %v4243_v60 = vld [vmem:[#allocation2 + $0x40] sm:$0xff]  ;;  %v4504_v7 = vld [vmem:[#allocation49_spill] sm:$0xff] }
 0x5e9   : >> { %v2191_v9 = vmul.f32 %v4243_v60, %v4148_v30  ;;  %v2930_v8 = vld [vmem:[#allocation2 + $0x38] sm:$0xff]  ;;  %p2934_p1 = pneg (%p923_p12), %p2933_p0 }
 0x5ea   : >> { %v1688_v47 = vpop.permute.xlu1 %1687  ;;  %v1690_v4 = vpop.permute.xlu0 %1689  ;;  %v1335_v54 = vadd.f32 %v4500_v42, %v1278_v31 }
 0x5eb   : >> { %v4211_v11 = vadd.f32 %v1688_v47, %v1650_v27  ;;  %v1708_v21 = vadd.f32 %v1690_v4, %v1651_v23  ;;  %v2928_v4 = vld [vmem:[#allocation2 + $0x18] sm:$0xff] }
 0x5ec   : >> { %2152 = vrot.lane.b32.xlu1 %v2133_v16, %s3083_s16  ;;  %2154 = vrot.lane.b32.xlu0 %v2134_v48, %s3083_s16  ;;  %v1392_v56 = vadd.f32 %v4501_v17, %v1335_v54  ;;  %v2929_v48 = vld [vmem:[#allocation2 + $0x28] sm:$0xff] }
 0x5ee   : >> { %v1692_v63 = vpop.permute.xlu1 %1691  ;;  %v1694_v24 = vpop.permute.xlu0 %1693  ;;  %v1449_v10 = vadd.f32 %v4502_v45, %v1392_v56 }
 0x5ef   : >> { %v1709_v36 = vadd.f32 %v1692_v63, %v1652_v5 }
 0x5f0   : >> { %2156 = vrot.lane.b32.xlu1 %v2135_v51, %s3083_s16  ;;  %2158 = vrot.lane.b32.xlu0 %v2136_v61, %s3083_s16  ;;  %v1482_v58 = vadd.f32 %v1474_v19, %v1449_v10 }
 0x5f2   : >> { %v1539_v22 = vadd.f32 %v4503_v50, %v1482_v58  ;;  %v1771_v62 = vpop.permute.xlu0 %1770 }
 0x5f4   : >> { %2160 = vrot.lane.b32.xlu1 %v2137_v15, %s3083_s16  ;;  %2203 = vrot.lane.b32.xlu0 %v2187_v29, %s3084_s17  ;;  %v1596_v41 = vadd.f32 %v4504_v7, %v1539_v22  ;;  %s3087_s16 = smov (%p923_p12), [#allocation3]  }
 0x5f6   : >> { %v1653_v1 = vadd.f32 %v4150_v12, %v1596_v41  ;;  %v1775_v13 = vpop.permute.xlu0 %1774 }
 0x5f8   : >> { %2205 = vrot.lane.b32.xlu1 %v2188_v39, %s3084_s17  ;;  %2207 = vrot.lane.b32.xlu0 %v2189_v46, %s3084_s17  ;;  %v1710_v26 = vadd.f32 %v1694_v24, %v1653_v1 }
 0x5fa   : >> { %v1779_v42 = vpop.permute.xlu0 %1778 }
 0x5fc   : >> { %2209 = vrot.lane.b32.xlu1 %v2190_v38, %s3084_s17  ;;  %2211 = vrot.lane.b32.xlu0 %v2191_v9, %s3084_s17 }
 0x5ff   : >> { %v1727_v35 = vpop.permute.xlu1 %1726 }
 0x600   : >> { %2213 = vrot.lane.b32.xlu1 %v2192_v34, %s3084_s17  ;;  %2215 = vrot.lane.b32.xlu0 %v2193_v6, %s3084_s17  ;;  %v1730_v23 = vmul.f32 %v2927_v25, %v1727_v35  ;;  %v1732_v12 = vmul.f32 %v4144_v44, %v1727_v35  ;;  %v1734_v32 = vmul.f32 %v4243_v60, %v1727_v35 }
 0x601   : >> { %v1735_v27 = vmul.f32 %v1727_v35, %v3787_v59  ;;  %v1736_v47 = vmul.f32 %v1727_v35, %v3949_v2  ;;  %v1729_v16 = vmul.f32 %v2928_v4, %v1727_v35  ;;  %v1731_v18 = vmul.f32 %v2929_v48, %v1727_v35 }
 0x602   : >> { %v1738_v30 = vadd.f32 %v1730_v23, %v4176_v37  ;;  %v1740_v33 = vadd.f32 %v1732_v12, %v4196_v20  ;;  %v1742_v40 = vadd.f32 %v1734_v32, %v1708_v21  ;;  %v1733_v0 = vmul.f32 %v2930_v8, %v1727_v35 }
 0x603   : >> { %v1773_v5 = vpop.permute.xlu1 %1772  ;;  %v1743_v63 = vadd.f32 %v1735_v27, %v1709_v36  ;;  %v1744_v44 = vadd.f32 %v1736_v47, %v1710_v26  ;;  %v1737_v51 = vadd.f32 %v1729_v16, %v4174_v49  ;;  %v1739_v61 = vadd.f32 %v1731_v18, %v4194_v55 }
 0x604   : >> { %v1795_v57 = vadd.f32 %v1773_v5, %v1738_v30  ;;  %2217 = vrot.lane.b32.xlu1 %v2194_v3, %s3084_s17  ;;  %v1741_v31 = vadd.f32 %v1733_v0, %v4211_v11  ;;  %s2935_s17 = sshll.u32 (%p923_p12), %s3087_s16, 4  ;;  %s2936_s17 = int_to_ptr.vmem [resolvable:$false] %s2935_s17 }
 0x605   : >> { %v1794_v54 = vadd.f32 %v1771_v62, %v1737_v51  ;;  %v1796_v37 = vadd.f32 %v1775_v13, %v1739_v61  ;;  %s2937_s23 = scalar_lea.vmem (%p923_p12), %s2936_s17, 2048  ;;  %p2938_p2 = scmp.lt.s32.totalorder (%p923_p12), %s4335_s10, %s2936_s17 }
 0x606   : >> { %v1798_v15 = vadd.f32 %v1779_v42, %v1741_v31  ;;  %p2939_p3 = scmp.lt.s32.totalorder (%p923_p12), %s2937_s23, %s2931_s15 }
 0x607   : >> { %v1777_v20 = vpop.permute.xlu1 %1776 }
 0x608   : >> { %v1797_v21 = vadd.f32 %v1777_v20, %v1740_v33  ;;  %p2940_p4 = por (%p923_p12), %p2939_p3, %p2938_p2 }
 0x60a   : > { %p2941_p7 = pnand (%p923_p12), %p2940_p4, %p2934_p1 }
 0x60b   : >> { %v1781_v29 = vpop.permute.xlu1 %1780  ;;  %v4269_v17 = vpop.permute.xlu0 %1988 }
 0x60c   : >> { %v1799_v36 = vadd.f32 %v1781_v29, %v1742_v40  ;;  %v1991_v5 = vmul.f32 %v4269_v17, %v4004_v28 }
 0x60f   : >> { %v1783_v56 = vpop.permute.xlu1 %1782  ;;  %v1785_v19 = vpop.permute.xlu0 %1784 }
 0x610   : >> { %v1800_v49 = vadd.f32 %v1783_v56, %v1743_v63  ;;  %v1801_v24 = vadd.f32 %v1785_v19, %v1744_v44  ;;  %v1992_v63 = vmul.f32 %v4269_v17, %v4002_v52  ;;  %v1995_v52 = vmul.f32 %v4243_v60, %v4269_v17 }
 0x611   : >> { %v1996_v56 = vmul.f32 %v4269_v17, %v3787_v59 }
 0x613   : >> { %v1828_v55 = vpop.permute.xlu1 %1827  ;;  %v1830_v45 = vpop.permute.xlu0 %1829 }
 0x614   : >> { %v1851_v10 = vadd.f32 %v1828_v55, %v1794_v54  ;;  %v1852_v39 = vadd.f32 %v1830_v45, %v1795_v57  ;;  %v1993_v54 = vmul.f32 %v4269_v17, %v4012_v53 }
 0x617   : >> { %v1832_v46 = vpop.permute.xlu1 %1831  ;;  %v1834_v11 = vpop.permute.xlu0 %1833 }
 0x618   : >> { %v1853_v58 = vadd.f32 %v1832_v46, %v1796_v37  ;;  %v1854_v50 = vadd.f32 %v1834_v11, %v1797_v21  ;;  %v1994_v37 = vmul.f32 %v4269_v17, %v4466_v43  ;;  %v1997_v43 = vmul.f32 %v4269_v17, %v3949_v2 }
 0x61b   : >> { %v1836_v22 = vpop.permute.xlu1 %1835  ;;  %v1838_v62 = vpop.permute.xlu0 %1837 }
 0x61c   : >> { %v1855_v38 = vadd.f32 %v1836_v22, %v1798_v15  ;;  %v1856_v9 = vadd.f32 %v1838_v62, %v1799_v36 }
 0x61f   : >> { %v1840_v7 = vpop.permute.xlu1 %1839  ;;  %v1842_v41 = vpop.permute.xlu0 %1841 }
 0x620   : >> { %v1857_v1 = vadd.f32 %v1840_v7, %v1800_v49  ;;  %v1858_v34 = vadd.f32 %v1842_v41, %v1801_v24 }
 0x623   : >> { %v1885_v6 = vpop.permute.xlu1 %1884  ;;  %v1887_v26 = vpop.permute.xlu0 %1886 }
 0x624   : >> { %v1908_v13 = vadd.f32 %v1885_v6, %v1851_v10  ;;  %v1909_v35 = vadd.f32 %v1887_v26, %v1852_v39  ;;  %v1998_v10 = vmul.f32 %v4269_v17, %v4046_v14 }
 0x627   : >> { %v1889_v3 = vpop.permute.xlu1 %1888  ;;  %v1891_v25 = vpop.permute.xlu0 %1890 }
 0x628   : >> { %v1910_v23 = vadd.f32 %v1889_v3, %v1853_v58  ;;  %v1911_v12 = vadd.f32 %v1891_v25, %v1854_v50 }
 0x62b   : >> { %v1893_v32 = vpop.permute.xlu1 %1892  ;;  %v1895_v27 = vpop.permute.xlu0 %1894 }
 0x62c   : >> { %v1912_v47 = vadd.f32 %v1893_v32, %v1855_v38  ;;  %v1913_v4 = vadd.f32 %v1895_v27, %v1856_v9 }
 0x62f   : >> { %v1897_v16 = vpop.permute.xlu1 %1896  ;;  %v1899_v48 = vpop.permute.xlu0 %1898 }
 0x630   : >> { %v1914_v18 = vadd.f32 %v1897_v16, %v1857_v1  ;;  %v1915_v30 = vadd.f32 %v1899_v48, %v1858_v34 }
 0x633   : >> { %v1942_v33 = vpop.permute.xlu1 %1941  ;;  %v1944_v40 = vpop.permute.xlu0 %1943 }
 0x634   : >> { %v1965_v8 = vadd.f32 %v1942_v33, %v1908_v13  ;;  %v1966_v0 = vadd.f32 %v1944_v40, %v1909_v35 }
 0x636   : >> { %v1999_v44 = vadd.f32 %v1991_v5, %v1965_v8  ;;  %v2000_v51 = vadd.f32 %v1992_v63, %v1966_v0 }
 0x637   : >> { %v1946_v61 = vpop.permute.xlu1 %1945  ;;  %v1948_v57 = vpop.permute.xlu0 %1947 }
 0x638   : >> { %v1967_v31 = vadd.f32 %v1946_v61, %v1910_v23  ;;  %v1968_v42 = vadd.f32 %v1948_v57, %v1911_v12 }
 0x63a   : >> { %v2001_v15 = vadd.f32 %v1993_v54, %v1967_v31  ;;  %v2002_v20 = vadd.f32 %v1994_v37, %v1968_v42 }
 0x63b   : >> { %v1950_v21 = vpop.permute.xlu1 %1949  ;;  %v1952_v29 = vpop.permute.xlu0 %1951 }
 0x63c   : >> { %v1969_v28 = vadd.f32 %v1950_v21, %v1912_v47  ;;  %v1970_v36 = vadd.f32 %v1952_v29, %v1913_v4 }
 0x63e   : >> { %v2003_v19 = vadd.f32 %v1995_v52, %v1969_v28  ;;  %v2004_v49 = vadd.f32 %v1996_v56, %v1970_v36 }
 0x63f   : >> { %v1954_v24 = vpop.permute.xlu1 %1953  ;;  %v1956_v55 = vpop.permute.xlu0 %1955 }
 0x640   : >> { %v1971_v53 = vadd.f32 %v1954_v24, %v1914_v18  ;;  %v1972_v45 = vadd.f32 %v1956_v55, %v1915_v30 }
 0x642   : >> { %v2005_v39 = vadd.f32 %v1997_v43, %v1971_v53  ;;  %v2006_v46 = vadd.f32 %v1998_v10, %v1972_v45 }
 0x643   : >> { %v2033_v11 = vpop.permute.xlu1 %2032  ;;  %v2035_v58 = vpop.permute.xlu0 %2034 }
 0x644   : >> { %v2056_v23 = vadd.f32 %v2033_v11, %v1999_v44  ;;  %v2057_v47 = vadd.f32 %v2035_v58, %v2000_v51 }
 0x647   : >> { %v2037_v60 = vpop.permute.xlu1 %2036  ;;  %v2039_v50 = vpop.permute.xlu0 %2038 }
 0x648   : >> { %v2058_v4 = vadd.f32 %v2037_v60, %v2001_v15  ;;  %v2059_v8 = vadd.f32 %v2039_v50, %v2002_v20 }
 0x64b   : >> { %v2041_v22 = vpop.permute.xlu1 %2040  ;;  %v2043_v59 = vpop.permute.xlu0 %2042 }
 0x64c   : >> { %v2060_v0 = vadd.f32 %v2041_v22, %v2003_v19  ;;  %v2061_v15 = vadd.f32 %v2043_v59, %v2004_v49 }
 0x64f   : >> { %v2045_v62 = vpop.permute.xlu1 %2044  ;;  %v2047_v38 = vpop.permute.xlu0 %2046 }
 0x650   : >> { %v2062_v21 = vadd.f32 %v2045_v62, %v2005_v39  ;;  %v2063_v56 = vadd.f32 %v2047_v38, %v2006_v46 }
 0x653   : >> { %v4287_v9 = vpop.permute.xlu1 %2240  ;;  %v2090_v7 = vpop.permute.xlu0 %2089 }
 0x654   : >> { %v2113_v27 = vadd.f32 %v2090_v7, %v2056_v23 }
 0x657   : >> { %v2092_v41 = vpop.permute.xlu1 %2091  ;;  %v2094_v1 = vpop.permute.xlu0 %2093 }
 0x658   : >> { %v2114_v30 = vadd.f32 %v2092_v41, %v2057_v47  ;;  %v2115_v33 = vadd.f32 %v2094_v1, %v2058_v4 }
 0x65b   : >> { %v2096_v34 = vpop.permute.xlu1 %2095  ;;  %v2098_v2 = vpop.permute.xlu0 %2097 }
 0x65c   : >> { %v2116_v57 = vadd.f32 %v2096_v34, %v2059_v8  ;;  %v2117_v31 = vadd.f32 %v2098_v2, %v2060_v0 }
 0x65f   : >> { %v2100_v6 = vpop.permute.xlu1 %2099  ;;  %v2102_v26 = vpop.permute.xlu0 %2101 }
 0x660   : >> { %v2118_v19 = vadd.f32 %v2100_v6, %v2061_v15  ;;  %v2119_v24 = vadd.f32 %v2102_v26, %v2062_v21 }
 0x663   : >> { %v2104_v14 = vpop.permute.xlu1 %2103  ;;  %v2147_v17 = vpop.permute.xlu0 %2146 }
 0x664   : >> { %v2170_v16 = vadd.f32 %v2147_v17, %v2113_v27  ;;  %v2120_v22 = vadd.f32 %v2104_v14, %v2063_v56 }
 0x667   : >> { %v2149_v13 = vpop.permute.xlu1 %2148  ;;  %v2151_v35 = vpop.permute.xlu0 %2150 }
 0x668   : >> { %v2171_v5 = vadd.f32 %v2149_v13, %v2114_v30  ;;  %v2172_v63 = vadd.f32 %v2151_v35, %v2115_v33 }
 0x66b   : >> { %v2153_v3 = vpop.permute.xlu1 %2152  ;;  %v2155_v25 = vpop.permute.xlu0 %2154 }
 0x66c   : >> { %v2173_v29 = vadd.f32 %v2153_v3, %v2116_v57  ;;  %v2174_v28 = vadd.f32 %v2155_v25, %v2117_v31 }
 0x66f   : >> { %v2157_v12 = vpop.permute.xlu1 %2156  ;;  %v2159_v32 = vpop.permute.xlu0 %2158 }
 0x670   : >> { %v2175_v39 = vadd.f32 %v2157_v12, %v2118_v19  ;;  %v2176_v11 = vadd.f32 %v2159_v32, %v2119_v24 }
 0x673   : >> { %v2161_v48 = vpop.permute.xlu1 %2160  ;;  %v2204_v18 = vpop.permute.xlu0 %2203 }
 0x674   : >> { %v2227_v40 = vadd.f32 %v2204_v18, %v2170_v16  ;;  %v2177_v34 = vadd.f32 %v2161_v48, %v2120_v22 }
 0x676   : >> { %v2243_v61 = vadd.f32 %v4287_v9, %v2227_v40 }
 0x677   : >> { %v2206_v44 = vpop.permute.xlu1 %2205  ;;  %v2208_v42 = vpop.permute.xlu0 %2207 }
 0x678   : >> { %v2259_v54 = vmul.f32 0.01, %v2243_v61  ;;  %v2228_v37 = vadd.f32 %v2206_v44, %v2171_v5  ;;  %v2229_v51 = vadd.f32 %v2208_v42, %v2172_v63  ;;  %vm2251_vm12 = vcmp.ge.f32.partialorder %v2243_v61, 0.0 }
 0x67a   : >> { %v2244_v36 = vadd.f32 %v4287_v9, %v2228_v37  ;;  %v2245_v20 = vadd.f32 %v4287_v9, %v2229_v51  ;;  %v2267_v52 = vsel %vm2251_vm12, %v2243_v61, %v2259_v54 }
 0x67b   : >> { %v2210_v55 = vpop.permute.xlu1 %2209  ;;  %2283 = vrot.lane.b32.xlu0 %v2267_v52, %s3085_s7  ;;  %v2212_v53 = vpop.permute.xlu0 %2211 }
 0x67c   : >> { %v2260_v45 = vmul.f32 0.01, %v2244_v36  ;;  %v2261_v43 = vmul.f32 0.01, %v2245_v20  ;;  %v2230_v10 = vadd.f32 %v2210_v55, %v2173_v29  ;;  %v2231_v49 = vadd.f32 %v2212_v53, %v2174_v28 }
 0x67d   : >> { %vm2252_vm13 = vcmp.ge.f32.partialorder %v2244_v36, 0.0  ;;  %vm2253_vm14 = vcmp.ge.f32.partialorder %v2245_v20, 0.0 }
 0x67e   : >> { %v2246_v58 = vadd.f32 %v4287_v9, %v2230_v10  ;;  %v2247_v60 = vadd.f32 %v4287_v9, %v2231_v49  ;;  %v2268_v46 = vsel %vm2252_vm13, %v2244_v36, %v2260_v45  ;;  %v2269_v50 = vsel %vm2253_vm14, %v2245_v20, %v2261_v43 }
 0x67f   : >> { %v2214_v59 = vpop.permute.xlu1 %2213  ;;  %2285 = vrot.lane.b32.xlu1 %v2268_v46, %s3085_s7  ;;  %2287 = vrot.lane.b32.xlu0 %v2269_v50, %s3085_s7  ;;  %v2216_v62 = vpop.permute.xlu0 %2215 }
 0x680   : >> { %v2262_v38 = vmul.f32 0.01, %v2246_v58  ;;  %v2263_v7 = vmul.f32 0.01, %v2247_v60  ;;  %v2232_v41 = vadd.f32 %v2214_v59, %v2175_v39  ;;  %v2233_v1 = vadd.f32 %v2216_v62, %v2176_v11 }
 0x681   : >> { %vm2254_vm15 = vcmp.ge.f32.partialorder %v2246_v58, 0.0  ;;  %vm2255_vm0 = vcmp.ge.f32.partialorder %v2247_v60, 0.0 }
 0x682   : >> { %v2248_v2 = vadd.f32 %v4287_v9, %v2232_v41  ;;  %v2249_v6 = vadd.f32 %v4287_v9, %v2233_v1  ;;  %v2270_v26 = vsel %vm2254_vm15, %v2246_v58, %v2262_v38  ;;  %v2271_v17 = vsel %vm2255_vm0, %v2247_v60, %v2263_v7 }
 0x683   : >> { %v2218_v14 = vpop.permute.xlu1 %2217  ;;  %2289 = vrot.lane.b32.xlu1 %v2270_v26, %s3085_s7  ;;  %2291 = vrot.lane.b32.xlu0 %v2271_v17, %s3085_s7 }
 0x684   : >> { %v2264_v13 = vmul.f32 0.01, %v2248_v2  ;;  %v2265_v35 = vmul.f32 0.01, %v2249_v6  ;;  %v2234_v3 = vadd.f32 %v2218_v14, %v2177_v34  ;;  %vm2256_vm1 = vcmp.ge.f32.partialorder %v2248_v2, 0.0 }
 0x685   : >> { %vm2257_vm2 = vcmp.ge.f32.partialorder %v2249_v6, 0.0 }
 0x686   : >> { %v2250_v25 = vadd.f32 %v4287_v9, %v2234_v3  ;;  %v2272_v23 = vsel %vm2256_vm1, %v2248_v2, %v2264_v13  ;;  %v2273_v12 = vsel %vm2257_vm2, %v2249_v6, %v2265_v35 }
 0x687   : >> { %2293 = vrot.lane.b32.xlu1 %v2272_v23, %s3085_s7  ;;  %2295 = vrot.lane.b32.xlu0 %v2273_v12, %s3085_s7 }
 0x688   : >> { %v2266_v32 = vmul.f32 0.01, %v2250_v25  ;;  %vm2258_vm3 = vcmp.ge.f32.partialorder %v2250_v25, 0.0 }
 0x68a   : >> { %v2274_v27 = vsel %vm2258_vm3, %v2250_v25, %v2266_v32 }
 0x68b   : >> { %2297 = vrot.lane.b32.xlu1 %v2274_v27, %s3085_s7 }
 0x6ed   : >> { %v2284_v47 = vpop.permute.xlu0 %2283 }
 0x6ee   : >> { %2307 = vst.msk [vmem:[#allocation2 + $0x10] sm:$0xff] %vm912_vm11, %v2284_v47 }
 0x6f1   : >> { %v2286_v4 = vpop.permute.xlu1 %2285  ;;  %v2288_v16 = vpop.permute.xlu0 %2287 }
 0x6f2   : >> { %2308 = vst.msk [vmem:[#allocation2 + $0x18] sm:$0xff] %vm912_vm11, %v2286_v4  ;;  %2309 = vst.msk [vmem:[#allocation2 + $0x20] sm:$0xff] %vm912_vm11, %v2288_v16 }
 0x6f5   : >> { %v2290_v9 = vpop.permute.xlu1 %2289  ;;  %v2292_v48 = vpop.permute.xlu0 %2291  ;;  %v2315_v8 = vld [vmem:[#allocation2 + $0x10] sm:$0xff] (%p923_p12) }
 0x6f6   : >> { %2310 = vst.msk [vmem:[#allocation2 + $0x28] sm:$0xff] %vm912_vm11, %v2290_v9  ;;  %2311 = vst.msk [vmem:[#allocation2 + $0x30] sm:$0xff] %vm912_vm11, %v2292_v48  ;;  %2331 = vrot.lane.b32.xlu0 (%p923_p12), %v2315_v8, %s3086_s9 }
 0x6f9   : >> { %v2294_v18 = vpop.permute.xlu1 %2293  ;;  %v2296_v30 = vpop.permute.xlu0 %2295  ;;  %v2317_v40 = vld [vmem:[#allocation2 + $0x20] sm:$0xff] (%p923_p12)  ;;  %v2316_v5 = vld [vmem:[#allocation2 + $0x18] sm:$0xff] (%p923_p12) }
 0x6fa   : >> { %2312 = vst.msk [vmem:[#allocation2 + $0x38] sm:$0xff] %vm912_vm11, %v2294_v18  ;;  %2313 = vst.msk [vmem:[#allocation2 + $0x40] sm:$0xff] %vm912_vm11, %v2296_v30  ;;  %925 = sbr.rel (!%p923_p12) target bundleno = 558 (0x22e), region = 146  ;;  %2335 = vrot.lane.b32.xlu1 (%p923_p12), %v2317_v40, %s3086_s9  ;;  %2333 = vrot.lane.b32.xlu0 (%p923_p12), %v2316_v5, %s3086_s9 }
 0x6fd   : >> { %v2298_v33 = vpop.permute.xlu1 %2297  ;;  %v2318_v0 = vld [vmem:[#allocation2 + $0x28] sm:$0xff] (%p923_p12)  ;;  %v2319_v61 = vld [vmem:[#allocation2 + $0x30] sm:$0xff] (%p923_p12) }
 0x6fe   : >> { %2314 = vst.msk [vmem:[#allocation2 + $0x48] sm:$0xff] %vm912_vm11, %v2298_v33  ;;  %2337 = vrot.lane.b32.xlu1 (%p923_p12), %v2318_v0, %s3086_s9  ;;  %2339 = vrot.lane.b32.xlu0 (%p923_p12), %v2319_v61, %s3086_s9 }
 0x701   : > { %v2320_v63 = vld [vmem:[#allocation2 + $0x38] sm:$0xff]  ;;  %v2321_v31 = vld [vmem:[#allocation2 + $0x40] sm:$0xff] }
 0x702   : > { %2341 = vrot.lane.b32.xlu1 %v2320_v63, %s3086_s9  ;;  %2343 = vrot.lane.b32.xlu0 %v2321_v31, %s3086_s9 }
 0x705   : > { %v2322_v57 = vld [vmem:[#allocation2 + $0x48] sm:$0xff] }
 0x706   : > { %2345 = vrot.lane.b32.xlu1 %v2322_v57, %s3086_s9 }
 0x768   : > { %v2332_v42 = vpop.permute.xlu0 %2331 }
 0x769   : > { %2356 = vst.msk [vmem:[%s3207_s12] sm:$0xff] %vm2355_vm4, %v2332_v42 }
 0x76c   : > { %v2336_v44 = vpop.permute.xlu1 %2335  ;;  %v2334_v37 = vpop.permute.xlu0 %2333 }
 0x76d   : > { %2358 = vst.msk [vmem:[%s3207_s12 + $0x10] sm:$0xff] %vm2355_vm4, %v2336_v44  ;;  %2357 = vst.msk [vmem:[%s3207_s12 + $0x8] sm:$0xff] %vm2355_vm4, %v2334_v37 }
 0x770   : > { %v2338_v54 = vpop.permute.xlu1 %2337  ;;  %v2340_v15 = vpop.permute.xlu0 %2339 }
 0x771   : > { %2359 = vst.msk [vmem:[%s3207_s12 + $0x18] sm:$0xff] %vm2355_vm4, %v2338_v54  ;;  %2360 = vst.msk [vmem:[%s3207_s12 + $0x20] sm:$0xff] %vm2355_vm4, %v2340_v15 }
 0x774   : > { %v2342_v51 = vpop.permute.xlu1 %2341  ;;  %v2344_v29 = vpop.permute.xlu0 %2343 }
 0x775   : > { %2361 = vst.msk [vmem:[%s3207_s12 + $0x28] sm:$0xff] %vm2355_vm4, %v2342_v51  ;;  %2362 = vst.msk [vmem:[%s3207_s12 + $0x30] sm:$0xff] %vm2355_vm4, %v2344_v29 }
 0x778   : > { %v2346_v21 = vpop.permute.xlu1 %2345 }
 0x779   : > { %2363 = vst.msk [vmem:[%s3207_s12 + $0x38] sm:$0xff] %vm2355_vm4, %v2346_v21 }
 0x77a   : > { %2944 = shalt.err (!%p2941_p7)
}
 0x77b   : > { %s2945_s30 = scalar_lea.hbm %s4333_s14, 1024  ;;  %s2949_s26 = scalar_lea.hbm %s4389_s5, 2048 }
 0x77c   : > { %p2946_p8 = scmp.ne.s32.totalorder %s4333_s14, %s2945_s30  ;;  %p2950_p11 = scmp.lt.u32.totalorder %s4333_s14, %s4389_s5 }
 0x77d   : > { %p2951_p12 = scmp.lt.u32.totalorder %s2949_s26, %s2945_s30  ;;  %p2953_p0 = scmp.lt.u32.totalorder %s2945_s30, %s4333_s14 }
 0x77e   : > { %p2947_p9 = pnand %p2946_p8, %p3158_p5 }
 0x77f   : > { %p2952_p13 = por %p2951_p12, %p2950_p11 }
 0x780   : > { %p2948_p10 = pneg %p2947_p9 }
 0x781   : > { %p2954_p1 = por %p2953_p0, %p2952_p13 }
 0x783   : > { %p2955_p2 = pnand %p2954_p1, %p2948_p10 }
 0x785   : > { %2958 = shalt.err (!%p2955_p2)
}
 0x786   : > { %s3088_s9 = smov 128   ;;  %s3089_s8 = smov 8  }
 0x787   : > { %2787 = dma.vmem_to_hbm [thread:$0]  (%p3158_p5), %s4335_s10, 1024, %s4333_s14, %s4343_s22, %s3088_s9, %s3088_s9, %s3089_s8  }
 0x788 PF: > { %p2793_p3 = scmp.ge.s32.totalorder %s3033_s21, 2  ;;  %s2393_s11 = sand.u32 1, %s3021_s18  }
 0x789   : > { %s2394_s13 = scalar_lea.sflag [#allocation4], %s2393_s11 }
 0x78a   : > { %p2790_p4 = pnand %p2793_p3, %p3162_p6 }
 0x78c   : > { %3016 = dma.done.wait (!%p2790_p4), %s2394_s13, 1024  }
 0x78d   : > { %3018 = vsyncadd (!%p2790_p4), %s2394_s13, 4294966272  ;;  %p15_p7 = scmp.ge.s32.totalorder %s3145_s24, 4   ;;  %s4505_s18 = smov %s3025_s19 }
 0x78e   : > { %s4506_s19 = smov %s3029_s20  ;;  %s4507_s20 = smov %s3156_s27 }
 0x78f   : > { %s4508_s21 = smov %s3145_s24  ;;  %17 = sbr.rel (!%p15_p7) target bundleno = 3 (0x3), region = 157 }
 0x796   :  { %2399 = vsyncpa [#allocation4], 1 }
 0x797   :  { %2401 = vsyncpa [#allocation4 + $0x1], 1 }

</bundles_post_ra>
